<compile_context>
chip_gen: v7x
topology: tpu7x:2x2x1
jax: 0.10.0
libtpu: 0.0.40
codegen_flags: <defaults>
</compile_context>

<pallas_src>
import functools
import math

import jax
import jax.numpy as jnp
from jax.experimental import pallas as pl
from jax.experimental.pallas import tpu as pltpu

LN_EPS = 1e-5


def _gelu(x):
    # GLM uses the tanh approximation of GELU (tanh goes to the EUP).
    return 0.5 * x * (1.0 + jnp.tanh(0.7978845608028654 * (x + 0.044715 * x * x * x)))


def _largest_divisor(n, cap):
    cap = max(1, min(int(cap), int(n)))
    for d in range(cap, 0, -1):
        if n % d == 0:
            return d
    return 1


@functools.lru_cache(maxsize=None)
def _vmem_limit_bytes():
    # Generation-specific VMEM budget: ~75% of physical (96 MiB on 128-MiB v5e/v6e,
    # 48 MiB on v7x's 64 MiB).  Falls back to the conservative 48 MiB.
    try:
        cap = int(pltpu.get_tpu_info().vmem_capacity_bytes)
    except Exception:
        cap = 64 * 1024 * 1024
    return max(32 * 1024 * 1024, (cap * 3) // 4)


@functools.lru_cache(maxsize=None)
def _buffered_supported():
    # Probe pipeline_mode=pl.Buffered(1) end-to-end so a missing/rejecting API path
    # degrades to default double-buffering instead of crashing the run.
    try:
        spec = pl.BlockSpec((8, 128), lambda i: (0, 0), pipeline_mode=pl.Buffered(1))

        def _k(x_ref, o_ref):
            o_ref[...] = x_ref[...] * 2.0

        out = pl.pallas_call(
            _k,
            out_shape=jax.ShapeDtypeStruct((16, 128), jnp.float32),
            grid=(2,),
            in_specs=[spec],
            out_specs=pl.BlockSpec((8, 128), lambda i: (i, 0)),
        )(jnp.ones((8, 128), jnp.float32))
        jax.block_until_ready(out)
        return True
    except Exception:
        return False


def _block_spec(shape, index_map, buffer_count=None):
    if buffer_count is not None and _buffered_supported():
        return pl.BlockSpec(shape, index_map, pipeline_mode=pl.Buffered(buffer_count))
    return pl.BlockSpec(shape, index_map)


# ----------------------------------------------------------------------------
# Pallas kernel: one GLM transformer layer.  Grid over blocks of TB samples;
# per-sample sep (attention separation index) is scalar-prefetched into SMEM and
# the [S, S] additive mask bias is generated in-kernel (no [BC, S, S] HBM mask).
# ----------------------------------------------------------------------------
def _make_layer_kernel(num_heads, head_dim, tb, seq_len, mlp_chunk):
    H = num_heads * head_dim
    S = seq_len
    H4 = 4 * H

    def kernel(sep_ref, h_ref,
               ln1_g_ref, ln1_b_ref, wqkv_ref, bqkv_ref, wdense_ref, bdense_ref,
               ln2_g_ref, ln2_b_ref, w1_ref, b1_ref, w2_ref, b2_ref,
               out_ref):
        blk = pl.program_id(0)
        x = h_ref[...].reshape(tb * S, H)                     # [TB*S, H] f32 (leading-dim merge)

        # --- input layernorm (f32) ---
        mu = jnp.mean(x, axis=-1, keepdims=True)
        var = jnp.mean((x - mu) ** 2, axis=-1, keepdims=True)
        xn = (x - mu) * jax.lax.rsqrt(var + LN_EPS)
        xn = xn * ln1_g_ref[...] + ln1_b_ref[...]
        xn_bf = xn.astype(jnp.bfloat16)

        # --- fused QKV projection (bf16 operands, f32 accumulation) ---
        # 1/sqrt(head_dim) is already folded into the Q columns of wqkv/bqkv.
        qkv = jnp.dot(xn_bf, wqkv_ref[...],
                      preferred_element_type=jnp.float32) + bqkv_ref[...]
        q = qkv[:, 0:H]
        k = qkv[:, H:2 * H]
        v = qkv[:, 2 * H:3 * H]

        # --- per-sample, per-head masked softmax attention ---
        # Per-head output is accumulated directly through the sliced wdense rows
        # (no NH-way lane concat).  TODO(synk): a fully batched-head einsum needs a
        # lane-dim-splitting reshape Mosaic does not reliably lower at small head_dim;
        # for very long S this should switch to flash-style KV tiling.
        row = jax.lax.broadcasted_iota(jnp.int32, (S, S), 0)
        col = jax.lax.broadcasted_iota(jnp.int32, (S, S), 1)
        attn_rows = []
        for t in range(tb):
            sep = sep_ref[blk * tb + t]
            visible = jnp.logical_or(col <= row, col < sep)
            bias = jnp.where(visible, 0.0, -10000.0)          # [S, S] f32, GLM "ltor" mask
            r0 = t * S
            acc = jnp.zeros((S, H), jnp.float32)
            for hd in range(num_heads):
                c0 = hd * head_dim
                qh = q[r0:r0 + S, c0:c0 + head_dim].astype(jnp.bfloat16)
                kh = k[r0:r0 + S, c0:c0 + head_dim].astype(jnp.bfloat16)
                vh = v[r0:r0 + S, c0:c0 + head_dim].astype(jnp.bfloat16)
                # contract on the last dim of both operands: no materialized kh.T
                scores = jax.lax.dot_general(
                    qh, kh, dimension_numbers=(((1,), (1,)), ((), ())),
                    preferred_element_type=jnp.float32)       # [S, S] f32
                scores = scores + bias
                smax = jnp.max(scores, axis=-1, keepdims=True)
                p = jnp.exp(scores - smax)
                p = p * pl.reciprocal(jnp.sum(p, axis=-1, keepdims=True), approx=True)
                ctx = jnp.dot(p.astype(jnp.bfloat16), vh,
                              preferred_element_type=jnp.float32)       # [S, hd]
                acc = acc + jnp.dot(ctx.astype(jnp.bfloat16),
                                    wdense_ref[c0:c0 + head_dim, :],
                                    preferred_element_type=jnp.float32)  # [S, H]
            attn_rows.append(acc)
        attn_out = attn_rows[0] if tb == 1 else jnp.concatenate(attn_rows, axis=0)
        attn_out = attn_out + bdense_ref[...]
        ln_input = x + attn_out

        # --- post-attention layernorm (f32) ---
        mu2 = jnp.mean(ln_input, axis=-1, keepdims=True)
        var2 = jnp.mean((ln_input - mu2) ** 2, axis=-1, keepdims=True)
        yn = (ln_input - mu2) * jax.lax.rsqrt(var2 + LN_EPS)
        yn = yn * ln2_g_ref[...] + ln2_b_ref[...]
        yn_bf = yn.astype(jnp.bfloat16)

        # --- MLP, chunked over the 4H dimension (no full [TB*S, 4H] f32 intermediate) ---
        ffn = jnp.zeros((tb * S, H), jnp.float32)
        for c0 in range(0, H4, mlp_chunk):
            h1c = jnp.dot(yn_bf, w1_ref[:, c0:c0 + mlp_chunk],
                          preferred_element_type=jnp.float32) + b1_ref[:, c0:c0 + mlp_chunk]
            h1c = _gelu(h1c)
            ffn = ffn + jnp.dot(h1c.astype(jnp.bfloat16), w2_ref[c0:c0 + mlp_chunk, :],
                                preferred_element_type=jnp.float32)
        ffn = ffn + b2_ref[...]

        out_ref[...] = (ln_input + ffn).reshape(tb, S, H)

    return kernel


_LAYER_PARAM_ORDER = ("ln1_g", "ln1_b", "wqkv", "bqkv", "wdense", "bdense",
                      "ln2_g", "ln2_b", "w1", "b1", "w2", "b2")


def glm_layer(h, sep, layer_params, num_heads, tb_cap=4):
    BC, S, H = h.shape
    head_dim = H // num_heads
    # Block several samples per grid step (fills MXU M dim at short S); fall back to
    # one sample/step if S is not sublane-aligned (keeps reshapes layout-free).
    tb = _largest_divisor(BC, tb_cap) if S % 8 == 0 else 1
    mlp_chunk = 4 * H if 4 * H <= 2048 else _largest_divisor(4 * H, 2048)
    kernel = _make_layer_kernel(num_heads, head_dim, tb, S, mlp_chunk)

    weight_args = [layer_params[n] for n in _LAYER_PARAM_ORDER]

    def _const_map(nd):
        return lambda i, sep_ref: (0,) * nd

    # Constant-index weight blocks: single-buffered (halves resident weight VMEM).
    # TODO(synk): at H >= ~1536 on v7x even single-buffered weights exceed 64 MiB VMEM;
    # tile wqkv over 3H and w1/w2 over 4H with an extra grid axis / emit_pipeline.
    weight_specs = [_block_spec(w.shape, _const_map(w.ndim), buffer_count=1)
                    for w in weight_args]

    grid_spec = pltpu.PrefetchScalarGridSpec(
        num_scalar_prefetch=1,
        grid=(BC // tb,),
        in_specs=[pl.BlockSpec((tb, S, H), lambda i, sep_ref: (i, 0, 0))] + weight_specs,
        out_specs=pl.BlockSpec((tb, S, H), lambda i, sep_ref: (i, 0, 0)),
    )
    # TODO(synk): optionally keep the inter-layer residual stream as bf16 in HBM to halve
    # activation DMA (minor numerics trade); kept f32 here for fidelity.
    return pl.pallas_call(
        kernel,
        out_shape=jax.ShapeDtypeStruct((BC, S, H), jnp.float32),
        grid_spec=grid_spec,
        compiler_params=pltpu.CompilerParams(
            dimension_semantics=("parallel",),
            vmem_limit_bytes=_vmem_limit_bytes()),
    )(sep, h, *weight_args)


# ----------------------------------------------------------------------------
# Pallas kernel: final LN + streamed vocab projection with online log-sum-exp +
# target-logit gather + logit-mask weighted sum (multi-token cloze score).
# Grid = (BC//TBC, V//TV): TBC samples share every streamed [TV, H] embedding tile
# (cuts embedding HBM traffic by TBC); [S, V] log-probs are never materialized.
# ----------------------------------------------------------------------------
def _make_cloze_kernel(S, TV, tbc, H):
    rows = tbc * S

    def kernel(h_ref, lnf_g_ref, lnf_b_ref, emb_ref, tgt_ref, lmask_ref, out_ref,
               xn_ref, m_ref, l_ref, t_ref):
        v = pl.program_id(1)

        @pl.when(v == 0)
        def _():
            # final layernorm, computed once per sample block and cached in bf16 scratch
            x = h_ref[...].reshape(rows, H)                   # [TBC*S, H] f32
            mu = jnp.mean(x, axis=-1, keepdims=True)
            var = jnp.mean((x - mu) ** 2, axis=-1, keepdims=True)
            xn = (x - mu) * jax.lax.rsqrt(var + LN_EPS)
            xn = xn * lnf_g_ref[...] + lnf_b_ref[...]
            xn_ref[...] = xn.astype(jnp.bfloat16)
            m_ref[...] = jnp.full((rows, 1), -1e30, dtype=jnp.float32)
            l_ref[...] = jnp.zeros((rows, 1), jnp.float32)
            t_ref[...] = jnp.zeros((rows, 1), jnp.float32)

        # logits for this vocab tile: contract on H against the [TV, H] embedding rows
        # TODO(synk): v7x-only fp8 (e4m3 + per-row scale) embeddings would halve streaming
        # bytes and double MXU throughput here.
        logits = jax.lax.dot_general(
            xn_ref[...], emb_ref[...],
            dimension_numbers=(((1,), (1,)), ((), ())),
            preferred_element_type=jnp.float32)               # [TBC*S, TV] f32

        # online (streaming) log-sum-exp over the vocab
        m_prev = m_ref[...]
        m_new = jnp.maximum(m_prev, jnp.max(logits, axis=-1, keepdims=True))
        l_ref[...] = (l_ref[...] * jnp.exp(m_prev - m_new)
                      + jnp.sum(jnp.exp(logits - m_new), axis=-1, keepdims=True))
        m_ref[...] = m_new

        # accumulate the target logit from whichever tile contains target_id
        tgt = tgt_ref[...].reshape(rows, 1)                   # [TBC*S, 1] int32
        vocab_ids = v * TV + jax.lax.broadcasted_iota(jnp.int32, (rows, TV), 1)
        t_ref[...] = t_ref[...] + jnp.sum(
            jnp.where(vocab_ids == tgt, logits, 0.0), axis=-1, keepdims=True)

        @pl.when(v == pl.num_programs(1) - 1)
        def _():
            lse = m_ref[...] + jnp.log(l_ref[...])
            picked = t_ref[...] - lse                          # [TBC*S, 1] target log-probs
            weighted = picked * lmask_ref[...].reshape(rows, 1)
            out_ref[...] = jnp.sum(weighted.reshape(tbc, S, 1), axis=1, keepdims=True)

    return kernel


def cloze_score(h, lnf_g, lnf_b, emb_bf, target_ids, logit_mask, tv=None, tbc_cap=8):
    BC, S, H = h.shape
    V = emb_bf.shape[0]
    if tv is None:
        # Larger vocab tiles on 128-MiB parts (v5e/v6e); smaller on v7x (64 MiB).
        budget = 4096 if _vmem_limit_bytes() >= 96 * 1024 * 1024 else 2048
        tv = _largest_divisor(V, budget)
    assert V % tv == 0, (V, tv)
    tbc = _largest_divisor(BC, tbc_cap) if S % 8 == 0 else 1
    num_v_tiles = V // tv
    kernel = _make_cloze_kernel(S, tv, tbc, H)

    return pl.pallas_call(
        kernel,
        out_shape=jax.ShapeDtypeStruct((BC, 1, 1), jnp.float32),
        grid=(BC // tbc, num_v_tiles),
        in_specs=[
            # blocks that are constant across the inner vocab axis: single-buffered
            _block_spec((tbc, S, H), lambda i, v: (i, 0, 0), buffer_count=1),
            _block_spec((1, H), lambda i, v: (0, 0), buffer_count=1),
            _block_spec((1, H), lambda i, v: (0, 0), buffer_count=1),
            # the streamed embedding tile keeps default double-buffering
            pl.BlockSpec((tv, H), lambda i, v: (v, 0)),
            _block_spec((tbc, S, 1), lambda i, v: (i, 0, 0), buffer_count=1),
            _block_spec((tbc, S, 1), lambda i, v: (i, 0, 0), buffer_count=1),
        ],
        out_specs=pl.BlockSpec((tbc, 1, 1), lambda i, v: (i, 0, 0)),
        scratch_shapes=[pltpu.VMEM((tbc * S, H), jnp.bfloat16),   # cached LN output
                        pltpu.VMEM((tbc * S, 1), jnp.float32),    # running max
                        pltpu.VMEM((tbc * S, 1), jnp.float32),    # running sum(exp)
                        pltpu.VMEM((tbc * S, 1), jnp.float32)],   # target logit
        compiler_params=pltpu.CompilerParams(
            dimension_semantics=("parallel", "arbitrary"),
            vmem_limit_bytes=_vmem_limit_bytes()),
    )(h, lnf_g, lnf_b, emb_bf,
      target_ids[..., None].astype(jnp.int32),
      logit_mask[..., None].astype(jnp.float32))


# ----------------------------------------------------------------------------
# Glue (plain JAX): embeddings, reshapes, parameter prep.
# ----------------------------------------------------------------------------
def _embed(input_ids, position_ids, params):
    h = jnp.take(params["word_emb"], input_ids, axis=0)                     # [BC, S, H]
    pos_ids = position_ids[:, 0]
    block_ids = position_ids[:, 1]
    h = h + jnp.take(params["pos_emb"], pos_ids, axis=0)
    h = h + jnp.take(params["block_pos_emb"], block_ids, axis=0)
    return h.astype(jnp.float32)


def prepare_params(params, num_heads):
    """Fold 1/sqrt(head_dim) into the Q columns of wqkv/bqkv (attention_scale=1.0)."""
    H = params["lnf_g"].shape[-1]
    head_dim = H // num_heads
    scale = 1.0 / math.sqrt(head_dim)
    col_scale = jnp.concatenate([jnp.full((H,), scale, jnp.float32),
                                 jnp.ones((2 * H,), jnp.float32)])[None, :]
    new = dict(params)
    layers = []
    for lp in params["layers"]:
        lp = dict(lp)
        lp["wqkv"] = (lp["wqkv"].astype(jnp.float32) * col_scale).astype(lp["wqkv"].dtype)
        lp["bqkv"] = lp["bqkv"].astype(jnp.float32) * col_scale
        layers.append(lp)
    new["layers"] = layers
    return new


def glm_multi_token_cloze_forward(params, input_ids, position_ids, attention_mask,
                                  target_ids, logit_mask, num_heads, vocab_tile=None):
    B, C, S = input_ids.shape
    BC = B * C
    input_ids = input_ids.reshape(BC, S)
    position_ids = position_ids.reshape(BC, 2, S)
    sep = attention_mask.reshape(BC).astype(jnp.int32)     # GLM "sep" semantics
    target_ids = target_ids.reshape(BC, S)
    logit_mask = logit_mask.reshape(BC, S)

    h = _embed(input_ids, position_ids, params)

    for layer_params in params["layers"]:
        h = glm_layer(h, sep, layer_params, num_heads)

    # word_emb stays [V, H]; convert once to bf16 for the streamed vocab projection
    emb_bf = params["word_emb"].astype(jnp.bfloat16)
    scores = cloze_score(h, params["lnf_g"], params["lnf_b"], emb_bf,
                         target_ids, logit_mask, tv=vocab_tile)
    return scores.reshape(B, C)   # logits reshaped to [-1, num_choices]; no mems (memory_length=0)


# ----------------------------------------------------------------------------
# Deterministic synthetic parameter init (normal std=0.02, LN gamma=1, beta=0).
# Matmul weights are stored in bf16 (MXU-native); biases/LN/embeddings in f32.
# ----------------------------------------------------------------------------
def init_params(key, num_layers, vocab_size, hidden_size, max_seq_len):
    H = hidden_size
    std = 0.02
    keys = jax.random.split(key, 3 + num_layers)
    params = {
        "word_emb": std * jax.random.normal(keys[0], (vocab_size, H), jnp.float32),
        "pos_emb": std * jax.random.normal(keys[1], (max_seq_len + 1, H), jnp.float32),
        "block_pos_emb": std * jax.random.normal(keys[2], (max_seq_len + 1, H), jnp.float32),
        "lnf_g": jnp.ones((1, H), jnp.float32),
        "lnf_b": jnp.zeros((1, H), jnp.float32),
        "layers": [],
    }
    for l in range(num_layers):
        lk = jax.random.split(keys[3 + l], 4)
        params["layers"].append({
            "ln1_g": jnp.ones((1, H), jnp.float32),
            "ln1_b": jnp.zeros((1, H), jnp.float32),
            "wqkv": (std * jax.random.normal(lk[0], (H, 3 * H), jnp.float32)).astype(jnp.bfloat16),
            "bqkv": jnp.zeros((1, 3 * H), jnp.float32),
            "wdense": (std * jax.random.normal(lk[1], (H, H), jnp.float32)).astype(jnp.bfloat16),
            "bdense": jnp.zeros((1, H), jnp.float32),
            "ln2_g": jnp.ones((1, H), jnp.float32),
            "ln2_b": jnp.zeros((1, H), jnp.float32),
            "w1": (std * jax.random.normal(lk[2], (H, 4 * H), jnp.float32)).astype(jnp.bfloat16),
            "b1": jnp.zeros((1, 4 * H), jnp.float32),
            "w2": (std * jax.random.normal(lk[3], (4 * H, H), jnp.float32)).astype(jnp.bfloat16),
            "b2": jnp.zeros((1, H), jnp.float32),
        })
    return params


if __name__ == "__main__":
    # Small, module-consistent shapes.
    B, C, S = 2, 2, 8          # batch, num_choices, seq
    H, NH = 32, 2              # hidden, attention heads
    V = 64                     # vocab
    L = 2                      # num transformer layers
    MAX_SEQ = 16
    VOCAB_TILE = 32            # exercises the multi-tile streaming LSE path (V // 32 = 2 tiles)

    # Warm the hardware probes (cached) before tracing.
    _ = _vmem_limit_bytes()
    _ = _buffered_supported()

    key = jax.random.PRNGKey(0)
    kp, k1, k2, k3, k4, k5 = jax.random.split(key, 6)

    params = prepare_params(init_params(kp, L, V, H, MAX_SEQ), num_heads=NH)

    input_ids = jax.random.randint(k1, (B, C, S), 0, V, dtype=jnp.int32)
    # position_ids: [B, C, 2, S]  (row 0 = positions, row 1 = block positions)
    pos = jnp.broadcast_to(jnp.arange(S, dtype=jnp.int32), (B, C, S))
    block_pos = jax.random.randint(k2, (B, C, S), 0, MAX_SEQ, dtype=jnp.int32)
    position_ids = jnp.stack([pos, block_pos], axis=2)
    # attention_mask: per-sample separation index (GLM "sep" semantics)
    attention_mask = jax.random.randint(k3, (B, C), 1, S, dtype=jnp.int32)
    target_ids = jax.random.randint(k4, (B, C, S), 0, V, dtype=jnp.int32)
    logit_mask = (jax.random.uniform(k5, (B, C, S)) > 0.3).astype(jnp.float32)

    fwd = jax.jit(functools.partial(glm_multi_token_cloze_forward,
                                    num_heads=NH, vocab_tile=VOCAB_TILE))
    out = fwd(params, input_ids, position_ids, attention_mask, target_ids, logit_mask)
    out = jax.block_until_ready(out)
    assert out.shape == (B, C), out.shape
    assert bool(jnp.all(jnp.isfinite(out)))
    # TODO(synk): prompt_pos / prompt_spell path and transformer memory (mems) are not modeled
    # (max_memory_length=0, prompt_pos=None in this eval-mode forward).
    print("KERNEL_OK")
</pallas_src>

<mosaic_0001>
module attributes {stable_mosaic.version = 11 : i64} {
  func.func @_k(%arg0: i32, %arg1: memref<8x128xf32, #tpu.memory_space<vmem>>, %arg2: memref<8x128xf32, #tpu.memory_space<vmem>>) attributes {dimension_semantics = [#tpu.dimension_semantics<arbitrary>], iteration_bounds = array<i64: 2>, scalar_prefetch = 0 : i64, scratch_operands = 0 : i64, tpu.core_type = #tpu.core_type<tc>, window_params = [{pipeline_mode = #tpu.pipeline_mode<synchronous>, transform_indices = @transform_0, window_bounds = array<i64: 8, 128>}, {transform_indices = @transform_1, window_bounds = array<i64: 8, 128>}]} {
    %c0 = arith.constant 0 : index
    %c0_0 = arith.constant 0 : index
    %0 = vector.load %arg1[%c0, %c0_0] : memref<8x128xf32, #tpu.memory_space<vmem>>, vector<8x128xf32>
    %cst = arith.constant 2.000000e+00 : f32
    %1 = vector.broadcast %cst : f32 to vector<8x128xf32>
    %2 = arith.mulf %0, %1 : vector<8x128xf32>
    %c0_1 = arith.constant 0 : index
    %c0_2 = arith.constant 0 : index
    %3 = vector.load %arg2[%c0_1, %c0_2] : memref<8x128xf32, #tpu.memory_space<vmem>>, vector<8x128xf32>
    tpu.vector_store %arg2[%c0_1, %c0_2], %2 {strides = array<i32>} : memref<8x128xf32, #tpu.memory_space<vmem>>, vector<8x128xf32>,
    return
  }
  func.func @transform_0(%arg0: i32) -> (i32, i32) {
    %c0_i32 = arith.constant 0 : i32
    %c0_i32_0 = arith.constant 0 : i32
    %c0_i32_1 = arith.constant 0 : i32
    return %c0_i32, %c0_i32_0 : i32, i32
  }
  func.func @transform_1(%arg0: i32) -> (i32, i32) {
    %c0_i32 = arith.constant 0 : i32
    %c0_i32_0 = arith.constant 0 : i32
    return %arg0, %c0_i32 : i32, i32
  }
}

module attributes {stable_mosaic.version = 11 : i64} {
  func.func @kernel(%arg0: i32, %arg1: i32, %arg2: memref<4x8x32xf32, #tpu.memory_space<vmem>>, %arg3: memref<1x32xf32, #tpu.memory_space<vmem>>, %arg4: memref<1x32xf32, #tpu.memory_space<vmem>>, %arg5: memref<32x32xbf16, #tpu.memory_space<vmem>>, %arg6: memref<4x8x1xi32, #tpu.memory_space<vmem>>, %arg7: memref<4x8x1xf32, #tpu.memory_space<vmem>>, %arg8: memref<4x1x1xf32, #tpu.memory_space<vmem>>, %arg9: memref<32x32xbf16, #tpu.memory_space<vmem>>, %arg10: memref<32x1xf32, #tpu.memory_space<vmem>>, %arg11: memref<32x1xf32, #tpu.memory_space<vmem>>, %arg12: memref<32x1xf32, #tpu.memory_space<vmem>>) attributes {dimension_semantics = [#tpu.dimension_semantics<parallel>, #tpu.dimension_semantics<arbitrary>], iteration_bounds = array<i64: 1, 2>, scalar_prefetch = 0 : i64, scratch_operands = 4 : i64, tpu.core_type = #tpu.core_type<tc>, window_params = [{transform_indices = @transform_0, window_bounds = array<i64: 4, 8, 32>}, {pipeline_mode = #tpu.pipeline_mode<synchronous>, transform_indices = @transform_1, window_bounds = array<i64: 1, 32>}, {pipeline_mode = #tpu.pipeline_mode<synchronous>, transform_indices = @transform_2, window_bounds = array<i64: 1, 32>}, {transform_indices = @transform_3, window_bounds = array<i64: 32, 32>}, {transform_indices = @transform_4, window_bounds = array<i64: 4, 8, 1>}, {transform_indices = @transform_5, window_bounds = array<i64: 4, 8, 1>}, {transform_indices = @transform_6, window_bounds = array<i64: 4, 1, 1>}]} {
    %c0_i32 = arith.constant 0 : i32
    %0 = arith.cmpi eq, %arg1, %c0_i32 : i32
    %1 = arith.extui %0 : i1 to i32
    %c0_i32_0 = arith.constant 0 : i32
    %2 = arith.cmpi ne, %1, %c0_i32_0 : i32
    scf.if %2 {
      %c0_24 = arith.constant 0 : index
      %c0_25 = arith.constant 0 : index
      %c0_26 = arith.constant 0 : index
      %40 = vector.load %arg2[%c0_24, %c0_25, %c0_26] : memref<4x8x32xf32, #tpu.memory_space<vmem>>, vector<4x8x32xf32>
      %41 = vector.shape_cast %40 : vector<4x8x32xf32> to vector<32x32xf32>
      %cst_27 = arith.constant dense<0.000000e+00> : vector<32xf32>
      %42 = vector.multi_reduction <add>, %41, %cst_27 [1] : vector<32x32xf32> to vector<32xf32>
      %43 = vector.shape_cast %42 : vector<32xf32> to vector<32x1xf32>
      %cst_28 = arith.constant 3.200000e+01 : f32
      %44 = vector.broadcast %cst_28 : f32 to vector<32x1xf32>
      %45 = arith.divf %43, %44 : vector<32x1xf32>
      %46 = vector.broadcast %45 : vector<32x1xf32> to vector<32x32xf32>
      %47 = arith.subf %41, %46 : vector<32x32xf32>
      %48 = arith.mulf %47, %47 : vector<32x32xf32>
      %cst_29 = arith.constant dense<0.000000e+00> : vector<32xf32>
      %49 = vector.multi_reduction <add>, %48, %cst_29 [1] : vector<32x32xf32> to vector<32xf32>
      %50 = vector.shape_cast %49 : vector<32xf32> to vector<32x1xf32>
      %cst_30 = arith.constant 3.200000e+01 : f32
      %51 = vector.broadcast %cst_30 : f32 to vector<32x1xf32>
      %52 = arith.divf %50, %51 : vector<32x1xf32>
      %53 = vector.broadcast %45 : vector<32x1xf32> to vector<32x32xf32>
      %54 = arith.subf %41, %53 : vector<32x32xf32>
      %cst_31 = arith.constant 9.99999974E-6 : f32
      %55 = vector.broadcast %cst_31 : f32 to vector<32x1xf32>
      %56 = arith.addf %52, %55 : vector<32x1xf32>
      %57 = math.rsqrt %56 : vector<32x1xf32>
      %58 = vector.broadcast %57 : vector<32x1xf32> to vector<32x32xf32>
      %59 = arith.mulf %54, %58 : vector<32x32xf32>
      %c0_32 = arith.constant 0 : index
      %c0_33 = arith.constant 0 : index
      %60 = vector.load %arg3[%c0_32, %c0_33] : memref<1x32xf32, #tpu.memory_space<vmem>>, vector<1x32xf32>
      %61 = vector.broadcast %60 : vector<1x32xf32> to vector<32x32xf32>
      %62 = arith.mulf %59, %61 : vector<32x32xf32>
      %c0_34 = arith.constant 0 : index
      %c0_35 = arith.constant 0 : index
      %63 = vector.load %arg4[%c0_34, %c0_35] : memref<1x32xf32, #tpu.memory_space<vmem>>, vector<1x32xf32>
      %64 = vector.broadcast %63 : vector<1x32xf32> to vector<32x32xf32>
      %65 = arith.addf %62, %64 : vector<32x32xf32>
      %66 = arith.truncf %65 : vector<32x32xf32> to vector<32x32xbf16>
      %c0_36 = arith.constant 0 : index
      %c0_37 = arith.constant 0 : index
      %67 = vector.load %arg9[%c0_36, %c0_37] : memref<32x32xbf16, #tpu.memory_space<vmem>>, vector<32x32xbf16>
      tpu.vector_store %arg9[%c0_36, %c0_37], %66 {strides = array<i32>} : memref<32x32xbf16, #tpu.memory_space<vmem>>, vector<32x32xbf16>,
      %cst_38 = arith.constant -1.000000e+30 : f32
      %68 = vector.broadcast %cst_38 : f32 to vector<32x1xf32>
      %c0_39 = arith.constant 0 : index
      %c0_40 = arith.constant 0 : index
      %69 = vector.load %arg10[%c0_39, %c0_40] : memref<32x1xf32, #tpu.memory_space<vmem>>, vector<32x1xf32>
      tpu.vector_store %arg10[%c0_39, %c0_40], %68 {strides = array<i32>} : memref<32x1xf32, #tpu.memory_space<vmem>>, vector<32x1xf32>,
      %cst_41 = arith.constant 0.000000e+00 : f32
      %70 = vector.broadcast %cst_41 : f32 to vector<32x1xf32>
      %c0_42 = arith.constant 0 : index
      %c0_43 = arith.constant 0 : index
      %71 = vector.load %arg11[%c0_42, %c0_43] : memref<32x1xf32, #tpu.memory_space<vmem>>, vector<32x1xf32>
      tpu.vector_store %arg11[%c0_42, %c0_43], %70 {strides = array<i32>} : memref<32x1xf32, #tpu.memory_space<vmem>>, vector<32x1xf32>,
      %cst_44 = arith.constant 0.000000e+00 : f32
      %72 = vector.broadcast %cst_44 : f32 to vector<32x1xf32>
      %c0_45 = arith.constant 0 : index
      %c0_46 = arith.constant 0 : index
      %73 = vector.load %arg12[%c0_45, %c0_46] : memref<32x1xf32, #tpu.memory_space<vmem>>, vector<32x1xf32>
      tpu.vector_store %arg12[%c0_45, %c0_46], %72 {strides = array<i32>} : memref<32x1xf32, #tpu.memory_space<vmem>>, vector<32x1xf32>,
    } else {
    }
    %c0 = arith.constant 0 : index
    %c0_1 = arith.constant 0 : index
    %3 = vector.load %arg9[%c0, %c0_1] : memref<32x32xbf16, #tpu.memory_space<vmem>>, vector<32x32xbf16>
    %c0_2 = arith.constant 0 : index
    %c0_3 = arith.constant 0 : index
    %4 = vector.load %arg5[%c0_2, %c0_3] : memref<32x32xbf16, #tpu.memory_space<vmem>>, vector<32x32xbf16>
    %cst = arith.constant dense<0.000000e+00> : vector<32x32xf32>
    %5 = tpu.matmul %3, %4, %cst {dimension_numbers = #tpu.dot_dimension_numbers<[1], [1], [0], [0], [0, 0, 1, 0], [], []>} : vector<32x32xbf16>, vector<32x32xbf16>, vector<32x32xf32> -> vector<32x32xf32>
    %c0_4 = arith.constant 0 : index
    %c0_5 = arith.constant 0 : index
    %6 = vector.load %arg10[%c0_4, %c0_5] : memref<32x1xf32, #tpu.memory_space<vmem>>, vector<32x1xf32>
    %cst_6 = arith.constant dense<0xFF800000> : vector<32xf32>
    %7 = vector.multi_reduction <maximumf>, %5, %cst_6 [1] : vector<32x32xf32> to vector<32xf32>
    %8 = vector.shape_cast %7 : vector<32xf32> to vector<32x1xf32>
    %9 = arith.maximumf %6, %8 : vector<32x1xf32>
    %c0_7 = arith.constant 0 : index
    %c0_8 = arith.constant 0 : index
    %10 = vector.load %arg11[%c0_7, %c0_8] : memref<32x1xf32, #tpu.memory_space<vmem>>, vector<32x1xf32>
    %11 = arith.subf %6, %9 : vector<32x1xf32>
    %12 = math.exp %11 : vector<32x1xf32>
    %13 = arith.mulf %10, %12 : vector<32x1xf32>
    %14 = vector.broadcast %9 : vector<32x1xf32> to vector<32x32xf32>
    %15 = arith.subf %5, %14 : vector<32x32xf32>
    %16 = math.exp %15 : vector<32x32xf32>
    %cst_9 = arith.constant dense<0.000000e+00> : vector<32xf32>
    %17 = vector.multi_reduction <add>, %16, %cst_9 [1] : vector<32x32xf32> to vector<32xf32>
    %18 = vector.shape_cast %17 : vector<32xf32> to vector<32x1xf32>
    %19 = arith.addf %13, %18 : vector<32x1xf32>
    %c0_10 = arith.constant 0 : index
    %c0_11 = arith.constant 0 : index
    %20 = vector.load %arg11[%c0_10, %c0_11] : memref<32x1xf32, #tpu.memory_space<vmem>>, vector<32x1xf32>
    tpu.vector_store %arg11[%c0_10, %c0_11], %19 {strides = array<i32>} : memref<32x1xf32, #tpu.memory_space<vmem>>, vector<32x1xf32>,
    %c0_12 = arith.constant 0 : index
    %c0_13 = arith.constant 0 : index
    %21 = vector.load %arg10[%c0_12, %c0_13] : memref<32x1xf32, #tpu.memory_space<vmem>>, vector<32x1xf32>
    tpu.vector_store %arg10[%c0_12, %c0_13], %9 {strides = array<i32>} : memref<32x1xf32, #tpu.memory_space<vmem>>, vector<32x1xf32>,
    %c0_14 = arith.constant 0 : index
    %c0_15 = arith.constant 0 : index
    %c0_16 = arith.constant 0 : index
    %22 = vector.load %arg6[%c0_14, %c0_15, %c0_16] : memref<4x8x1xi32, #tpu.memory_space<vmem>>, vector<4x8x1xi32>
    %23 = vector.shape_cast %22 : vector<4x8x1xi32> to vector<32x1xi32>
    %c32_i32 = arith.constant 32 : i32
    %24 = arith.muli %arg1, %c32_i32 : i32
    %25 = tpu.iota {dimensions = array<i32: 1>} : vector<32x32xi32>
    %26 = vector.broadcast %24 : i32 to vector<32x32xi32>
    %27 = arith.addi %26, %25 : vector<32x32xi32>
    %c0_17 = arith.constant 0 : index
    %c0_18 = arith.constant 0 : index
    %28 = vector.load %arg12[%c0_17, %c0_18] : memref<32x1xf32, #tpu.memory_space<vmem>>, vector<32x1xf32>
    %29 = vector.broadcast %23 : vector<32x1xi32> to vector<32x32xi32>
    %30 = arith.cmpi eq, %27, %29 : vector<32x32xi32>
    %cst_19 = arith.constant 0.000000e+00 : f32
    %31 = vector.broadcast %cst_19 : f32 to vector<32x32xf32>
    %32 = arith.select %30, %5, %31 : vector<32x32xi1>, vector<32x32xf32>
    %cst_20 = arith.constant dense<0.000000e+00> : vector<32xf32>
    %33 = vector.multi_reduction <add>, %32, %cst_20 [1] : vector<32x32xf32> to vector<32xf32>
    %34 = vector.shape_cast %33 : vector<32xf32> to vector<32x1xf32>
    %35 = arith.addf %28, %34 : vector<32x1xf32>
    %c0_21 = arith.constant 0 : index
    %c0_22 = arith.constant 0 : index
    %36 = vector.load %arg12[%c0_21, %c0_22] : memref<32x1xf32, #tpu.memory_space<vmem>>, vector<32x1xf32>
    tpu.vector_store %arg12[%c0_21, %c0_22], %35 {strides = array<i32>} : memref<32x1xf32, #tpu.memory_space<vmem>>, vector<32x1xf32>,
    %c1_i32 = arith.constant 1 : i32
    %37 = arith.cmpi eq, %arg1, %c1_i32 : i32
    %38 = arith.extui %37 : i1 to i32
    %c0_i32_23 = arith.constant 0 : i32
    %39 = arith.cmpi ne, %38, %c0_i32_23 : i32
    scf.if %39 {
      %c0_24 = arith.constant 0 : index
      %c0_25 = arith.constant 0 : index
      %40 = vector.load %arg10[%c0_24, %c0_25] : memref<32x1xf32, #tpu.memory_space<vmem>>, vector<32x1xf32>
      %c0_26 = arith.constant 0 : index
      %c0_27 = arith.constant 0 : index
      %41 = vector.load %arg11[%c0_26, %c0_27] : memref<32x1xf32, #tpu.memory_space<vmem>>, vector<32x1xf32>
      %42 = math.log %41 : vector<32x1xf32>
      %43 = arith.addf %40, %42 : vector<32x1xf32>
      %c0_28 = arith.constant 0 : index
      %c0_29 = arith.constant 0 : index
      %44 = vector.load %arg12[%c0_28, %c0_29] : memref<32x1xf32, #tpu.memory_space<vmem>>, vector<32x1xf32>
      %45 = arith.subf %44, %43 : vector<32x1xf32>
      %c0_30 = arith.constant 0 : index
      %c0_31 = arith.constant 0 : index
      %c0_32 = arith.constant 0 : index
      %46 = vector.load %arg7[%c0_30, %c0_31, %c0_32] : memref<4x8x1xf32, #tpu.memory_space<vmem>>, vector<4x8x1xf32>
      %47 = vector.shape_cast %46 : vector<4x8x1xf32> to vector<32x1xf32>
      %48 = arith.mulf %45, %47 : vector<32x1xf32>
      %49 = vector.shape_cast %48 : vector<32x1xf32> to vector<4x8x1xf32>
      %cst_33 = arith.constant dense<0.000000e+00> : vector<4x1xf32>
      %50 = vector.multi_reduction <add>, %49, %cst_33 [1] : vector<4x8x1xf32> to vector<4x1xf32>
      %51 = vector.shape_cast %50 : vector<4x1xf32> to vector<4x1x1xf32>
      %c0_34 = arith.constant 0 : index
      %c0_35 = arith.constant 0 : index
      %c0_36 = arith.constant 0 : index
      %52 = vector.load %arg8[%c0_34, %c0_35, %c0_36] : memref<4x1x1xf32, #tpu.memory_space<vmem>>, vector<4x1x1xf32>
      tpu.vector_store %arg8[%c0_34, %c0_35, %c0_36], %51 {strides = array<i32>} : memref<4x1x1xf32, #tpu.memory_space<vmem>>, vector<4x1x1xf32>,
    } else {
    }
    return
  }
  func.func @transform_0(%arg0: i32, %arg1: i32) -> (i32, i32, i32) {
    %c0_i32 = arith.constant 0 : i32
    %c0_i32_0 = arith.constant 0 : i32
    %c0_i32_1 = arith.constant 0 : i32
    return %arg0, %c0_i32, %c0_i32_0 : i32, i32, i32
  }
  func.func @transform_1(%arg0: i32, %arg1: i32) -> (i32, i32) {
    %c0_i32 = arith.constant 0 : i32
    %c0_i32_0 = arith.constant 0 : i32
    %c0_i32_1 = arith.constant 0 : i32
    return %c0_i32, %c0_i32_0 : i32, i32
  }
  func.func @transform_2(%arg0: i32, %arg1: i32) -> (i32, i32) {
    %c0_i32 = arith.constant 0 : i32
    %c0_i32_0 = arith.constant 0 : i32
    %c0_i32_1 = arith.constant 0 : i32
    return %c0_i32, %c0_i32_0 : i32, i32
  }
  func.func @transform_3(%arg0: i32, %arg1: i32) -> (i32, i32) {
    %c0_i32 = arith.constant 0 : i32
    %c0_i32_0 = arith.constant 0 : i32
    return %arg1, %c0_i32 : i32, i32
  }
  func.func @transform_4(%arg0: i32, %arg1: i32) -> (i32, i32, i32) {
    %c0_i32 = arith.constant 0 : i32
    %c0_i32_0 = arith.constant 0 : i32
    %c0_i32_1 = arith.constant 0 : i32
    return %arg0, %c0_i32, %c0_i32_0 : i32, i32, i32
  }
  func.func @transform_5(%arg0: i32, %arg1: i32) -> (i32, i32, i32) {
    %c0_i32 = arith.constant 0 : i32
    %c0_i32_0 = arith.constant 0 : i32
    %c0_i32_1 = arith.constant 0 : i32
    return %arg0, %c0_i32, %c0_i32_0 : i32, i32, i32
  }
  func.func @transform_6(%arg0: i32, %arg1: i32) -> (i32, i32, i32) {
    %c0_i32 = arith.constant 0 : i32
    %c0_i32_0 = arith.constant 0 : i32
    %c0_i32_1 = arith.constant 0 : i32
    return %arg0, %c0_i32, %c0_i32_0 : i32, i32, i32
  }
}

module attributes {stable_mosaic.version = 11 : i64} {
  func.func @kernel(%arg0: i32, %arg1: memref<4xi32, #tpu.memory_space<smem>>, %arg2: memref<4x8x32xf32, #tpu.memory_space<vmem>>, %arg3: memref<1x32xf32, #tpu.memory_space<vmem>>, %arg4: memref<1x32xf32, #tpu.memory_space<vmem>>, %arg5: memref<32x96xbf16, #tpu.memory_space<vmem>>, %arg6: memref<1x96xf32, #tpu.memory_space<vmem>>, %arg7: memref<32x32xbf16, #tpu.memory_space<vmem>>, %arg8: memref<1x32xf32, #tpu.memory_space<vmem>>, %arg9: memref<1x32xf32, #tpu.memory_space<vmem>>, %arg10: memref<1x32xf32, #tpu.memory_space<vmem>>, %arg11: memref<32x128xbf16, #tpu.memory_space<vmem>>, %arg12: memref<1x128xf32, #tpu.memory_space<vmem>>, %arg13: memref<128x32xbf16, #tpu.memory_space<vmem>>, %arg14: memref<1x32xf32, #tpu.memory_space<vmem>>, %arg15: memref<4x8x32xf32, #tpu.memory_space<vmem>>) attributes {dimension_semantics = [#tpu.dimension_semantics<parallel>], iteration_bounds = array<i64: 1>, scalar_prefetch = 1 : i64, scratch_operands = 0 : i64, tpu.core_type = #tpu.core_type<tc>, window_params = [{transform_indices = @transform_0, window_bounds = array<i64: 4, 8, 32>}, {pipeline_mode = #tpu.pipeline_mode<synchronous>, transform_indices = @transform_1, window_bounds = array<i64: 1, 32>}, {pipeline_mode = #tpu.pipeline_mode<synchronous>, transform_indices = @transform_2, window_bounds = array<i64: 1, 32>}, {pipeline_mode = #tpu.pipeline_mode<synchronous>, transform_indices = @transform_3, window_bounds = array<i64: 32, 96>}, {pipeline_mode = #tpu.pipeline_mode<synchronous>, transform_indices = @transform_4, window_bounds = array<i64: 1, 96>}, {pipeline_mode = #tpu.pipeline_mode<synchronous>, transform_indices = @transform_5, window_bounds = array<i64: 32, 32>}, {pipeline_mode = #tpu.pipeline_mode<synchronous>, transform_indices = @transform_6, window_bounds = array<i64: 1, 32>}, {pipeline_mode = #tpu.pipeline_mode<synchronous>, transform_indices = @transform_7, window_bounds = array<i64: 1, 32>}, {pipeline_mode = #tpu.pipeline_mode<synchronous>, transform_indices = @transform_8, window_bounds = array<i64: 1, 32>}, {pipeline_mode = #tpu.pipeline_mode<synchronous>, transform_indices = @transform_9, window_bounds = array<i64: 32, 128>}, {pipeline_mode = #tpu.pipeline_mode<synchronous>, transform_indices = @transform_10, window_bounds = array<i64: 1, 128>}, {pipeline_mode = #tpu.pipeline_mode<synchronous>, transform_indices = @transform_11, window_bounds = array<i64: 128, 32>}, {pipeline_mode = #tpu.pipeline_mode<synchronous>, transform_indices = @transform_12, window_bounds = array<i64: 1, 32>}, {transform_indices = @transform_13, window_bounds = array<i64: 4, 8, 32>}]} {
    %c0 = arith.constant 0 : index
    %c0_0 = arith.constant 0 : index
    %c0_1 = arith.constant 0 : index
    %0 = vector.load %arg2[%c0, %c0_0, %c0_1] : memref<4x8x32xf32, #tpu.memory_space<vmem>>, vector<4x8x32xf32>
    %1 = vector.shape_cast %0 : vector<4x8x32xf32> to vector<32x32xf32>
    %cst = arith.constant dense<0.000000e+00> : vector<32xf32>
    %2 = vector.multi_reduction <add>, %1, %cst [1] : vector<32x32xf32> to vector<32xf32>
    %3 = vector.shape_cast %2 : vector<32xf32> to vector<32x1xf32>
    %cst_2 = arith.constant 3.200000e+01 : f32
    %4 = vector.broadcast %cst_2 : f32 to vector<32x1xf32>
    %5 = arith.divf %3, %4 : vector<32x1xf32>
    %6 = vector.broadcast %5 : vector<32x1xf32> to vector<32x32xf32>
    %7 = arith.subf %1, %6 : vector<32x32xf32>
    %8 = arith.mulf %7, %7 : vector<32x32xf32>
    %cst_3 = arith.constant dense<0.000000e+00> : vector<32xf32>
    %9 = vector.multi_reduction <add>, %8, %cst_3 [1] : vector<32x32xf32> to vector<32xf32>
    %10 = vector.shape_cast %9 : vector<32xf32> to vector<32x1xf32>
    %cst_4 = arith.constant 3.200000e+01 : f32
    %11 = vector.broadcast %cst_4 : f32 to vector<32x1xf32>
    %12 = arith.divf %10, %11 : vector<32x1xf32>
    %13 = vector.broadcast %5 : vector<32x1xf32> to vector<32x32xf32>
    %14 = arith.subf %1, %13 : vector<32x32xf32>
    %cst_5 = arith.constant 9.99999974E-6 : f32
    %15 = vector.broadcast %cst_5 : f32 to vector<32x1xf32>
    %16 = arith.addf %12, %15 : vector<32x1xf32>
    %17 = math.rsqrt %16 : vector<32x1xf32>
    %18 = vector.broadcast %17 : vector<32x1xf32> to vector<32x32xf32>
    %19 = arith.mulf %14, %18 : vector<32x32xf32>
    %c0_6 = arith.constant 0 : index
    %c0_7 = arith.constant 0 : index
    %20 = vector.load %arg3[%c0_6, %c0_7] : memref<1x32xf32, #tpu.memory_space<vmem>>, vector<1x32xf32>
    %21 = vector.broadcast %20 : vector<1x32xf32> to vector<32x32xf32>
    %22 = arith.mulf %19, %21 : vector<32x32xf32>
    %c0_8 = arith.constant 0 : index
    %c0_9 = arith.constant 0 : index
    %23 = vector.load %arg4[%c0_8, %c0_9] : memref<1x32xf32, #tpu.memory_space<vmem>>, vector<1x32xf32>
    %24 = vector.broadcast %23 : vector<1x32xf32> to vector<32x32xf32>
    %25 = arith.addf %22, %24 : vector<32x32xf32>
    %26 = arith.truncf %25 : vector<32x32xf32> to vector<32x32xbf16>
    %c0_10 = arith.constant 0 : index
    %c0_11 = arith.constant 0 : index
    %27 = vector.load %arg5[%c0_10, %c0_11] : memref<32x96xbf16, #tpu.memory_space<vmem>>, vector<32x96xbf16>
    %cst_12 = arith.constant dense<0.000000e+00> : vector<32x96xf32>
    %28 = tpu.matmul %26, %27, %cst_12 {dimension_numbers = #tpu.dot_dimension_numbers<[1], [0], [0], [1], [0, 0, 1, 1], [], []>} : vector<32x32xbf16>, vector<32x96xbf16>, vector<32x96xf32> -> vector<32x96xf32>
    %c0_13 = arith.constant 0 : index
    %c0_14 = arith.constant 0 : index
    %29 = vector.load %arg6[%c0_13, %c0_14] : memref<1x96xf32, #tpu.memory_space<vmem>>, vector<1x96xf32>
    %30 = vector.broadcast %29 : vector<1x96xf32> to vector<32x96xf32>
    %31 = arith.addf %28, %30 : vector<32x96xf32>
    %32 = vector.extract_strided_slice %31 {offsets = [0, 0], sizes = [32, 32], strides = [1, 1]} : vector<32x96xf32> to vector<32x32xf32>
    %33 = vector.extract_strided_slice %31 {offsets = [0, 32], sizes = [32, 32], strides = [1, 1]} : vector<32x96xf32> to vector<32x32xf32>
    %34 = vector.extract_strided_slice %31 {offsets = [0, 64], sizes = [32, 32], strides = [1, 1]} : vector<32x96xf32> to vector<32x32xf32>
    %35 = tpu.iota {dimensions = array<i32: 0>} : vector<8x8xi32>
    %36 = tpu.iota {dimensions = array<i32: 1>} : vector<8x8xi32>
    %c4_i32 = arith.constant 4 : i32
    %37 = arith.muli %arg0, %c4_i32 : i32
    %c0_i32 = arith.constant 0 : i32
    %38 = arith.addi %37, %c0_i32 : i32
    %39 = arith.index_cast %38 : i32 to index
    %40 = memref.load %arg1[%39] : memref<4xi32, #tpu.memory_space<smem>>
    %41 = arith.cmpi sle, %36, %35 : vector<8x8xi32>
    %42 = vector.broadcast %40 : i32 to vector<8x8xi32>
    %43 = arith.cmpi slt, %36, %42 : vector<8x8xi32>
    %44 = arith.ori %41, %43 : vector<8x8xi1>
    %cst_15 = arith.constant 0.000000e+00 : f32
    %cst_16 = arith.constant -1.000000e+04 : f32
    %45 = vector.broadcast %cst_15 : f32 to vector<8x8xf32>
    %46 = vector.broadcast %cst_16 : f32 to vector<8x8xf32>
    %47 = arith.select %44, %45, %46 : vector<8x8xi1>, vector<8x8xf32>
    %cst_17 = arith.constant 0.000000e+00 : f32
    %48 = vector.broadcast %cst_17 : f32 to vector<8x32xf32>
    %49 = vector.extract_strided_slice %32 {offsets = [0, 0], sizes = [8, 16], strides = [1, 1]} : vector<32x32xf32> to vector<8x16xf32>
    %50 = arith.truncf %49 : vector<8x16xf32> to vector<8x16xbf16>
    %51 = vector.extract_strided_slice %33 {offsets = [0, 0], sizes = [8, 16], strides = [1, 1]} : vector<32x32xf32> to vector<8x16xf32>
    %52 = arith.truncf %51 : vector<8x16xf32> to vector<8x16xbf16>
    %53 = vector.extract_strided_slice %34 {offsets = [0, 0], sizes = [8, 16], strides = [1, 1]} : vector<32x32xf32> to vector<8x16xf32>
    %54 = arith.truncf %53 : vector<8x16xf32> to vector<8x16xbf16>
    %cst_18 = arith.constant dense<0.000000e+00> : vector<8x8xf32>
    %55 = tpu.matmul %50, %52, %cst_18 {dimension_numbers = #tpu.dot_dimension_numbers<[1], [1], [0], [0], [0, 0, 1, 0], [], []>} : vector<8x16xbf16>, vector<8x16xbf16>, vector<8x8xf32> -> vector<8x8xf32>
    %56 = arith.addf %55, %47 : vector<8x8xf32>
    %cst_19 = arith.constant dense<0xFF800000> : vector<8xf32>
    %57 = vector.multi_reduction <maximumf>, %56, %cst_19 [1] : vector<8x8xf32> to vector<8xf32>
    %58 = vector.shape_cast %57 : vector<8xf32> to vector<8x1xf32>
    %59 = vector.broadcast %58 : vector<8x1xf32> to vector<8x8xf32>
    %60 = arith.subf %56, %59 : vector<8x8xf32>
    %61 = math.exp %60 : vector<8x8xf32>
    %cst_20 = arith.constant dense<0.000000e+00> : vector<8xf32>
    %62 = vector.multi_reduction <add>, %61, %cst_20 [1] : vector<8x8xf32> to vector<8xf32>
    %63 = vector.shape_cast %62 : vector<8xf32> to vector<8x1xf32>
    %64 = tpu.reciprocal %63 {approx = true} : vector<8x1xf32> -> vector<8x1xf32>
    %65 = vector.broadcast %64 : vector<8x1xf32> to vector<8x8xf32>
    %66 = arith.mulf %61, %65 : vector<8x8xf32>
    %67 = arith.truncf %66 : vector<8x8xf32> to vector<8x8xbf16>
    %cst_21 = arith.constant dense<0.000000e+00> : vector<8x16xf32>
    %68 = tpu.matmul %67, %54, %cst_21 {dimension_numbers = #tpu.dot_dimension_numbers<[1], [0], [0], [1], [0, 0, 1, 1], [], []>} : vector<8x8xbf16>, vector<8x16xbf16>, vector<8x16xf32> -> vector<8x16xf32>
    %69 = arith.truncf %68 : vector<8x16xf32> to vector<8x16xbf16>
    %c0_22 = arith.constant 0 : index
    %c0_23 = arith.constant 0 : index
    %70 = vector.load %arg7[%c0_22, %c0_23] : memref<32x32xbf16, #tpu.memory_space<vmem>>, vector<16x32xbf16>
    %cst_24 = arith.constant dense<0.000000e+00> : vector<8x32xf32>
    %71 = tpu.matmul %69, %70, %cst_24 {dimension_numbers = #tpu.dot_dimension_numbers<[1], [0], [0], [1], [0, 0, 1, 1], [], []>} : vector<8x16xbf16>, vector<16x32xbf16>, vector<8x32xf32> -> vector<8x32xf32>
    %72 = arith.addf %48, %71 : vector<8x32xf32>
    %73 = vector.extract_strided_slice %32 {offsets = [0, 16], sizes = [8, 16], strides = [1, 1]} : vector<32x32xf32> to vector<8x16xf32>
    %74 = arith.truncf %73 : vector<8x16xf32> to vector<8x16xbf16>
    %75 = vector.extract_strided_slice %33 {offsets = [0, 16], sizes = [8, 16], strides = [1, 1]} : vector<32x32xf32> to vector<8x16xf32>
    %76 = arith.truncf %75 : vector<8x16xf32> to vector<8x16xbf16>
    %77 = vector.extract_strided_slice %34 {offsets = [0, 16], sizes = [8, 16], strides = [1, 1]} : vector<32x32xf32> to vector<8x16xf32>
    %78 = arith.truncf %77 : vector<8x16xf32> to vector<8x16xbf16>
    %cst_25 = arith.constant dense<0.000000e+00> : vector<8x8xf32>
    %79 = tpu.matmul %74, %76, %cst_25 {dimension_numbers = #tpu.dot_dimension_numbers<[1], [1], [0], [0], [0, 0, 1, 0], [], []>} : vector<8x16xbf16>, vector<8x16xbf16>, vector<8x8xf32> -> vector<8x8xf32>
    %80 = arith.addf %79, %47 : vector<8x8xf32>
    %cst_26 = arith.constant dense<0xFF800000> : vector<8xf32>
    %81 = vector.multi_reduction <maximumf>, %80, %cst_26 [1] : vector<8x8xf32> to vector<8xf32>
    %82 = vector.shape_cast %81 : vector<8xf32> to vector<8x1xf32>
    %83 = vector.broadcast %82 : vector<8x1xf32> to vector<8x8xf32>
    %84 = arith.subf %80, %83 : vector<8x8xf32>
    %85 = math.exp %84 : vector<8x8xf32>
    %cst_27 = arith.constant dense<0.000000e+00> : vector<8xf32>
    %86 = vector.multi_reduction <add>, %85, %cst_27 [1] : vector<8x8xf32> to vector<8xf32>
    %87 = vector.shape_cast %86 : vector<8xf32> to vector<8x1xf32>
    %88 = tpu.reciprocal %87 {approx = true} : vector<8x1xf32> -> vector<8x1xf32>
    %89 = vector.broadcast %88 : vector<8x1xf32> to vector<8x8xf32>
    %90 = arith.mulf %85, %89 : vector<8x8xf32>
    %91 = arith.truncf %90 : vector<8x8xf32> to vector<8x8xbf16>
    %cst_28 = arith.constant dense<0.000000e+00> : vector<8x16xf32>
    %92 = tpu.matmul %91, %78, %cst_28 {dimension_numbers = #tpu.dot_dimension_numbers<[1], [0], [0], [1], [0, 0, 1, 1], [], []>} : vector<8x8xbf16>, vector<8x16xbf16>, vector<8x16xf32> -> vector<8x16xf32>
    %93 = arith.truncf %92 : vector<8x16xf32> to vector<8x16xbf16>
    %c16 = arith.constant 16 : index
    %c0_29 = arith.constant 0 : index
    %94 = vector.load %arg7[%c16, %c0_29] : memref<32x32xbf16, #tpu.memory_space<vmem>>, vector<16x32xbf16>
    %cst_30 = arith.constant dense<0.000000e+00> : vector<8x32xf32>
    %95 = tpu.matmul %93, %94, %cst_30 {dimension_numbers = #tpu.dot_dimension_numbers<[1], [0], [0], [1], [0, 0, 1, 1], [], []>} : vector<8x16xbf16>, vector<16x32xbf16>, vector<8x32xf32> -> vector<8x32xf32>
    %96 = arith.addf %72, %95 : vector<8x32xf32>
    %c4_i32_31 = arith.constant 4 : i32
    %97 = arith.muli %arg0, %c4_i32_31 : i32
    %c1_i32 = arith.constant 1 : i32
    %98 = arith.addi %97, %c1_i32 : i32
    %99 = arith.index_cast %98 : i32 to index
    %100 = memref.load %arg1[%99] : memref<4xi32, #tpu.memory_space<smem>>
    %101 = arith.cmpi sle, %36, %35 : vector<8x8xi32>
    %102 = vector.broadcast %100 : i32 to vector<8x8xi32>
    %103 = arith.cmpi slt, %36, %102 : vector<8x8xi32>
    %104 = arith.ori %101, %103 : vector<8x8xi1>
    %cst_32 = arith.constant 0.000000e+00 : f32
    %cst_33 = arith.constant -1.000000e+04 : f32
    %105 = vector.broadcast %cst_32 : f32 to vector<8x8xf32>
    %106 = vector.broadcast %cst_33 : f32 to vector<8x8xf32>
    %107 = arith.select %104, %105, %106 : vector<8x8xi1>, vector<8x8xf32>
    %cst_34 = arith.constant 0.000000e+00 : f32
    %108 = vector.broadcast %cst_34 : f32 to vector<8x32xf32>
    %109 = vector.extract_strided_slice %32 {offsets = [8, 0], sizes = [8, 16], strides = [1, 1]} : vector<32x32xf32> to vector<8x16xf32>
    %110 = arith.truncf %109 : vector<8x16xf32> to vector<8x16xbf16>
    %111 = vector.extract_strided_slice %33 {offsets = [8, 0], sizes = [8, 16], strides = [1, 1]} : vector<32x32xf32> to vector<8x16xf32>
    %112 = arith.truncf %111 : vector<8x16xf32> to vector<8x16xbf16>
    %113 = vector.extract_strided_slice %34 {offsets = [8, 0], sizes = [8, 16], strides = [1, 1]} : vector<32x32xf32> to vector<8x16xf32>
    %114 = arith.truncf %113 : vector<8x16xf32> to vector<8x16xbf16>
    %cst_35 = arith.constant dense<0.000000e+00> : vector<8x8xf32>
    %115 = tpu.matmul %110, %112, %cst_35 {dimension_numbers = #tpu.dot_dimension_numbers<[1], [1], [0], [0], [0, 0, 1, 0], [], []>} : vector<8x16xbf16>, vector<8x16xbf16>, vector<8x8xf32> -> vector<8x8xf32>
    %116 = arith.addf %115, %107 : vector<8x8xf32>
    %cst_36 = arith.constant dense<0xFF800000> : vector<8xf32>
    %117 = vector.multi_reduction <maximumf>, %116, %cst_36 [1] : vector<8x8xf32> to vector<8xf32>
    %118 = vector.shape_cast %117 : vector<8xf32> to vector<8x1xf32>
    %119 = vector.broadcast %118 : vector<8x1xf32> to vector<8x8xf32>
    %120 = arith.subf %116, %119 : vector<8x8xf32>
    %121 = math.exp %120 : vector<8x8xf32>
    %cst_37 = arith.constant dense<0.000000e+00> : vector<8xf32>
    %122 = vector.multi_reduction <add>, %121, %cst_37 [1] : vector<8x8xf32> to vector<8xf32>
    %123 = vector.shape_cast %122 : vector<8xf32> to vector<8x1xf32>
    %124 = tpu.reciprocal %123 {approx = true} : vector<8x1xf32> -> vector<8x1xf32>
    %125 = vector.broadcast %124 : vector<8x1xf32> to vector<8x8xf32>
    %126 = arith.mulf %121, %125 : vector<8x8xf32>
    %127 = arith.truncf %126 : vector<8x8xf32> to vector<8x8xbf16>
    %cst_38 = arith.constant dense<0.000000e+00> : vector<8x16xf32>
    %128 = tpu.matmul %127, %114, %cst_38 {dimension_numbers = #tpu.dot_dimension_numbers<[1], [0], [0], [1], [0, 0, 1, 1], [], []>} : vector<8x8xbf16>, vector<8x16xbf16>, vector<8x16xf32> -> vector<8x16xf32>
    %129 = arith.truncf %128 : vector<8x16xf32> to vector<8x16xbf16>
    %c0_39 = arith.constant 0 : index
    %c0_40 = arith.constant 0 : index
    %130 = vector.load %arg7[%c0_39, %c0_40] : memref<32x32xbf16, #tpu.memory_space<vmem>>, vector<16x32xbf16>
    %cst_41 = arith.constant dense<0.000000e+00> : vector<8x32xf32>
    %131 = tpu.matmul %129, %130, %cst_41 {dimension_numbers = #tpu.dot_dimension_numbers<[1], [0], [0], [1], [0, 0, 1, 1], [], []>} : vector<8x16xbf16>, vector<16x32xbf16>, vector<8x32xf32> -> vector<8x32xf32>
    %132 = arith.addf %108, %131 : vector<8x32xf32>
    %133 = vector.extract_strided_slice %32 {offsets = [8, 16], sizes = [8, 16], strides = [1, 1]} : vector<32x32xf32> to vector<8x16xf32>
    %134 = arith.truncf %133 : vector<8x16xf32> to vector<8x16xbf16>
    %135 = vector.extract_strided_slice %33 {offsets = [8, 16], sizes = [8, 16], strides = [1, 1]} : vector<32x32xf32> to vector<8x16xf32>
    %136 = arith.truncf %135 : vector<8x16xf32> to vector<8x16xbf16>
    %137 = vector.extract_strided_slice %34 {offsets = [8, 16], sizes = [8, 16], strides = [1, 1]} : vector<32x32xf32> to vector<8x16xf32>
    %138 = arith.truncf %137 : vector<8x16xf32> to vector<8x16xbf16>
    %cst_42 = arith.constant dense<0.000000e+00> : vector<8x8xf32>
    %139 = tpu.matmul %134, %136, %cst_42 {dimension_numbers = #tpu.dot_dimension_numbers<[1], [1], [0], [0], [0, 0, 1, 0], [], []>} : vector<8x16xbf16>, vector<8x16xbf16>, vector<8x8xf32> -> vector<8x8xf32>
    %140 = arith.addf %139, %107 : vector<8x8xf32>
    %cst_43 = arith.constant dense<0xFF800000> : vector<8xf32>
    %141 = vector.multi_reduction <maximumf>, %140, %cst_43 [1] : vector<8x8xf32> to vector<8xf32>
    %142 = vector.shape_cast %141 : vector<8xf32> to vector<8x1xf32>
    %143 = vector.broadcast %142 : vector<8x1xf32> to vector<8x8xf32>
    %144 = arith.subf %140, %143 : vector<8x8xf32>
    %145 = math.exp %144 : vector<8x8xf32>
    %cst_44 = arith.constant dense<0.000000e+00> : vector<8xf32>
    %146 = vector.multi_reduction <add>, %145, %cst_44 [1] : vector<8x8xf32> to vector<8xf32>
    %147 = vector.shape_cast %146 : vector<8xf32> to vector<8x1xf32>
    %148 = tpu.reciprocal %147 {approx = true} : vector<8x1xf32> -> vector<8x1xf32>
    %149 = vector.broadcast %148 : vector<8x1xf32> to vector<8x8xf32>
    %150 = arith.mulf %145, %149 : vector<8x8xf32>
    %151 = arith.truncf %150 : vector<8x8xf32> to vector<8x8xbf16>
    %cst_45 = arith.constant dense<0.000000e+00> : vector<8x16xf32>
    %152 = tpu.matmul %151, %138, %cst_45 {dimension_numbers = #tpu.dot_dimension_numbers<[1], [0], [0], [1], [0, 0, 1, 1], [], []>} : vector<8x8xbf16>, vector<8x16xbf16>, vector<8x16xf32> -> vector<8x16xf32>
    %153 = arith.truncf %152 : vector<8x16xf32> to vector<8x16xbf16>
    %c16_46 = arith.constant 16 : index
    %c0_47 = arith.constant 0 : index
    %154 = vector.load %arg7[%c16_46, %c0_47] : memref<32x32xbf16, #tpu.memory_space<vmem>>, vector<16x32xbf16>
    %cst_48 = arith.constant dense<0.000000e+00> : vector<8x32xf32>
    %155 = tpu.matmul %153, %154, %cst_48 {dimension_numbers = #tpu.dot_dimension_numbers<[1], [0], [0], [1], [0, 0, 1, 1], [], []>} : vector<8x16xbf16>, vector<16x32xbf16>, vector<8x32xf32> -> vector<8x32xf32>
    %156 = arith.addf %132, %155 : vector<8x32xf32>
    %c4_i32_49 = arith.constant 4 : i32
    %157 = arith.muli %arg0, %c4_i32_49 : i32
    %c2_i32 = arith.constant 2 : i32
    %158 = arith.addi %157, %c2_i32 : i32
    %159 = arith.index_cast %158 : i32 to index
    %160 = memref.load %arg1[%159] : memref<4xi32, #tpu.memory_space<smem>>
    %161 = arith.cmpi sle, %36, %35 : vector<8x8xi32>
    %162 = vector.broadcast %160 : i32 to vector<8x8xi32>
    %163 = arith.cmpi slt, %36, %162 : vector<8x8xi32>
    %164 = arith.ori %161, %163 : vector<8x8xi1>
    %cst_50 = arith.constant 0.000000e+00 : f32
    %cst_51 = arith.constant -1.000000e+04 : f32
    %165 = vector.broadcast %cst_50 : f32 to vector<8x8xf32>
    %166 = vector.broadcast %cst_51 : f32 to vector<8x8xf32>
    %167 = arith.select %164, %165, %166 : vector<8x8xi1>, vector<8x8xf32>
    %cst_52 = arith.constant 0.000000e+00 : f32
    %168 = vector.broadcast %cst_52 : f32 to vector<8x32xf32>
    %169 = vector.extract_strided_slice %32 {offsets = [16, 0], sizes = [8, 16], strides = [1, 1]} : vector<32x32xf32> to vector<8x16xf32>
    %170 = arith.truncf %169 : vector<8x16xf32> to vector<8x16xbf16>
    %171 = vector.extract_strided_slice %33 {offsets = [16, 0], sizes = [8, 16], strides = [1, 1]} : vector<32x32xf32> to vector<8x16xf32>
    %172 = arith.truncf %171 : vector<8x16xf32> to vector<8x16xbf16>
    %173 = vector.extract_strided_slice %34 {offsets = [16, 0], sizes = [8, 16], strides = [1, 1]} : vector<32x32xf32> to vector<8x16xf32>
    %174 = arith.truncf %173 : vector<8x16xf32> to vector<8x16xbf16>
    %cst_53 = arith.constant dense<0.000000e+00> : vector<8x8xf32>
    %175 = tpu.matmul %170, %172, %cst_53 {dimension_numbers = #tpu.dot_dimension_numbers<[1], [1], [0], [0], [0, 0, 1, 0], [], []>} : vector<8x16xbf16>, vector<8x16xbf16>, vector<8x8xf32> -> vector<8x8xf32>
    %176 = arith.addf %175, %167 : vector<8x8xf32>
    %cst_54 = arith.constant dense<0xFF800000> : vector<8xf32>
    %177 = vector.multi_reduction <maximumf>, %176, %cst_54 [1] : vector<8x8xf32> to vector<8xf32>
    %178 = vector.shape_cast %177 : vector<8xf32> to vector<8x1xf32>
    %179 = vector.broadcast %178 : vector<8x1xf32> to vector<8x8xf32>
    %180 = arith.subf %176, %179 : vector<8x8xf32>
    %181 = math.exp %180 : vector<8x8xf32>
    %cst_55 = arith.constant dense<0.000000e+00> : vector<8xf32>
    %182 = vector.multi_reduction <add>, %181, %cst_55 [1] : vector<8x8xf32> to vector<8xf32>
    %183 = vector.shape_cast %182 : vector<8xf32> to vector<8x1xf32>
    %184 = tpu.reciprocal %183 {approx = true} : vector<8x1xf32> -> vector<8x1xf32>
    %185 = vector.broadcast %184 : vector<8x1xf32> to vector<8x8xf32>
    %186 = arith.mulf %181, %185 : vector<8x8xf32>
    %187 = arith.truncf %186 : vector<8x8xf32> to vector<8x8xbf16>
    %cst_56 = arith.constant dense<0.000000e+00> : vector<8x16xf32>
    %188 = tpu.matmul %187, %174, %cst_56 {dimension_numbers = #tpu.dot_dimension_numbers<[1], [0], [0], [1], [0, 0, 1, 1], [], []>} : vector<8x8xbf16>, vector<8x16xbf16>, vector<8x16xf32> -> vector<8x16xf32>
    %189 = arith.truncf %188 : vector<8x16xf32> to vector<8x16xbf16>
    %c0_57 = arith.constant 0 : index
    %c0_58 = arith.constant 0 : index
    %190 = vector.load %arg7[%c0_57, %c0_58] : memref<32x32xbf16, #tpu.memory_space<vmem>>, vector<16x32xbf16>
    %cst_59 = arith.constant dense<0.000000e+00> : vector<8x32xf32>
    %191 = tpu.matmul %189, %190, %cst_59 {dimension_numbers = #tpu.dot_dimension_numbers<[1], [0], [0], [1], [0, 0, 1, 1], [], []>} : vector<8x16xbf16>, vector<16x32xbf16>, vector<8x32xf32> -> vector<8x32xf32>
    %192 = arith.addf %168, %191 : vector<8x32xf32>
    %193 = vector.extract_strided_slice %32 {offsets = [16, 16], sizes = [8, 16], strides = [1, 1]} : vector<32x32xf32> to vector<8x16xf32>
    %194 = arith.truncf %193 : vector<8x16xf32> to vector<8x16xbf16>
    %195 = vector.extract_strided_slice %33 {offsets = [16, 16], sizes = [8, 16], strides = [1, 1]} : vector<32x32xf32> to vector<8x16xf32>
    %196 = arith.truncf %195 : vector<8x16xf32> to vector<8x16xbf16>
    %197 = vector.extract_strided_slice %34 {offsets = [16, 16], sizes = [8, 16], strides = [1, 1]} : vector<32x32xf32> to vector<8x16xf32>
    %198 = arith.truncf %197 : vector<8x16xf32> to vector<8x16xbf16>
    %cst_60 = arith.constant dense<0.000000e+00> : vector<8x8xf32>
    %199 = tpu.matmul %194, %196, %cst_60 {dimension_numbers = #tpu.dot_dimension_numbers<[1], [1], [0], [0], [0, 0, 1, 0], [], []>} : vector<8x16xbf16>, vector<8x16xbf16>, vector<8x8xf32> -> vector<8x8xf32>
    %200 = arith.addf %199, %167 : vector<8x8xf32>
    %cst_61 = arith.constant dense<0xFF800000> : vector<8xf32>
    %201 = vector.multi_reduction <maximumf>, %200, %cst_61 [1] : vector<8x8xf32> to vector<8xf32>
    %202 = vector.shape_cast %201 : vector<8xf32> to vector<8x1xf32>
    %203 = vector.broadcast %202 : vector<8x1xf32> to vector<8x8xf32>
    %204 = arith.subf %200, %203 : vector<8x8xf32>
    %205 = math.exp %204 : vector<8x8xf32>
    %cst_62 = arith.constant dense<0.000000e+00> : vector<8xf32>
    %206 = vector.multi_reduction <add>, %205, %cst_62 [1] : vector<8x8xf32> to vector<8xf32>
    %207 = vector.shape_cast %206 : vector<8xf32> to vector<8x1xf32>
    %208 = tpu.reciprocal %207 {approx = true} : vector<8x1xf32> -> vector<8x1xf32>
    %209 = vector.broadcast %208 : vector<8x1xf32> to vector<8x8xf32>
    %210 = arith.mulf %205, %209 : vector<8x8xf32>
    %211 = arith.truncf %210 : vector<8x8xf32> to vector<8x8xbf16>
    %cst_63 = arith.constant dense<0.000000e+00> : vector<8x16xf32>
    %212 = tpu.matmul %211, %198, %cst_63 {dimension_numbers = #tpu.dot_dimension_numbers<[1], [0], [0], [1], [0, 0, 1, 1], [], []>} : vector<8x8xbf16>, vector<8x16xbf16>, vector<8x16xf32> -> vector<8x16xf32>
    %213 = arith.truncf %212 : vector<8x16xf32> to vector<8x16xbf16>
    %c16_64 = arith.constant 16 : index
    %c0_65 = arith.constant 0 : index
    %214 = vector.load %arg7[%c16_64, %c0_65] : memref<32x32xbf16, #tpu.memory_space<vmem>>, vector<16x32xbf16>
    %cst_66 = arith.constant dense<0.000000e+00> : vector<8x32xf32>
    %215 = tpu.matmul %213, %214, %cst_66 {dimension_numbers = #tpu.dot_dimension_numbers<[1], [0], [0], [1], [0, 0, 1, 1], [], []>} : vector<8x16xbf16>, vector<16x32xbf16>, vector<8x32xf32> -> vector<8x32xf32>
    %216 = arith.addf %192, %215 : vector<8x32xf32>
    %c4_i32_67 = arith.constant 4 : i32
    %217 = arith.muli %arg0, %c4_i32_67 : i32
    %c3_i32 = arith.constant 3 : i32
    %218 = arith.addi %217, %c3_i32 : i32
    %219 = arith.index_cast %218 : i32 to index
    %220 = memref.load %arg1[%219] : memref<4xi32, #tpu.memory_space<smem>>
    %221 = arith.cmpi sle, %36, %35 : vector<8x8xi32>
    %222 = vector.broadcast %220 : i32 to vector<8x8xi32>
    %223 = arith.cmpi slt, %36, %222 : vector<8x8xi32>
    %224 = arith.ori %221, %223 : vector<8x8xi1>
    %cst_68 = arith.constant 0.000000e+00 : f32
    %cst_69 = arith.constant -1.000000e+04 : f32
    %225 = vector.broadcast %cst_68 : f32 to vector<8x8xf32>
    %226 = vector.broadcast %cst_69 : f32 to vector<8x8xf32>
    %227 = arith.select %224, %225, %226 : vector<8x8xi1>, vector<8x8xf32>
    %cst_70 = arith.constant 0.000000e+00 : f32
    %228 = vector.broadcast %cst_70 : f32 to vector<8x32xf32>
    %229 = vector.extract_strided_slice %32 {offsets = [24, 0], sizes = [8, 16], strides = [1, 1]} : vector<32x32xf32> to vector<8x16xf32>
    %230 = arith.truncf %229 : vector<8x16xf32> to vector<8x16xbf16>
    %231 = vector.extract_strided_slice %33 {offsets = [24, 0], sizes = [8, 16], strides = [1, 1]} : vector<32x32xf32> to vector<8x16xf32>
    %232 = arith.truncf %231 : vector<8x16xf32> to vector<8x16xbf16>
    %233 = vector.extract_strided_slice %34 {offsets = [24, 0], sizes = [8, 16], strides = [1, 1]} : vector<32x32xf32> to vector<8x16xf32>
    %234 = arith.truncf %233 : vector<8x16xf32> to vector<8x16xbf16>
    %cst_71 = arith.constant dense<0.000000e+00> : vector<8x8xf32>
    %235 = tpu.matmul %230, %232, %cst_71 {dimension_numbers = #tpu.dot_dimension_numbers<[1], [1], [0], [0], [0, 0, 1, 0], [], []>} : vector<8x16xbf16>, vector<8x16xbf16>, vector<8x8xf32> -> vector<8x8xf32>
    %236 = arith.addf %235, %227 : vector<8x8xf32>
    %cst_72 = arith.constant dense<0xFF800000> : vector<8xf32>
    %237 = vector.multi_reduction <maximumf>, %236, %cst_72 [1] : vector<8x8xf32> to vector<8xf32>
    %238 = vector.shape_cast %237 : vector<8xf32> to vector<8x1xf32>
    %239 = vector.broadcast %238 : vector<8x1xf32> to vector<8x8xf32>
    %240 = arith.subf %236, %239 : vector<8x8xf32>
    %241 = math.exp %240 : vector<8x8xf32>
    %cst_73 = arith.constant dense<0.000000e+00> : vector<8xf32>
    %242 = vector.multi_reduction <add>, %241, %cst_73 [1] : vector<8x8xf32> to vector<8xf32>
    %243 = vector.shape_cast %242 : vector<8xf32> to vector<8x1xf32>
    %244 = tpu.reciprocal %243 {approx = true} : vector<8x1xf32> -> vector<8x1xf32>
    %245 = vector.broadcast %244 : vector<8x1xf32> to vector<8x8xf32>
    %246 = arith.mulf %241, %245 : vector<8x8xf32>
    %247 = arith.truncf %246 : vector<8x8xf32> to vector<8x8xbf16>
    %cst_74 = arith.constant dense<0.000000e+00> : vector<8x16xf32>
    %248 = tpu.matmul %247, %234, %cst_74 {dimension_numbers = #tpu.dot_dimension_numbers<[1], [0], [0], [1], [0, 0, 1, 1], [], []>} : vector<8x8xbf16>, vector<8x16xbf16>, vector<8x16xf32> -> vector<8x16xf32>
    %249 = arith.truncf %248 : vector<8x16xf32> to vector<8x16xbf16>
    %c0_75 = arith.constant 0 : index
    %c0_76 = arith.constant 0 : index
    %250 = vector.load %arg7[%c0_75, %c0_76] : memref<32x32xbf16, #tpu.memory_space<vmem>>, vector<16x32xbf16>
    %cst_77 = arith.constant dense<0.000000e+00> : vector<8x32xf32>
    %251 = tpu.matmul %249, %250, %cst_77 {dimension_numbers = #tpu.dot_dimension_numbers<[1], [0], [0], [1], [0, 0, 1, 1], [], []>} : vector<8x16xbf16>, vector<16x32xbf16>, vector<8x32xf32> -> vector<8x32xf32>
    %252 = arith.addf %228, %251 : vector<8x32xf32>
    %253 = vector.extract_strided_slice %32 {offsets = [24, 16], sizes = [8, 16], strides = [1, 1]} : vector<32x32xf32> to vector<8x16xf32>
    %254 = arith.truncf %253 : vector<8x16xf32> to vector<8x16xbf16>
    %255 = vector.extract_strided_slice %33 {offsets = [24, 16], sizes = [8, 16], strides = [1, 1]} : vector<32x32xf32> to vector<8x16xf32>
    %256 = arith.truncf %255 : vector<8x16xf32> to vector<8x16xbf16>
    %257 = vector.extract_strided_slice %34 {offsets = [24, 16], sizes = [8, 16], strides = [1, 1]} : vector<32x32xf32> to vector<8x16xf32>
    %258 = arith.truncf %257 : vector<8x16xf32> to vector<8x16xbf16>
    %cst_78 = arith.constant dense<0.000000e+00> : vector<8x8xf32>
    %259 = tpu.matmul %254, %256, %cst_78 {dimension_numbers = #tpu.dot_dimension_numbers<[1], [1], [0], [0], [0, 0, 1, 0], [], []>} : vector<8x16xbf16>, vector<8x16xbf16>, vector<8x8xf32> -> vector<8x8xf32>
    %260 = arith.addf %259, %227 : vector<8x8xf32>
    %cst_79 = arith.constant dense<0xFF800000> : vector<8xf32>
    %261 = vector.multi_reduction <maximumf>, %260, %cst_79 [1] : vector<8x8xf32> to vector<8xf32>
    %262 = vector.shape_cast %261 : vector<8xf32> to vector<8x1xf32>
    %263 = vector.broadcast %262 : vector<8x1xf32> to vector<8x8xf32>
    %264 = arith.subf %260, %263 : vector<8x8xf32>
    %265 = math.exp %264 : vector<8x8xf32>
    %cst_80 = arith.constant dense<0.000000e+00> : vector<8xf32>
    %266 = vector.multi_reduction <add>, %265, %cst_80 [1] : vector<8x8xf32> to vector<8xf32>
    %267 = vector.shape_cast %266 : vector<8xf32> to vector<8x1xf32>
    %268 = tpu.reciprocal %267 {approx = true} : vector<8x1xf32> -> vector<8x1xf32>
    %269 = vector.broadcast %268 : vector<8x1xf32> to vector<8x8xf32>
    %270 = arith.mulf %265, %269 : vector<8x8xf32>
    %271 = arith.truncf %270 : vector<8x8xf32> to vector<8x8xbf16>
    %cst_81 = arith.constant dense<0.000000e+00> : vector<8x16xf32>
    %272 = tpu.matmul %271, %258, %cst_81 {dimension_numbers = #tpu.dot_dimension_numbers<[1], [0], [0], [1], [0, 0, 1, 1], [], []>} : vector<8x8xbf16>, vector<8x16xbf16>, vector<8x16xf32> -> vector<8x16xf32>
    %273 = arith.truncf %272 : vector<8x16xf32> to vector<8x16xbf16>
    %c16_82 = arith.constant 16 : index
    %c0_83 = arith.constant 0 : index
    %274 = vector.load %arg7[%c16_82, %c0_83] : memref<32x32xbf16, #tpu.memory_space<vmem>>, vector<16x32xbf16>
    %cst_84 = arith.constant dense<0.000000e+00> : vector<8x32xf32>
    %275 = tpu.matmul %273, %274, %cst_84 {dimension_numbers = #tpu.dot_dimension_numbers<[1], [0], [0], [1], [0, 0, 1, 1], [], []>} : vector<8x16xbf16>, vector<16x32xbf16>, vector<8x32xf32> -> vector<8x32xf32>
    %276 = arith.addf %252, %275 : vector<8x32xf32>
    %277 = tpu.concatenate %96, %156, %216, %276 in 0 : vector<8x32xf32>, vector<8x32xf32>, vector<8x32xf32>, vector<8x32xf32> -> vector<32x32xf32>
    %c0_85 = arith.constant 0 : index
    %c0_86 = arith.constant 0 : index
    %278 = vector.load %arg8[%c0_85, %c0_86] : memref<1x32xf32, #tpu.memory_space<vmem>>, vector<1x32xf32>
    %279 = vector.broadcast %278 : vector<1x32xf32> to vector<32x32xf32>
    %280 = arith.addf %277, %279 : vector<32x32xf32>
    %281 = arith.addf %1, %280 : vector<32x32xf32>
    %cst_87 = arith.constant dense<0.000000e+00> : vector<32xf32>
    %282 = vector.multi_reduction <add>, %281, %cst_87 [1] : vector<32x32xf32> to vector<32xf32>
    %283 = vector.shape_cast %282 : vector<32xf32> to vector<32x1xf32>
    %cst_88 = arith.constant 3.200000e+01 : f32
    %284 = vector.broadcast %cst_88 : f32 to vector<32x1xf32>
    %285 = arith.divf %283, %284 : vector<32x1xf32>
    %286 = vector.broadcast %285 : vector<32x1xf32> to vector<32x32xf32>
    %287 = arith.subf %281, %286 : vector<32x32xf32>
    %288 = arith.mulf %287, %287 : vector<32x32xf32>
    %cst_89 = arith.constant dense<0.000000e+00> : vector<32xf32>
    %289 = vector.multi_reduction <add>, %288, %cst_89 [1] : vector<32x32xf32> to vector<32xf32>
    %290 = vector.shape_cast %289 : vector<32xf32> to vector<32x1xf32>
    %cst_90 = arith.constant 3.200000e+01 : f32
    %291 = vector.broadcast %cst_90 : f32 to vector<32x1xf32>
    %292 = arith.divf %290, %291 : vector<32x1xf32>
    %293 = vector.broadcast %285 : vector<32x1xf32> to vector<32x32xf32>
    %294 = arith.subf %281, %293 : vector<32x32xf32>
    %cst_91 = arith.constant 9.99999974E-6 : f32
    %295 = vector.broadcast %cst_91 : f32 to vector<32x1xf32>
    %296 = arith.addf %292, %295 : vector<32x1xf32>
    %297 = math.rsqrt %296 : vector<32x1xf32>
    %298 = vector.broadcast %297 : vector<32x1xf32> to vector<32x32xf32>
    %299 = arith.mulf %294, %298 : vector<32x32xf32>
    %c0_92 = arith.constant 0 : index
    %c0_93 = arith.constant 0 : index
    %300 = vector.load %arg9[%c0_92, %c0_93] : memref<1x32xf32, #tpu.memory_space<vmem>>, vector<1x32xf32>
    %301 = vector.broadcast %300 : vector<1x32xf32> to vector<32x32xf32>
    %302 = arith.mulf %299, %301 : vector<32x32xf32>
    %c0_94 = arith.constant 0 : index
    %c0_95 = arith.constant 0 : index
    %303 = vector.load %arg10[%c0_94, %c0_95] : memref<1x32xf32, #tpu.memory_space<vmem>>, vector<1x32xf32>
    %304 = vector.broadcast %303 : vector<1x32xf32> to vector<32x32xf32>
    %305 = arith.addf %302, %304 : vector<32x32xf32>
    %306 = arith.truncf %305 : vector<32x32xf32> to vector<32x32xbf16>
    %cst_96 = arith.constant 0.000000e+00 : f32
    %307 = vector.broadcast %cst_96 : f32 to vector<32x32xf32>
    %c0_97 = arith.constant 0 : index
    %c0_98 = arith.constant 0 : index
    %308 = vector.load %arg11[%c0_97, %c0_98] : memref<32x128xbf16, #tpu.memory_space<vmem>>, vector<32x128xbf16>
    %cst_99 = arith.constant dense<0.000000e+00> : vector<32x128xf32>
    %309 = tpu.matmul %306, %308, %cst_99 {dimension_numbers = #tpu.dot_dimension_numbers<[1], [0], [0], [1], [0, 0, 1, 1], [], []>} : vector<32x32xbf16>, vector<32x128xbf16>, vector<32x128xf32> -> vector<32x128xf32>
    %c0_100 = arith.constant 0 : index
    %c0_101 = arith.constant 0 : index
    %310 = vector.load %arg12[%c0_100, %c0_101] : memref<1x128xf32, #tpu.memory_space<vmem>>, vector<1x128xf32>
    %311 = vector.broadcast %310 : vector<1x128xf32> to vector<32x128xf32>
    %312 = arith.addf %309, %311 : vector<32x128xf32>
    %cst_102 = arith.constant 5.000000e-01 : f32
    %313 = vector.broadcast %cst_102 : f32 to vector<32x128xf32>
    %314 = arith.mulf %313, %312 : vector<32x128xf32>
    %cst_103 = arith.constant 4.471500e-02 : f32
    %315 = vector.broadcast %cst_103 : f32 to vector<32x128xf32>
    %316 = arith.mulf %315, %312 : vector<32x128xf32>
    %317 = arith.mulf %316, %312 : vector<32x128xf32>
    %318 = arith.mulf %317, %312 : vector<32x128xf32>
    %319 = arith.addf %312, %318 : vector<32x128xf32>
    %cst_104 = arith.constant 0.797884583 : f32
    %320 = vector.broadcast %cst_104 : f32 to vector<32x128xf32>
    %321 = arith.mulf %320, %319 : vector<32x128xf32>
    %322 = math.tanh %321 : vector<32x128xf32>
    %cst_105 = arith.constant 1.000000e+00 : f32
    %323 = vector.broadcast %cst_105 : f32 to vector<32x128xf32>
    %324 = arith.addf %323, %322 : vector<32x128xf32>
    %325 = arith.mulf %314, %324 : vector<32x128xf32>
    %326 = arith.truncf %325 : vector<32x128xf32> to vector<32x128xbf16>
    %c0_106 = arith.constant 0 : index
    %c0_107 = arith.constant 0 : index
    %327 = vector.load %arg13[%c0_106, %c0_107] : memref<128x32xbf16, #tpu.memory_space<vmem>>, vector<128x32xbf16>
    %cst_108 = arith.constant dense<0.000000e+00> : vector<32x32xf32>
    %328 = tpu.matmul %326, %327, %cst_108 {dimension_numbers = #tpu.dot_dimension_numbers<[1], [0], [0], [1], [0, 0, 1, 1], [], []>} : vector<32x128xbf16>, vector<128x32xbf16>, vector<32x32xf32> -> vector<32x32xf32>
    %329 = arith.addf %307, %328 : vector<32x32xf32>
    %c0_109 = arith.constant 0 : index
    %c0_110 = arith.constant 0 : index
    %330 = vector.load %arg14[%c0_109, %c0_110] : memref<1x32xf32, #tpu.memory_space<vmem>>, vector<1x32xf32>
    %331 = vector.broadcast %330 : vector<1x32xf32> to vector<32x32xf32>
    %332 = arith.addf %329, %331 : vector<32x32xf32>
    %333 = arith.addf %281, %332 : vector<32x32xf32>
    %334 = vector.shape_cast %333 : vector<32x32xf32> to vector<4x8x32xf32>
    %c0_111 = arith.constant 0 : index
    %c0_112 = arith.constant 0 : index
    %c0_113 = arith.constant 0 : index
    %335 = vector.load %arg15[%c0_111, %c0_112, %c0_113] : memref<4x8x32xf32, #tpu.memory_space<vmem>>, vector<4x8x32xf32>
    tpu.vector_store %arg15[%c0_111, %c0_112, %c0_113], %334 {strides = array<i32>} : memref<4x8x32xf32, #tpu.memory_space<vmem>>, vector<4x8x32xf32>,
    return
  }
  func.func @transform_0(%arg0: i32, %arg1: memref<4xi32, #tpu.memory_space<smem>>) -> (i32, i32, i32) {
    %c0_i32 = arith.constant 0 : i32
    %c0_i32_0 = arith.constant 0 : i32
    %c0_i32_1 = arith.constant 0 : i32
    return %arg0, %c0_i32, %c0_i32_0 : i32, i32, i32
  }
  func.func @transform_1(%arg0: i32, %arg1: memref<4xi32, #tpu.memory_space<smem>>) -> (i32, i32) {
    %c0_i32 = arith.constant 0 : i32
    %c0_i32_0 = arith.constant 0 : i32
    %c0_i32_1 = arith.constant 0 : i32
    return %c0_i32, %c0_i32_0 : i32, i32
  }
  func.func @transform_2(%arg0: i32, %arg1: memref<4xi32, #tpu.memory_space<smem>>) -> (i32, i32) {
    %c0_i32 = arith.constant 0 : i32
    %c0_i32_0 = arith.constant 0 : i32
    %c0_i32_1 = arith.constant 0 : i32
    return %c0_i32, %c0_i32_0 : i32, i32
  }
  func.func @transform_3(%arg0: i32, %arg1: memref<4xi32, #tpu.memory_space<smem>>) -> (i32, i32) {
    %c0_i32 = arith.constant 0 : i32
    %c0_i32_0 = arith.constant 0 : i32
    %c0_i32_1 = arith.constant 0 : i32
    return %c0_i32, %c0_i32_0 : i32, i32
  }
  func.func @transform_4(%arg0: i32, %arg1: memref<4xi32, #tpu.memory_space<smem>>) -> (i32, i32) {
    %c0_i32 = arith.constant 0 : i32
    %c0_i32_0 = arith.constant 0 : i32
    %c0_i32_1 = arith.constant 0 : i32
    return %c0_i32, %c0_i32_0 : i32, i32
  }
  func.func @transform_5(%arg0: i32, %arg1: memref<4xi32, #tpu.memory_space<smem>>) -> (i32, i32) {
    %c0_i32 = arith.constant 0 : i32
    %c0_i32_0 = arith.constant 0 : i32
    %c0_i32_1 = arith.constant 0 : i32
    return %c0_i32, %c0_i32_0 : i32, i32
  }
  func.func @transform_6(%arg0: i32, %arg1: memref<4xi32, #tpu.memory_space<smem>>) -> (i32, i32) {
    %c0_i32 = arith.constant 0 : i32
    %c0_i32_0 = arith.constant 0 : i32
    %c0_i32_1 = arith.constant 0 : i32
    return %c0_i32, %c0_i32_0 : i32, i32
  }
  func.func @transform_7(%arg0: i32, %arg1: memref<4xi32, #tpu.memory_space<smem>>) -> (i32, i32) {
    %c0_i32 = arith.constant 0 : i32
    %c0_i32_0 = arith.constant 0 : i32
    %c0_i32_1 = arith.constant 0 : i32
    return %c0_i32, %c0_i32_0 : i32, i32
  }
  func.func @transform_8(%arg0: i32, %arg1: memref<4xi32, #tpu.memory_space<smem>>) -> (i32, i32) {
    %c0_i32 = arith.constant 0 : i32
    %c0_i32_0 = arith.constant 0 : i32
    %c0_i32_1 = arith.constant 0 : i32
    return %c0_i32, %c0_i32_0 : i32, i32
  }
  func.func @transform_9(%arg0: i32, %arg1: memref<4xi32, #tpu.memory_space<smem>>) -> (i32, i32) {
    %c0_i32 = arith.constant 0 : i32
    %c0_i32_0 = arith.constant 0 : i32
    %c0_i32_1 = arith.constant 0 : i32
    return %c0_i32, %c0_i32_0 : i32, i32
  }
  func.func @transform_10(%arg0: i32, %arg1: memref<4xi32, #tpu.memory_space<smem>>) -> (i32, i32) {
    %c0_i32 = arith.constant 0 : i32
    %c0_i32_0 = arith.constant 0 : i32
    %c0_i32_1 = arith.constant 0 : i32
    return %c0_i32, %c0_i32_0 : i32, i32
  }
  func.func @transform_11(%arg0: i32, %arg1: memref<4xi32, #tpu.memory_space<smem>>) -> (i32, i32) {
    %c0_i32 = arith.constant 0 : i32
    %c0_i32_0 = arith.constant 0 : i32
    %c0_i32_1 = arith.constant 0 : i32
    return %c0_i32, %c0_i32_0 : i32, i32
  }
  func.func @transform_12(%arg0: i32, %arg1: memref<4xi32, #tpu.memory_space<smem>>) -> (i32, i32) {
    %c0_i32 = arith.constant 0 : i32
    %c0_i32_0 = arith.constant 0 : i32
    %c0_i32_1 = arith.constant 0 : i32
    return %c0_i32, %c0_i32_0 : i32, i32
  }
  func.func @transform_13(%arg0: i32, %arg1: memref<4xi32, #tpu.memory_space<smem>>) -> (i32, i32, i32) {
    %c0_i32 = arith.constant 0 : i32
    %c0_i32_0 = arith.constant 0 : i32
    %c0_i32_1 = arith.constant 0 : i32
    return %arg0, %c0_i32, %c0_i32_0 : i32, i32, i32
  }
}

</mosaic_0001>

<bundles_post_ra>
// kernel: tpu_custom_call.1
= control target key start
LH: loop header
LB: loop body
LE: loop exit
PB: predicated region body
PF: predicated region fallthrough
CT: control target
= control target key end

     0   :  { %6 = vsyncpa [#allocation3], 0  ;;  %s482_s0 = inlined_call_operand.hbm [shape: f32[8,128], index: 0, kind: input, shape index: {}]   ;;  %s483_s1 = inlined_call_operand.hbm [shape: f32[16,128], index: 1, kind: output, shape index: {}]  }
   0x1   :  { %7 = vsyncpa [#allocation4], 0 }
   0x2   :  { %9 = vsyncpa [#allocation4 + $0x1], 0  ;;  %s352_s6 = smov 0   ;;  %s354_s7 = smov 0  }
   0x3   :  { %s356_s8 = smov 0   ;;  %s358_s9 = smov 0  }
   0x4 LB: > { %s373_s10 = sadd.s32 4294967295, %s338_s9   ;;  %s184_s11 = sadd.s32 4294967294, %s338_s9   ;;  %s338_s9 = sphi %s358_s9, %s499_s9   ;;  %s334_s8 = sphi %s356_s8, %s498_s8   ;;  %s330_s7 = sphi %s354_s7, %s497_s7   ;;  %s326_s6 = sphi %s352_s6, %s496_s6  }
   0x5   : > { %s377_s12 = sadd.s32 1, %s338_s9   ;;  %s43_s13 = sadd.s32 1, %s334_s8 }
   0x6   : > { %s40_s14 = ssub.s32 %s338_s9, %s377_s12  ;;  %p53_p0 = scmp.ne.s32.totalorder %s334_s8, %s330_s7 }
   0x7   : > { %p41_p1 = scmp.eq.s32.totalorder %s40_s14, 0  ;;  %p54_p2 = scmp.eq.s32.totalorder %s373_s10, 1 }
   0x8   : > { %p59_p3 = scmp.ne.s32.totalorder %s330_s7, %s326_s6  ;;  %p60_p4 = scmp.eq.s32.totalorder %s184_s11, 1 }
   0x9   : > { %s388_s15 = scalar_select %p41_p1, %s334_s8, %s43_s13  }
   0xa   : > { %p390_p5 = por %p54_p2, %p53_p0  ;;  %p394_p6 = por %p60_p4, %p59_p3 }
   0xb   : > { %p185_p7 = scmp.ge.s32.totalorder %s338_s9, 1  ;;  %p67_p8 = scmp.lt.s32.totalorder %s338_s9, 3 }
   0xc   : > { %s487_s16 = scalar_select %p390_p5, 1, 0 }
   0xd   : > { %s488_s17 = scalar_select %p394_p6, 1, 0 }
   0xe   : > { %p484_p9 = scmp.eq.s32.totalorder %s373_s10, 0  ;;  %p401_p10 = pnand %p185_p7, %p67_p8 }
   0xf   : > { %s340_s19 = smov [#allocation2]   ;;  %s244_s24 = scalar_lea.hbm %s482_s0, 128 }
  0x10   : > { %s489_s18 = scalar_select %p401_p10, 1, 0 }
  0x11   : > { %s80_s20 = sshll.u32 %s340_s19, 4  ;;  %p200_p11 = pneg %p401_p10  ;;  %s81_s20 = int_to_ptr.vmem [resolvable:$true] %s80_s20 }
  0x12   : > { %p245_p13 = scmp.ne.s32.totalorder %s482_s0, %s244_s24  ;;  %p251_p3 = scmp.lt.u32.totalorder %s244_s24, %s482_s0 }
  0x13   : > { %p409_p12 = pnand %p484_p9, %p200_p11 }
  0x15   : > { %p246_p0 = pneg %p409_p12 }
  0x17   : > { %p247_p1 = pnand %p246_p0, %p245_p13 }
  0x19   : > { %p248_p2 = pneg %p247_p1 }
  0x1b   : > { %p253_p4 = pnand %p251_p3, %p248_p2 }
  0x1d   : > { %256 = shalt.err (!%p253_p4)
}
  0x1e   : > { %s257_s29 = scalar_lea.vmem %s81_s20, 128  ;;  %p265_p9 = scmp.lt.s32.totalorder %s81_s20, %s81_s20 }
  0x1f   : > { %p258_p7 = scmp.ne.s32.totalorder %s81_s20, %s257_s29  ;;  %p266_p6 = scmp.lt.s32.totalorder %s257_s29, %s257_s29 }
  0x21   : > { %p260_p8 = pnand %p258_p7, %p246_p0  ;;  %p267_p5 = por %p266_p6, %p265_p9 }
  0x23   : > { %p261_p11 = pneg %p260_p8 }
  0x25   : > { %p268_p10 = pnand %p267_p5, %p261_p11 }
  0x27   : > { %271 = shalt.err (!%p268_p10)
}
  0x28   : > { %203 = dma.hbm_to_vmem [thread:$0]  (!%p409_p12), %s482_s0, 128, %s81_s20, [#allocation3]  }
  0x29   : > { %p491_p13 = scmp.ne.s32.totalorder %s489_s18, 0 }
  0x2a   : > { %p492_p1 = scmp.eq.s32.totalorder (!%p491_p13), %s373_s10, 0 }
  0x2b   : > { %93 = sbr.rel (%p491_p13) target bundleno = 77 (0x4d), region = 24 }
  0x32   : > { %317 = dma.done.wait (%p492_p1), [#allocation3], 128   ;;  %p493_p0 = pmov %p492_p1 }
  0x33   : > { %s105_s3 = sand.u32 1, %s330_s7   ;;  %s191_s13 = sshll.u32 %s373_s10, 7  ;;  %v108_v0 = vld [vmem:[#allocation2] sm:$0xff] }
  0x34   : > { %319 = vsyncadd (%p493_p0), [#allocation3], 4294967168  ;;  %s189_s4 = sshll.u32 %s105_s3, 3  ;;  %v109_v1 = vmul.f32 2.0, %v108_v0  ;;  %s442_s19 = scalar_lea.hbm %s483_s1, %s191_s13 }
  0x35   : > { %s107_s5 = scalar_lea.vmem [#allocation5], %s189_s4  ;;  %s112_s20 = scalar_lea.sflag [#allocation4], %s105_s3 }
  0x36   : > { %s125_s11 = sshll.u32 %s107_s5, 4  ;;  %110 = vst [vmem:[%s107_s5] sm:$0xff] %v109_v1  ;;  %p494_p6 = scmp.ne.s32.totalorder %s487_s16, 0  ;;  %s437_s11 = int_to_ptr.vmem [resolvable:$true] %s125_s11 }
  0x37   : > { %s272_s21 = scalar_lea.vmem %s437_s11, 128  ;;  %s341_s10 = smov [#allocation5]  }
  0x38   : > { %p273_p5 = scmp.ne.s32.totalorder %s437_s11, %s272_s21  ;;  %s276_s22 = sshll.u32 %s341_s10, 4  ;;  %s277_s22 = int_to_ptr.vmem [resolvable:$false] %s276_s22 }
  0x39   : > { %s278_s23 = scalar_lea.vmem %s277_s22, 256  ;;  %p279_p12 = scmp.lt.s32.totalorder %s437_s11, %s277_s22 }
  0x3a   : > { %p274_p9 = pnand %p273_p5, %p494_p6  ;;  %p280_p2 = scmp.lt.s32.totalorder %s278_s23, %s272_s21 }
  0x3c   : > { %p275_p10 = pneg %p274_p9  ;;  %p281_p3 = por %p280_p2, %p279_p12 }
  0x3e   : > { %p282_p4 = pnand %p281_p3, %p275_p10 }
  0x40   : > { %285 = shalt.err (!%p282_p4)
}
  0x41   : > { %s286_s24 = scalar_lea.hbm %s442_s19, 128  ;;  %s290_s27 = scalar_lea.hbm %s483_s1, 256 }
  0x42   : > { %p287_p7 = scmp.ne.s32.totalorder %s442_s19, %s286_s24  ;;  %p291_p13 = scmp.lt.u32.totalorder %s442_s19, %s483_s1 }
  0x43   : > { %p292_p1 = scmp.lt.u32.totalorder %s290_s27, %s286_s24  ;;  %p294_p5 = scmp.lt.u32.totalorder %s286_s24, %s442_s19 }
  0x44   : > { %p288_p8 = pnand %p287_p7, %p494_p6 }
  0x45   : > { %p293_p0 = por %p292_p1, %p291_p13 }
  0x46   : > { %p289_p11 = pneg %p288_p8 }
  0x47   : > { %p295_p9 = por %p294_p5, %p293_p0 }
  0x49   : > { %p296_p10 = pnand %p295_p9, %p289_p11 }
  0x4b   : > { %299 = shalt.err (!%p296_p10)
}
  0x4c   : > { %198 = dma.vmem_to_hbm [thread:$0]  (%p494_p6), %s437_s11, 128, %s442_s19, %s112_s20  }
  0x4d PF: > { %p210_p12 = scmp.ge.s32.totalorder %s338_s9, 2  ;;  %s137_s30 = sand.u32 1, %s326_s6  }
  0x4e   : > { %p495_p2 = scmp.ne.s32.totalorder %s488_s17, 0  ;;  %s138_s2 = scalar_lea.sflag [#allocation4], %s137_s30 }
  0x50   : > { %p205_p3 = pnand %p210_p12, %p495_p2 }
  0x52   : > { %321 = dma.done.wait (!%p205_p3), %s138_s2, 128  }
  0x53   : > { %323 = vsyncadd (!%p205_p3), %s138_s2, 4294967168  ;;  %p12_p4 = scmp.ge.s32.totalorder %s377_s12, 4   ;;  %s496_s6 = smov %s330_s7 }
  0x54   : > { %s497_s7 = smov %s334_s8  ;;  %s498_s8 = smov %s388_s15 }
  0x55   : > { %s499_s9 = smov %s377_s12  ;;  %14 = sbr.rel (!%p12_p4) target bundleno = 4 (0x4), region = 61 }
  0x5c   :  { %143 = vsyncpa [#allocation3], 1 }
  0x5d   :  { %145 = vsyncpa [#allocation3 + $0x1], 1 }
  0x5e   :  { %146 = vsyncpa [#allocation4], 1 }
  0x5f   :  { %148 = vsyncpa [#allocation4 + $0x1], 1 }

// kernel: glm_multi_token_cloze_forward.5
= control target key start
LH: loop header
LB: loop body
LE: loop exit
PB: predicated region body
PF: predicated region fallthrough
CT: control target
= control target key end

     0   :  { %s996_s21 = smov 0   ;;  %s998_s22 = smov 0   ;;  %s1202_s0 = inlined_call_operand.vmem [shape: f32[4,8,32], index: 0, kind: input, shape index: {}]   ;;  %s1203_s1 = inlined_call_operand.vmem [shape: f32[1,32], index: 1, kind: input, shape index: {}]   ;;  %s1204_s2 = inlined_call_operand.vmem [shape: f32[1,32], index: 2, kind: input, shape index: {}]   ;;  %s1205_s3 = inlined_call_operand.vmem [shape: bf16[64,32], index: 3, kind: input, shape index: {}]   ;;  %s1206_s4 = inlined_call_operand.vmem [shape: s32[4,8,1], index: 4, kind: input, shape index: {}]   ;;  %s1207_s5 = inlined_call_operand.vmem [shape: f32[4,8,1], index: 5, kind: input, shape index: {}]   ;;  %s1208_s6 = inlined_call_operand.vmem [shape: f32[4,1,1], index: 6, kind: output, shape index: {}]  }
   0x1   :  { %s1000_s23 = smov 0  }
   0x2 LB: > { %s25_s24 = sadd.s32 1, %s952_s22  ;;  %p841_p0 = scmp.ge.s32.totalorder %s956_s23, 1  ;;  %s956_s23 = sphi %s1000_s23, %s16_s23   ;;  %s952_s22 = sphi %s998_s22, %s1210_s22   ;;  %s948_s21 = sphi %s996_s21, %s1209_s21  }
   0x3   : > { %p26_p1 = scmp.ge.s32.totalorder %s25_s24, 2  ;;  %p258_p2 = scmp.lt.s32.totalorder %s956_s23, 3 }
   0x5   : > { %s1212_s24 = smov (%p26_p1, %s25_s24), 0  ;;  %p259_p3 = pnand %p841_p0, %p258_p2 }
   0x6   : > { %s842_s25 = sshll.u32 (!%p259_p3), %s948_s21, 2  ;;  %p844_p5 = scmp.ne.s32.totalorder (!%p259_p3), %s948_s21, 0 }
   0x7   : > { %262 = sbr.rel (%p259_p3) target bundleno = 1054 (0x41e), region = 44  ;;  %p309_p4 = scmp.lt.s32.totalorder (!%p259_p3), %s842_s25, 7 }
   0xe   : > { %s1214_s25 = smov (!%p309_p4, %s842_s25), 7  ;;  %335 = sbr.rel (%p844_p5) target bundleno = 340 (0x154), region = 48 }
   0xf   : > { %s843_s26 = sshll.u32 %s1214_s25, 2  ;;  %v336_v0 = vld [vmem:[%s1202_s0] sm:$0xff] (!%p844_p5)  ;;  %vm340_vm0 = vcmask (!%p844_p5), 261120   ;;  %v338_v1 = vld [vmem:[%s1202_s0 + $0x10] sm:$0xff] (!%p844_p5)  ;;  %v337_v2 = vld [vmem:[%s1202_s0 + $0x8] sm:$0xff] (!%p844_p5)  ;;  %vm420_vm1 = vcmask (!%p844_p5), 7168  }
  0x10   : > { %s1020_s29 = scalar_lea.vmem %s1205_s3, %s843_s26  ;;  %v341_v3 = vsel (!%p844_p5), %vm340_vm0, %v336_v0, 0.0  ;;  %v347_v4 = vsel (!%p844_p5), %vm340_vm0, %v338_v1, 0.0  ;;  %v339_v5 = vld [vmem:[%s1202_s0 + $0x18] sm:$0xff] (!%p844_p5)  ;;  %v344_v6 = vsel (!%p844_p5), %vm340_vm0, %v337_v2, 0.0  ;;  %v958_v28 = vmov (!%p844_p5), -1e+30  }
  0x11   : > { %342 = vadd.xlane.f32.xlu0 (!%p844_p5), %v341_v3  ;;  %348 = vadd.xlane.f32.xlu1 (!%p844_p5), %v347_v4  ;;  %v350_v7 = vsel (!%p844_p5), %vm340_vm0, %v339_v5, 0.0  ;;  %421 = vst.msk [vmem:[#allocation3] sm:$0xff] (!%p844_p5), %vm420_vm1, %v958_v28  ;;  %422 = vst.msk [vmem:[#allocation3 + $0x8] sm:$0xff] (!%p844_p5), %vm420_vm1, %v958_v28  ;;  %v959_v29 = vmov (!%p844_p5), 0.0   ;;  %v845_v44 = vld [vmem:[%s1203_s1] ss:$0 sm:$0xff] (!%p844_p5) }
  0x12   : > { %423 = vst.msk [vmem:[#allocation3 + $0x10] sm:$0xff] (!%p844_p5), %vm420_vm1, %v958_v28  ;;  %424 = vst.msk [vmem:[#allocation3 + $0x18] sm:$0xff] (!%p844_p5), %vm420_vm1, %v958_v28  ;;  %v846_v49 = vld [vmem:[%s1204_s2] ss:$0 sm:$0xff] (!%p844_p5) }
  0x13   : > { %425 = vst.msk [vmem:[#allocation4] sm:$0xff] (!%p844_p5), %vm420_vm1, %v959_v29  ;;  %426 = vst.msk [vmem:[#allocation4 + $0x8] sm:$0xff] (!%p844_p5), %vm420_vm1, %v959_v29 }
  0x14   : > { %427 = vst.msk [vmem:[#allocation4 + $0x10] sm:$0xff] (!%p844_p5), %vm420_vm1, %v959_v29  ;;  %428 = vst.msk [vmem:[#allocation4 + $0x18] sm:$0xff] (!%p844_p5), %vm420_vm1, %v959_v29 }
  0x15   : > { %345 = vadd.xlane.f32.xlu0 %v344_v6  ;;  %351 = vadd.xlane.f32.xlu1 %v350_v7  ;;  %429 = vst.msk [vmem:[#allocation5] sm:$0xff] %vm420_vm1, %v959_v29  ;;  %430 = vst.msk [vmem:[#allocation5 + $0x8] sm:$0xff] %vm420_vm1, %v959_v29 }
  0x16   : > { %431 = vst.msk [vmem:[#allocation5 + $0x10] sm:$0xff] %vm420_vm1, %v959_v29  ;;  %432 = vst.msk [vmem:[#allocation5 + $0x18] sm:$0xff] %vm420_vm1, %v959_v29 }
  0x9e   : > { %v343_v8 = vpop.xlane.xlu0 %342  ;;  %v349_v9 = vpop.xlane.xlu1 %348 }
  0x9f   : > { %v354_v10 = vmul.f32 0.03125, %v343_v8  ;;  %v356_v11 = vmul.f32 0.03125, %v349_v9 }
  0xa1   : > { %v358_v12 = vsub.f32 %v336_v0, %v354_v10  ;;  %v360_v13 = vsub.f32 %v338_v1, %v356_v11 }
  0xa2   : > { %v346_v14 = vpop.xlane.xlu0 %345  ;;  %v352_v15 = vpop.xlane.xlu1 %351 }
  0xa3   : > { %v355_v16 = vmul.f32 0.03125, %v346_v14  ;;  %v357_v17 = vmul.f32 0.03125, %v352_v15  ;;  %v362_v18 = vmul.f32 %v358_v12, %v358_v12  ;;  %v364_v19 = vmul.f32 %v360_v13, %v360_v13 }
  0xa5   : > { %v359_v20 = vsub.f32 %v337_v2, %v355_v16  ;;  %v361_v21 = vsub.f32 %v339_v5, %v357_v17  ;;  %v366_v22 = vsel %vm340_vm0, %v362_v18, 0.0  ;;  %v372_v23 = vsel %vm340_vm0, %v364_v19, 0.0 }
  0xa6   : > { %367 = vadd.xlane.f32.xlu0 %v366_v22 }
  0xa7   : > { %v363_v24 = vmul.f32 %v359_v20, %v359_v20  ;;  %v365_v25 = vmul.f32 %v361_v21, %v361_v21 }
  0xa9   : > { %v369_v26 = vsel %vm340_vm0, %v363_v24, 0.0  ;;  %v375_v27 = vsel %vm340_vm0, %v365_v25, 0.0 }
  0xaa   : > { %373 = vadd.xlane.f32.xlu0 %v372_v23  ;;  %370 = vadd.xlane.f32.xlu1 %v369_v26 }
  0xae   : > { %376 = vadd.xlane.f32.xlu1 %v375_v27 }
 0x133   : > { %v368_v30 = vpop.xlane.xlu0 %367 }
 0x134   : > { %v378_v31 = vmul.f32 0.03125, %v368_v30 }
 0x136   : > { %v382_v32 = vadd.f32 1e-05, %v378_v31 }
 0x137   : > { %v371_v33 = vpop.xlane.xlu1 %370  ;;  %v374_v34 = vpop.xlane.xlu0 %373 }
 0x138   : > { %898 = vrsqrt.f32 %v382_v32  ;;  %v379_v35 = vmul.f32 0.03125, %v371_v33  ;;  %v380_v36 = vmul.f32 0.03125, %v374_v34 }
 0x13a   : > { %v383_v37 = vadd.f32 1e-05, %v379_v35  ;;  %v384_v38 = vadd.f32 1e-05, %v380_v36 }
 0x13b   : > { %v377_v39 = vpop.xlane.xlu1 %376 }
 0x13c   : > { %900 = vrsqrt.f32 %v383_v37  ;;  %v381_v40 = vmul.f32 0.03125, %v377_v39 }
 0x13d   : > { %902 = vrsqrt.f32 %v384_v38 }
 0x13e   : > { %v385_v41 = vadd.f32 1e-05, %v381_v40 }
 0x140   : > { %904 = vrsqrt.f32 %v385_v41 }
 0x142   : > { %v899_v42 = vpop.eup %898 }
 0x143   : > { %v390_v43 = vmul.f32 %v899_v42, %v358_v12 }
 0x145   : > { %v401_v47 = vmul.f32 %v845_v44, %v390_v43 }
 0x146   : > { %v901_v45 = vpop.eup %900 }
 0x147   : > { %v903_v46 = vpop.eup %902  ;;  %v391_v48 = vmul.f32 %v901_v45, %v359_v20  ;;  %v412_v53 = vadd.f32 %v846_v49, %v401_v47 }
 0x148   : > { %v392_v50 = vmul.f32 %v903_v46, %v360_v13 }
 0x149   : > { %v402_v51 = vmul.f32 %v845_v44, %v391_v48 }
 0x14a   : > { %v905_v52 = vpop.eup %904  ;;  %v403_v55 = vmul.f32 %v845_v44, %v392_v50 }
 0x14b   : > { %v413_v54 = vadd.f32 %v846_v49, %v402_v51  ;;  %v393_v56 = vmul.f32 %v905_v52, %v361_v21 }
 0x14c   : > { %v414_v59 = vadd.f32 %v846_v49, %v403_v55 }
 0x14d   : > { %v416_v57 = vpack.c.bf16 %v413_v54, %v412_v53  ;;  %v404_v58 = vmul.f32 %v845_v44, %v393_v56 }
 0x14f   : > { %418 = vst.msk [vmem:[#allocation2] sm:$0xff] %vm340_vm0, %v416_v57  ;;  %v415_v60 = vadd.f32 %v846_v49, %v404_v58 }
 0x151   : > { %v417_v61 = vpack.c.bf16 %v415_v60, %v414_v59 }
 0x153   : > { %419 = vst.msk [vmem:[#allocation2 + $0x8] sm:$0xff] %vm340_vm0, %v417_v61 }
 0x154 PF: > { %v908_v62 = vld [vmem:[%s1020_s29] sm:$0xff]   ;;  %vm449_vm2 = vcmask 261120   ;;  %v909_v63 = vld [vmem:[%s1020_s29 + $0x8] sm:$0xff]   ;;  %v960_v12 = vmov 0   ;;  %vm599_vm3 = vcmask 7168   ;;  %v610_v31 = vld [vmem:[%s1206_s4 + $0x10] sm:$0xff]  ;;  %v613_v36 = vlaneseq }
 0x155   : > { %869 = vmatprep.subr.msk.bf16.mxu0 %vm449_vm2, %v908_v62  ;;  %v457_v0 = vsel %vm449_vm2, %v908_v62, 0  ;;  %v460_v2 = vsel %vm449_vm2, %v909_v63, 0  ;;  %907 = vset.pattern.permute.xlu1 %v960_v12  ;;  %v608_v29 = vld [vmem:[%s1206_s4] sm:$0xff]  ;;  %v609_v30 = vld [vmem:[%s1206_s4 + $0x8] sm:$0xff]  ;;  %v611_v32 = vld [vmem:[%s1206_s4 + $0x18] sm:$0xff]  ;;  %s851_s30 = sshll.u32 %s948_s21, 5 }
 0x156   : > { %v433_v1 = vld [vmem:[#allocation2] sm:$0xff]  ;;  %862 = vmatpush3.bf16.xpose.msra.mxu0 %v457_v0  ;;  %906 = vset.pattern.permute.xlu0 %v960_v12  ;;  %v614_v40 = vand.u32 127, %v613_v36  ;;  %v615_v43 = vstv %s851_s30  ;;  %p852_p6 = scmp.ne.s32.totalorder %s948_s21, 1 }
 0x157   : > { %865 = vmatprep.mubr.msk.bf16.mxu0 %vm449_vm2, %v433_v1  ;;  %870 = vmatprep.subr.msk.bf16.mxu0 %vm449_vm2, %v909_v63  ;;  %v1077_v14 = vld [vmem:[#allocation3] sm:$0xff]  ;;  %v1092_v21 = vld [vmem:[#allocation3 + $0x8] sm:$0xff]  ;;  %vm729_vm8 = vcmask (!%p852_p6), 0  }
 0x158   : > { %v1075_v13 = vld [vmem:[#allocation3 + $0x10] sm:$0xff]  ;;  %v1085_v19 = vld [vmem:[#allocation3 + $0x18] sm:$0xff]  ;;  %v616_v46 = vadd.s32 %v615_v43, %v614_v40 }
 0x15a   : > { %v434_v3 = vld [vmem:[#allocation2 + $0x8] sm:$0xff]  ;;  %v533_v12 = vld [vmem:[#allocation4 + $0x10] sm:$0xff] }
 0x15e   : > { %864 = vmatpush3.bf16.xpose.msra.mxu0 %v460_v2 }
 0x165   : > { %866 = vmatmul.mubr.msk.bf16.vlgmr.msra.gmra.mrb[0].mxu0 %vm449_vm2, %v434_v3 }
 0x238   : > { %v1059_v4 = vpop.f32.mrb[0].mxu0 }
 0x239   : > { %v1061_v5 = vpop.f32.mrb[1].mxu0  ;;  %v521_v6 = vsel %vm449_vm2, %v1059_v4, -inf }
 0x23a   : > { %522 = vmax.xlane.f32.xlu1 %v521_v6  ;;  %v1065_v7 = vpop.f32.mrb[2].mxu0  ;;  %v515_v8 = vsel %vm449_vm2, %v1061_v5, -inf }
 0x23b   : > { %516 = vmax.xlane.f32.xlu0 %v515_v8  ;;  %v1069_v9 = vpop.f32.mrb[3].mxu0  ;;  %v524_v10 = vsel %vm449_vm2, %v1065_v7, -inf }
 0x23c   : > { %v518_v11 = vsel %vm449_vm2, %v1069_v9, -inf }
 0x23e   : > { %525 = vmax.xlane.f32.xlu1 %v524_v10 }
 0x23f   : > { %519 = vmax.xlane.f32.xlu0 %v518_v11 }
 0x2c7   : > { %v523_v15 = vpop.xlane.xlu1 %522 }
 0x2c8   : > { %v1080_v16 = vmax.f32 %v1075_v13, %v523_v15  ;;  %v517_v17 = vpop.xlane.xlu0 %516  ;;  %v618_v15 = vld [vmem:[#allocation5 + $0x8] sm:$0xff] }
 0x2c9   : > { %v1083_v18 = vmax.f32 %v1077_v14, %v517_v17 }
 0x2ca   : > { %v537_v20 = vsub.f32 %v1075_v13, %v1080_v16  ;;  %606 = vst.msk [vmem:[#allocation3 + $0x10] sm:$0xff] %vm599_vm3, %v1080_v16  ;;  %563 = vperm.xlu1 %907, %v1080_v16  }
 0x2cb   : > { %v535_v22 = vsub.f32 %v1077_v14, %v1083_v18  ;;  %604 = vst.msk [vmem:[#allocation3] sm:$0xff] %vm599_vm3, %v1083_v18  ;;  %v526_v23 = vpop.xlane.xlu1 %525  ;;  %553 = vperm.xlu0 %906, %v1083_v18  }
 0x2cc   : > { %v1100_v24 = vmax.f32 %v1085_v19, %v526_v23  ;;  %v520_v25 = vpop.xlane.xlu0 %519  ;;  %v543_v6 = vmul.f32 1.442695, %v537_v20  ;;  %v531_v20 = vld [vmem:[#allocation4] sm:$0xff] }
 0x2cd   : > { %v1103_v26 = vmax.f32 %v1092_v21, %v520_v25 }
 0x2ce   : > { %v538_v27 = vsub.f32 %v1085_v19, %v1100_v24  ;;  %607 = vst.msk [vmem:[#allocation3 + $0x18] sm:$0xff] %vm599_vm3, %v1100_v24  ;;  %568 = vperm.xlu1 %907, %v1100_v24   ;;  %v532_v19 = vld [vmem:[#allocation4 + $0x8] sm:$0xff] }
 0x2cf   : > { %v536_v28 = vsub.f32 %v1092_v21, %v1103_v26  ;;  %605 = vst.msk [vmem:[#allocation3 + $0x8] sm:$0xff] %vm599_vm3, %v1103_v26 }
 0x2d1   : > { %v541_v8 = vmul.f32 1.442695, %v536_v28  ;;  %v534_v28 = vld [vmem:[#allocation4 + $0x18] sm:$0xff] }
 0x2d2   : > { %558 = vperm.xlu1 %907, %v1103_v26  }
 0x2d6   : > { %622 = vperm.xlu1 %907, %v608_v29  }
 0x2da   : > { %625 = vperm.xlu1 %907, %v609_v30  }
 0x2de   : > { %628 = vperm.xlu1 %907, %v610_v31  }
 0x2e2   : > { %631 = vperm.xlu1 %907, %v611_v32  }
 0x349   : > { %v564_v33 = vpop.permute.xlu1 %563 }
 0x34a   : > { %v573_v34 = vsub.f32 %v1059_v4, %v564_v33  ;;  %v554_v35 = vpop.permute.xlu0 %553  ;;  %v619_v33 = vld [vmem:[#allocation5 + $0x10] sm:$0xff] }
 0x34b   : > { %v571_v37 = vsub.f32 %v1061_v5, %v554_v35 }
 0x34c   : > { %v579_v38 = vmul.f32 1.442695, %v573_v34 }
 0x34d   : > { %v569_v39 = vpop.permute.xlu1 %568  ;;  %v575_v41 = vmul.f32 1.442695, %v571_v37 }
 0x34e   : > { %910 = vpow2.f32 %v579_v38  ;;  %v574_v42 = vsub.f32 %v1065_v7, %v569_v39  ;;  %v620_v38 = vld [vmem:[#allocation5 + $0x18] sm:$0xff] }
 0x34f   : > { %912 = vpow2.f32 %v575_v41 }
 0x350   : > { %v581_v47 = vmul.f32 1.442695, %v574_v42 }
 0x351   : > { %v559_v44 = vpop.permute.xlu1 %558 }
 0x352   : > { %v572_v45 = vsub.f32 %v1069_v9, %v559_v44 }
 0x354   : > { %v577_v48 = vmul.f32 1.442695, %v572_v45 }
 0x355   : > { %v623_v49 = vpop.permute.xlu1 %622 }
 0x356   : > { %914 = vpow2.f32 %v577_v48  ;;  %vm633_vm4 = vcmp.eq.s32.totalorder %v616_v46, %v623_v49  ;;  %v666_v49 = vld [vmem:[#allocation3 + $0x8] sm:$0xff] (!%p852_p6) }
 0x357   : > { %916 = vpow2.f32 %v581_v47  ;;  %v637_v50 = vsel %vm633_vm4, %v1061_v5, 0.0 }
 0x358   : > { %v641_v51 = vsel %vm449_vm2, %v637_v50, 0.0  ;;  %v911_v52 = vpop.eup %910  ;;  %918 = vpow2.f32 %v543_v6  ;;  %v695_v6 = vld [vmem:[%s1207_s5 + $0x10] sm:$0xff] (!%p852_p6) }
 0x359   : > { %642 = vadd.xlane.f32.xlu0 %v641_v51  ;;  %v626_v53 = vpop.permute.xlu1 %625  ;;  %v589_v55 = vsel %vm449_vm2, %v911_v52, 0.0  ;;  %v913_v57 = vpop.eup %912 }
 0x35a   : > { %vm634_vm5 = vcmp.eq.s32.totalorder %v616_v46, %v626_v53  ;;  %v583_v60 = vsel %vm449_vm2, %v913_v57, 0.0  ;;  %v693_v57 = vld [vmem:[%s1207_s5] sm:$0xff] (!%p852_p6) }
 0x35b   : > { %v638_v54 = vsel %vm634_vm5, %v1069_v9, 0.0  ;;  %v617_v9 = vld [vmem:[#allocation5] sm:$0xff] }
 0x35c   : > { %v644_v56 = vsel %vm449_vm2, %v638_v54, 0.0 }
 0x35d   : > { %590 = vadd.xlane.f32.xlu0 %v589_v55  ;;  %645 = vadd.xlane.f32.xlu1 %v644_v56  ;;  %v629_v58 = vpop.permute.xlu1 %628  ;;  %v667_v55 = vld [vmem:[#allocation3 + $0x10] sm:$0xff] (!%p852_p6) }
 0x35e   : > { %vm635_vm6 = vcmp.eq.s32.totalorder %v616_v46, %v629_v58 }
 0x35f   : > { %v639_v0 = vsel %vm635_vm6, %v1059_v4, 0.0  ;;  %v539_v4 = vmul.f32 1.442695, %v535_v22 }
 0x360   : > { %v915_v59 = vpop.eup %914  ;;  %v647_v2 = vsel %vm449_vm2, %v639_v0, 0.0 }
 0x361   : > { %v917_v61 = vpop.eup %916  ;;  %v632_v62 = vpop.permute.xlu1 %631  ;;  %584 = vadd.xlane.f32.xlu1 %v583_v60  ;;  %v586_v63 = vsel %vm449_vm2, %v915_v59, 0.0  ;;  %920 = vpow2.f32 %v539_v4  ;;  %v668_v60 = vld [vmem:[#allocation3 + $0x18] sm:$0xff] (!%p852_p6) }
 0x362   : > { %vm636_vm7 = vcmp.eq.s32.totalorder %v616_v46, %v632_v62  ;;  %587 = vadd.xlane.f32.xlu0 %v586_v63  ;;  %v592_v1 = vsel %vm449_vm2, %v917_v61, 0.0  ;;  %922 = vpow2.f32 %v541_v8  ;;  %v919_v10 = vpop.eup %918  ;;  %v665_v46 = vld [vmem:[#allocation3] sm:$0xff] (!%p852_p6)  ;;  %v694_v62 = vld [vmem:[%s1207_s5 + $0x8] sm:$0xff] (!%p852_p6) }
 0x363   : > { %v640_v3 = vsel %vm636_vm7, %v1065_v7, 0.0  ;;  %v545_v7 = vmul.f32 1.442695, %v538_v27  ;;  %v549_v14 = vmul.f32 %v919_v10, %v533_v12 }
 0x364   : > { %v650_v5 = vsel %vm449_vm2, %v640_v3, 0.0 }
 0x365   : > { %593 = vadd.xlane.f32.xlu1 %v592_v1  ;;  %924 = vpow2.f32 %v545_v7 }
 0x366   : > { %648 = vadd.xlane.f32.xlu0 %v647_v2 }
 0x369   : > { %651 = vadd.xlane.f32.xlu1 %v650_v5 }
 0x36b   : > { %v921_v16 = vpop.eup %920 }
 0x36c   : > { %v923_v21 = vpop.eup %922  ;;  %v547_v24 = vmul.f32 %v921_v16, %v531_v20 }
 0x36d   : > { %v548_v27 = vmul.f32 %v923_v21, %v532_v19 }
 0x36f   : > { %v925_v25 = vpop.eup %924 }
 0x370   : > { %v550_v32 = vmul.f32 %v925_v25, %v534_v28 }
 0x3e6   : > { %v643_v11 = vpop.xlane.xlu0 %642 }
 0x3e7   : > { %v653_v13 = vadd.f32 %v643_v11, %v617_v9  ;;  %v696_v9 = vld [vmem:[%s1207_s5 + $0x18] sm:$0xff] (!%p852_p6) }
 0x3e9   : > { %657 = vst.msk [vmem:[#allocation5] sm:$0xff] %vm599_vm3, %v653_v13 }
 0x3ea   : > { %v646_v17 = vpop.xlane.xlu1 %645  ;;  %v591_v18 = vpop.xlane.xlu0 %590 }
 0x3eb   : > { %v654_v22 = vadd.f32 %v646_v17, %v618_v15  ;;  %v597_v23 = vadd.f32 %v591_v18, %v549_v14 }
 0x3ed   : > { %658 = vst.msk [vmem:[#allocation5 + $0x8] sm:$0xff] %vm599_vm3, %v654_v22  ;;  %602 = vst.msk [vmem:[#allocation4 + $0x10] sm:$0xff] %vm599_vm3, %v597_v23 }
 0x3ee   : > { %v585_v26 = vpop.xlane.xlu1 %584 }
 0x3ef   : > { %v595_v29 = vadd.f32 %v585_v26, %v547_v24  ;;  %v588_v30 = vpop.xlane.xlu0 %587 }
 0x3f0   : > { %v596_v31 = vadd.f32 %v588_v30, %v548_v27  ;;  %v685_v50 = vld [vmem:[#allocation5] sm:$0xff] (!%p852_p6) }
 0x3f1   : > { %600 = vst.msk [vmem:[#allocation4] sm:$0xff] %vm599_vm3, %v595_v29 }
 0x3f2   : > { %601 = vst.msk [vmem:[#allocation4 + $0x8] sm:$0xff] %vm599_vm3, %v596_v31  ;;  %v594_v34 = vpop.xlane.xlu1 %593 }
 0x3f3   : > { %v598_v35 = vadd.f32 %v594_v34, %v550_v32  ;;  %v649_v36 = vpop.xlane.xlu0 %648  ;;  %664 = sbr.rel (%p852_p6) target bundleno = 1054 (0x41e), region = 52 }
 0x3f4   : > { %v655_v37 = vadd.f32 %v649_v36, %v619_v33  ;;  %v671_v43 = vld [vmem:[#allocation4 + $0x10] sm:$0xff] (!%p852_p6)  ;;  %v686_v54 = vld [vmem:[#allocation5 + $0x8] sm:$0xff] (!%p852_p6) }
 0x3f5   : > { %603 = vst.msk [vmem:[#allocation4 + $0x18] sm:$0xff] %vm599_vm3, %v598_v35 }
 0x3f6   : > { %659 = vst.msk [vmem:[#allocation5 + $0x10] sm:$0xff] %vm599_vm3, %v655_v37  ;;  %v652_v39 = vpop.xlane.xlu1 %651 }
 0x3f7   : > { %v656_v40 = vadd.f32 %v652_v39, %v620_v38 }
 0x3f8   : > { %v669_v41 = vld [vmem:[#allocation4] sm:$0xff] (!%p852_p6) }
 0x3f9   : > { %660 = vst.msk [vmem:[#allocation5 + $0x18] sm:$0xff] %vm599_vm3, %v656_v40  ;;  %926 = vlog2.f32 (!%p852_p6), %v669_v41  ;;  %v670_v42 = vld [vmem:[#allocation4 + $0x8] sm:$0xff] (!%p852_p6) }
 0x3fa   : > { %928 = vlog2.f32 %v670_v42 }
 0x3fb   : > { %930 = vlog2.f32 %v671_v43 }
 0x3fc   : > { %v672_v44 = vld [vmem:[#allocation4 + $0x18] sm:$0xff] }
 0x3fd   : > { %932 = vlog2.f32 %v672_v44  ;;  %v687_v63 = vld [vmem:[#allocation5 + $0x10] sm:$0xff] }
 0x400   : > { %v688_v3 = vld [vmem:[#allocation5 + $0x18] sm:$0xff] }
 0x403   : > { %v927_v45 = vpop.eup %926 }
 0x404   : > { %v929_v47 = vpop.eup %928  ;;  %v674_v48 = vmul.f32 0.6931472, %v927_v45 }
 0x405   : > { %v676_v51 = vmul.f32 0.6931472, %v929_v47  ;;  %v931_v52 = vpop.eup %930 }
 0x406   : > { %v681_v53 = vadd.f32 %v674_v48, %v665_v46  ;;  %v678_v59 = vmul.f32 0.6931472, %v931_v52 }
 0x407   : > { %v933_v56 = vpop.eup %932  ;;  %v682_v58 = vadd.f32 %v676_v51, %v666_v49 }
 0x408   : > { %v689_v61 = vsub.f32 %v685_v50, %v681_v53  ;;  %v680_v0 = vmul.f32 0.6931472, %v933_v56  ;;  %v683_v2 = vadd.f32 %v678_v59, %v667_v55 }
 0x409   : > { %v690_v1 = vsub.f32 %v686_v54, %v682_v58 }
 0x40a   : > { %v697_v5 = vmul.f32 %v693_v57, %v689_v61  ;;  %v684_v4 = vadd.f32 %v680_v0, %v668_v60  ;;  %v691_v7 = vsub.f32 %v687_v63, %v683_v2 }
 0x40b   : > { %v698_v8 = vmul.f32 %v694_v62, %v690_v1 }
 0x40c   : > { %v701_v10 = vsel %vm599_vm3, %v697_v5, 0.0  ;;  %v692_v11 = vsub.f32 %v688_v3, %v684_v4  ;;  %v699_v15 = vmul.f32 %v695_v6, %v691_v7 }
 0x40d   : > { %v702_v12 = vrot.slane %v701_v10, 4  ;;  %v708_v13 = vsel %vm599_vm3, %v698_v8, 0.0 }
 0x40e   : > { %v709_v14 = vrot.slane %v708_v13, 4  ;;  %v700_v16 = vmul.f32 %v696_v9, %v692_v11  ;;  %v715_v18 = vsel %vm599_vm3, %v699_v15, 0.0 }
 0x40f   : > { %v703_v17 = vadd.f32 %v702_v12, %v701_v10  ;;  %v716_v21 = vrot.slane %v715_v18, 4 }
 0x410   : > { %v710_v20 = vadd.f32 %v709_v14, %v708_v13  ;;  %v722_v22 = vsel %vm599_vm3, %v700_v16, 0.0 }
 0x411   : > { %v704_v23 = vrot.slane %v703_v17, 2  ;;  %v723_v19 = vrot.slane %v722_v22, 4  ;;  %v717_v25 = vadd.f32 %v716_v21, %v715_v18 }
 0x412   : > { %v711_v24 = vrot.slane %v710_v20, 2 }
 0x413   : > { %v705_v26 = vadd.f32 %v704_v23, %v703_v17  ;;  %v724_v27 = vadd.f32 %v723_v19, %v722_v22  ;;  %v718_v29 = vrot.slane %v717_v25, 2 }
 0x414   : > { %v712_v28 = vadd.f32 %v711_v24, %v710_v20 }
 0x415   : > { %v706_v30 = vrot.slane %v705_v26, 1  ;;  %v725_v31 = vrot.slane %v724_v27, 2  ;;  %v719_v33 = vadd.f32 %v718_v29, %v717_v25 }
 0x416   : > { %v713_v32 = vrot.slane %v712_v28, 1 }
 0x417   : > { %v707_v34 = vadd.f32 %v706_v30, %v705_v26  ;;  %v726_v35 = vadd.f32 %v725_v31, %v724_v27  ;;  %v720_v37 = vrot.slane %v719_v33, 1 }
 0x418   : > { %v714_v36 = vadd.f32 %v713_v32, %v712_v28 }
 0x419   : > { %730 = vst.msk [vmem:[%s1208_s6] sm:$0x1] %vm729_vm8, %v707_v34  ;;  %v727_v38 = vrot.slane %v726_v35, 1  ;;  %v721_v39 = vadd.f32 %v720_v37, %v719_v33 }
 0x41a   : > { %731 = vst.msk [vmem:[%s1208_s6 + $0x1] sm:$0x1] %vm729_vm8, %v714_v36 }
 0x41b   : > { %v728_v40 = vadd.f32 %v727_v38, %v726_v35  ;;  %732 = vst.msk [vmem:[%s1208_s6 + $0x2] sm:$0x1] %vm729_vm8, %v721_v39 }
 0x41d   : > { %733 = vst.msk [vmem:[%s1208_s6 + $0x3] sm:$0x1] %vm729_vm8, %v728_v40 }
 0x41e PF: > { %s16_s23 = sadd.s32 1, %s956_s23   ;;  %s1209_s21 = smov %s952_s22 }
 0x41f   : > { %p13_p7 = scmp.ge.s32.totalorder %s16_s23, 4   ;;  %s1210_s22 = smov %s1212_s24 }
 0x421   :  { %15 = sbr.rel (!%p13_p7) target bundleno = 2 (0x2), region = 91 }

// kernel: glm_multi_token_cloze_forward.3
= control target key start
LH: loop header
LB: loop body
LE: loop exit
PB: predicated region body
PF: predicated region fallthrough
CT: control target
= control target key end

     0   :  { %s2715_s0 = inlined_call_operand.vmem [shape: s32[4], index: 0, kind: input, shape index: {}]   ;;  %s2716_s1 = inlined_call_operand.vmem [shape: f32[4,8,32], index: 1, kind: input, shape index: {}]   ;;  %s2717_s2 = inlined_call_operand.vmem [shape: f32[1,32], index: 2, kind: input, shape index: {}]   ;;  %s2718_s3 = inlined_call_operand.vmem [shape: f32[1,32], index: 3, kind: input, shape index: {}]   ;;  %s2719_s4 = inlined_call_operand.vmem [shape: bf16[32,96], index: 4, kind: input, shape index: {}]   ;;  %s2720_s5 = inlined_call_operand.vmem [shape: f32[1,96], index: 5, kind: input, shape index: {}]   ;;  %s2721_s6 = inlined_call_operand.vmem [shape: bf16[32,32], index: 6, kind: input, shape index: {}]   ;;  %s2722_s7 = inlined_call_operand.vmem [shape: f32[1,32], index: 7, kind: input, shape index: {}]   ;;  %s2723_s8 = inlined_call_operand.vmem [shape: f32[1,32], index: 8, kind: input, shape index: {}]   ;;  %s2724_s9 = inlined_call_operand.vmem [shape: f32[1,32], index: 9, kind: input, shape index: {}]   ;;  %s2725_s10 = inlined_call_operand.vmem [shape: bf16[32,128], index: 10, kind: input, shape index: {}]   ;;  %s2726_s11 = inlined_call_operand.vmem [shape: f32[1,128], index: 11, kind: input, shape index: {}]   ;;  %s2727_s12 = inlined_call_operand.vmem [shape: bf16[128,32], index: 12, kind: input, shape index: {}]   ;;  %s2728_s13 = inlined_call_operand.vmem [shape: f32[1,32], index: 13, kind: input, shape index: {}]   ;;  %s2729_s14 = inlined_call_operand.vmem [shape: f32[4,8,32], index: 14, kind: output, shape index: {}]  }
   0x1   :  { %s19_s15 = sshll.u32 %s2715_s0, 4  ;;  %s20_s15 = int_to_ptr.vmem [resolvable:$true] %s19_s15 }
   0x2   :  { %s2210_s16 = scalar_lea.vmem %s20_s15, 16  ;;  %p2215_p1 = scmp.lt.s32.totalorder %s20_s15, %s20_s15 }
   0x3   :  { %p2211_p0 = scmp.ne.s32.totalorder %s20_s15, %s2210_s16  ;;  %p2216_p2 = scmp.lt.s32.totalorder %s2210_s16, %s2210_s16 }
   0x5   :  { %p2217_p3 = por %p2216_p2, %p2215_p1 }
   0x7   :  { %p2218_p4 = pnand %p2217_p3, %p2211_p0 }
   0x9   :  { %2221 = shalt.err (!%p2218_p4)  }
   0xa   :  { %s2224_s17 = smov [#allocation3]  }
   0xb   :  { %22 = dma.vmem_to_smem %s20_s15, 16, %s2224_s17, [#allocation2] }
   0xc   :  { %2222 = dma.done.wait [#allocation2], 16 }
   0xd   :  { %2223 = vsyncadd [#allocation2], 4294967280 }
   0xe   :  { %24 = sfence }
   0xf   :  { %v2314_v0 = vld [vmem:[%s2716_s1] sm:$0xff]  ;;  %vm56_vm0 = vcmask 261120   ;;  %v2319_v1 = vld [vmem:[%s2716_s1 + $0x10] sm:$0xff]  ;;  %v2324_v2 = vld [vmem:[%s2716_s1 + $0x8] sm:$0xff]  ;;  %v2225_v62 = vmov 0.0   ;;  %vm2226_vm1 = vmmov 0  }
  0x10   :  { %v57_v3 = vsel %vm56_vm0, %v2314_v0, 0.0  ;;  %v63_v4 = vsel %vm56_vm0, %v2319_v1, 0.0  ;;  %v55_v5 = vld [vmem:[%s2716_s1 + $0x18] sm:$0xff]  ;;  %v60_v6 = vsel %vm56_vm0, %v2324_v2, 0.0  ;;  %v2139_v28 = vld [vmem:[%s2719_s4] sm:$0xff]   ;;  %v2140_v29 = vld [vmem:[%s2719_s4 + $0x8] sm:$0xff]   ;;  %1976 = vmatprep.subr.bf16.mxu0 %v2225_v62  ;;  %1978 = vmatprep.mubr.msk.bf16.mxu0 %vm2226_vm1, %v2225_v62 }
  0x11   :  { %58 = vadd.xlane.f32.xlu0 %v57_v3  ;;  %64 = vadd.xlane.f32.xlu1 %v63_v4  ;;  %v66_v7 = vsel %vm56_vm0, %v55_v5, 0.0  ;;  %v1831_v44 = vld [vmem:[%s2717_s2] ss:$0 sm:$0xff]  ;;  %s2228_s16 = smov 80   ;;  %vm227_vm2 = vcmask 130048   ;;  %s217_s17 = sld [smem:[#allocation3]] }
  0x12   :  { %1950 = vmatprep.subr.bf16.mxu1 %v2139_v28  ;;  %v1832_v50 = vld [vmem:[%s2718_s3] ss:$0 sm:$0xff]  ;;  %vm274_vm6 = vcmask 64512   ;;  %s2230_s18 = smov 64   ;;  %s2231_s19 = smov 112   ;;  %vm292_vm7 = vcmask 1043456  }
  0x13   :  { %1951 = vmatpush3.bf16.msra.mxu1 %v2139_v28  ;;  %v1833_v63 = vld [vmem:[%s2720_s5] ss:$0 sm:$0xff]  ;;  %s2227_s5 = smov 96   ;;  %s2232_s0 = smov 48  }
  0x14   :  { %1952 = vmatprep.subr.bf16.mxu1 %v2140_v29  ;;  %s1853_s24 = sld [smem:[#allocation3 + $0x2]]  ;;  %s1860_s25 = sld [smem:[#allocation3 + $0x3]] }
  0x15   :  { %61 = vadd.xlane.f32.xlu0 %v60_v6  ;;  %67 = vadd.xlane.f32.xlu1 %v66_v7 }
  0x17   :  { %1953 = vmatpush3.bf16.msra.mxu1 %v2140_v29 }
  0x18   :  { %1958 = vmatprep.subr.bf16.mxu1 %v2225_v62 }
  0x9e   :  { %v59_v8 = vpop.xlane.xlu0 %58  ;;  %v65_v9 = vpop.xlane.xlu1 %64 }
  0x9f   :  { %v70_v10 = vmul.f32 0.03125, %v59_v8  ;;  %v72_v11 = vmul.f32 0.03125, %v65_v9 }
  0xa1   :  { %v74_v12 = vsub.f32 %v2314_v0, %v70_v10  ;;  %v76_v13 = vsub.f32 %v2319_v1, %v72_v11 }
  0xa2   :  { %v62_v14 = vpop.xlane.xlu0 %61  ;;  %v68_v15 = vpop.xlane.xlu1 %67 }
  0xa3   :  { %v71_v16 = vmul.f32 0.03125, %v62_v14  ;;  %v73_v17 = vmul.f32 0.03125, %v68_v15  ;;  %v78_v18 = vmul.f32 %v74_v12, %v74_v12  ;;  %v80_v19 = vmul.f32 %v76_v13, %v76_v13 }
  0xa4   :  { %v212_v14 = vlaneseq }
  0xa5   :  { %v75_v20 = vsub.f32 %v2324_v2, %v71_v16  ;;  %v77_v21 = vsub.f32 %v55_v5, %v73_v17  ;;  %v82_v22 = vsel %vm56_vm0, %v78_v18, 0.0  ;;  %v88_v23 = vsel %vm56_vm0, %v80_v19, 0.0 }
  0xa6   :  { %83 = vadd.xlane.f32.xlu0 %v82_v22  ;;  %v2384_v15 = vshrl.u32 %v212_v14, 7  ;;  %v2386_v16 = vand.u32 127, %v212_v14  ;;  %v219_v17 = vstv %s217_s17  ;;  %v2229_v18 = vmov -10000.0  }
  0xa7   :  { %v79_v24 = vmul.f32 %v75_v20, %v75_v20  ;;  %v81_v25 = vmul.f32 %v77_v21, %v77_v21 }
  0xa8   :  { %vm218_vm3 = vcmp.le.s32.totalorder %v2386_v16, %v2384_v15  ;;  %vm220_vm4 = vcmp.lt.s32.totalorder %v2386_v16, %v219_v17  ;;  %v2586_v15 = vld [vmem:[%s2722_s7] ss:$0 sm:$0xff] }
  0xa9   :  { %v85_v26 = vsel %vm56_vm0, %v79_v24, 0.0  ;;  %v91_v27 = vsel %vm56_vm0, %v81_v25, 0.0  ;;  %vm221_vm5 = vmor %vm218_vm3, %vm220_vm4 }
  0xaa   :  { %89 = vadd.xlane.f32.xlu0 %v88_v23  ;;  %86 = vadd.xlane.f32.xlu1 %v85_v26  ;;  %v222_v19 = vsel %vm221_vm5, 0.0, %v2229_v18 }
  0xae   :  { %92 = vadd.xlane.f32.xlu1 %v91_v27 }
 0x133   :  { %v84_v30 = vpop.xlane.xlu0 %83 }
 0x134   :  { %v94_v31 = vmul.f32 0.03125, %v84_v30 }
 0x136   :  { %v98_v32 = vadd.f32 1e-05, %v94_v31 }
 0x137   :  { %v87_v33 = vpop.xlane.xlu1 %86  ;;  %v90_v34 = vpop.xlane.xlu0 %89 }
 0x138   :  { %2153 = vrsqrt.f32 %v98_v32  ;;  %v95_v35 = vmul.f32 0.03125, %v87_v33  ;;  %v96_v36 = vmul.f32 0.03125, %v90_v34 }
 0x13a   :  { %v99_v37 = vadd.f32 1e-05, %v95_v35  ;;  %v100_v38 = vadd.f32 1e-05, %v96_v36 }
 0x13b   :  { %v93_v39 = vpop.xlane.xlu1 %92 }
 0x13c   :  { %2155 = vrsqrt.f32 %v99_v37  ;;  %v97_v40 = vmul.f32 0.03125, %v93_v39 }
 0x13d   :  { %2157 = vrsqrt.f32 %v100_v38 }
 0x13e   :  { %v101_v41 = vadd.f32 1e-05, %v97_v40 }
 0x140   :  { %2159 = vrsqrt.f32 %v101_v41 }
 0x142   :  { %v2154_v42 = vpop.eup %2153 }
 0x143   :  { %v106_v43 = vmul.f32 %v2154_v42, %v74_v12 }
 0x145   :  { %v117_v48 = vmul.f32 %v1831_v44, %v106_v43 }
 0x146   :  { %v2156_v45 = vpop.eup %2155 }
 0x147   :  { %v2158_v46 = vpop.eup %2157  ;;  %v107_v47 = vmul.f32 %v2156_v45, %v75_v20  ;;  %v128_v54 = vadd.f32 %v1832_v50, %v117_v48 }
 0x148   :  { %v108_v49 = vmul.f32 %v2158_v46, %v76_v13 }
 0x149   :  { %v118_v51 = vmul.f32 %v1831_v44, %v107_v47 }
 0x14a   :  { %v2160_v52 = vpop.eup %2159  ;;  %v119_v56 = vmul.f32 %v1831_v44, %v108_v49 }
 0x14b   :  { %v109_v53 = vmul.f32 %v2160_v52, %v77_v21  ;;  %v129_v55 = vadd.f32 %v1832_v50, %v118_v51 }
 0x14c   :  { %v130_v59 = vadd.f32 %v1832_v50, %v119_v56 }
 0x14d   :  { %v132_v57 = vpack.c.bf16 %v129_v55, %v128_v54  ;;  %v120_v58 = vmul.f32 %v1831_v44, %v109_v53 }
 0x14f   :  { %1954 = vmatprep.mubr.msk.bf16.mxu1 %vm56_vm0, %v132_v57  ;;  %v131_v60 = vadd.f32 %v1832_v50, %v120_v58  ;;  %v2430_v58 = vld [vmem:[%s2721_s6 + $0x8] sm:$0xff]  }
 0x151   :  { %v133_v61 = vpack.c.bf16 %v131_v60, %v130_v59 }
 0x153   :  { %1955 = vmatmul.mubr.msk.bf16.vlgmr.msra.gmra.mrb[0].mxu1 %vm56_vm0, %v133_v61 }
 0x154   :  { %1960 = vmatprep.mubr.msk.bf16.mxu1 %vm2226_vm1, %v2225_v62 }
 0x226   :  { %v1956_v3 = vpop.f32.mrb[0].mxu1 }
 0x227   :  { %v2366_v4 = vadd.f32 %v1956_v3, %v1833_v63  ;;  %v197_v5 = vpop.f32.mrb[1].mxu1 }
 0x228   :  { %v198_v6 = vadd.f32 %v1833_v63, %v197_v5  ;;  %v1957_v7 = vpop.f32.mrb[2].mxu1 }
 0x229   :  { %v2368_v8 = vadd.f32 %v1957_v7, %v1833_v63  ;;  %v200_v9 = vpop.f32.mrb[3].mxu1 }
 0x22a   :  { %v2370_v10 = vpack.c.bf16 %v198_v6, %v198_v6  ;;  %v2372_v11 = vadd.f32 %v1833_v63, %v200_v9  ;;  %v2437_v63 = vld [vmem:[%s2721_s6] sm:$0xff]   ;;  %s1846_s6 = sld [smem:[#allocation3 + $0x1]] }
 0x22c   :  { %225 = vrot.lane.b32.xlu0 %v2370_v10, %s2227_s5  ;;  %v2416_v50 = vpack.c.bf16 %v2372_v11, %v2372_v11 }
 0x230   :  { %341 = vrot.lane.b32.xlu0 %v2370_v10, %s2228_s16 }
 0x29e   :  { %v226_v12 = vpop.permute.xlu0 %225 }
 0x29f   :  { %v232_v13 = vsel %vm227_vm2, %v226_v12, 0 }
 0x2a0   :  { %1959 = vmatpush3.bf16.xpose.msra.mxu1 %v232_v13 }
 0x2a1   :  { %1964 = vmatprep.subr.bf16.mxu1 %v2225_v62 }
 0x2a2   :  { %v342_v36 = vpop.permute.xlu0 %341 }
 0x2a3   :  { %v347_v38 = vsel %vm227_vm2, %v342_v36, 0 }
 0x2a7   :  { %1961 = vmatmul.mubr.msk.bf16.vlgmr.msra.gmra.mrb[4].mxu1 %vm227_vm2, %v2370_v10 }
 0x2a8   :  { %1966 = vmatprep.mubr.msk.bf16.mxu1 %vm2226_vm1, %v2225_v62 }
 0x37a   :  { %v268_v20 = vpop.f32.mrb[4].mxu1 }
 0x37b   :  { %v269_v21 = vadd.f32 %v268_v20, %v222_v19  ;;  %v1962_v22 = vpop.f32.mrb[5].mxu1 }
 0x37c   :  { %v271_v23 = vpop.f32.mrb[6].mxu1 }
 0x37d   :  { %v1963_v24 = vpop.f32.mrb[7].mxu1  ;;  %v275_v25 = vsel %vm274_vm6, %v269_v21, -inf }
 0x37e   :  { %276 = vmax.xlane.f32.xlu1 %v275_v25  ;;  %v552_v24 = vstv %s1846_s6 }
 0x37f   :  { %vm553_vm8 = vcmp.lt.s32.totalorder %v2386_v16, %v552_v24 }
 0x380   :  { %vm554_vm9 = vmor %vm218_vm3, %vm553_vm8 }
 0x40b   :  { %v277_v26 = vpop.xlane.xlu1 %276 }
 0x40c   :  { %v278_v27 = vsub.f32 %v269_v21, %v277_v26 }
 0x40e   :  { %v279_v28 = vmul.f32 1.442695, %v278_v27 }
 0x410   :  { %2161 = vpow2.f32 %v279_v28 }
 0x41a   :  { %v2162_v29 = vpop.eup %2161 }
 0x41b   :  { %v281_v30 = vsel %vm274_vm6, %v2162_v29, 0.0 }
 0x41c   :  { %282 = vadd.xlane.f32.xlu1 %v281_v30  ;;  %v555_v30 = vsel %vm554_vm9, 0.0, %v2229_v18 }
 0x42d   :  { %287 = vrot.lane.b32.xlu1 %v2370_v10, %s2230_s18 }
 0x431   :  { %339 = vrot.lane.b32.xlu1 %v2370_v10, %s2231_s19 }
 0x4a9   :  { %v283_v31 = vpop.xlane.xlu1 %282 }
 0x4aa   :  { %2163 = vrcp.f32 %v283_v31 }
 0x4ad   :  { %v288_v32 = vpop.permute.xlu1 %287 }
 0x4ae   :  { %v294_v33 = vsel %vm292_vm7, %v288_v32, 0 }
 0x4af   :  { %1965 = vmatpush3.bf16.msra.mxu1 %v294_v33 }
 0x4b0   :  { %1970 = vmatprep.subr.bf16.mxu1 %v2225_v62 }
 0x4b1   :  { %v340_v39 = vpop.permute.xlu1 %339 }
 0x4b4   :  { %v2164_v34 = vpop.eup %2163 }
 0x4b5   :  { %v285_v35 = vmul.f32 %v2164_v34, %v2162_v29 }
 0x4b7   :  { %v286_v37 = vpack.c.bf16 %v285_v35, %v285_v35 }
 0x4b9   :  { %1967 = vmatmul.mubr.msk.bf16.vlgmr.msra.gmra.mrb[8].mxu1 %vm274_vm6, %v286_v37 }
 0x4ba   :  { %1971 = vmatpush3.bf16.xpose.msra.mxu1 %v347_v38  ;;  %1972 = vmatprep.mubr.msk.bf16.mxu1 %vm2226_vm1, %v2225_v62 }
 0x4bb   :  { %1982 = vmatprep.subr.bf16.mxu1 %v2225_v62 }
 0x4c1   :  { %1973 = vmatmul.mubr.msk.bf16.vlgmr.msra.gmra.mrb[12].mxu1 %vm227_vm2, %v340_v39 }
 0x4c2   :  { %1984 = vmatprep.mubr.msk.bf16.mxu1 %vm2226_vm1, %v2225_v62  ;;  %1983 = vmatpush3.bf16.msra.mxu1 %v2430_v58 }
 0x4c3   :  { %1994 = vmatprep.subr.bf16.mxu1 %v2225_v62 }
 0x58c   :  { %v330_v40 = vpop.f32.mrb[8].mxu1 }
 0x58d   :  { %v1968_v41 = vpop.f32.mrb[9].mxu1  ;;  %v336_v5 = vpack.c.bf16 %v330_v40, %v330_v40 }
 0x58e   :  { %v333_v42 = vpop.f32.mrb[10].mxu1 }
 0x58f   :  { %v1969_v43 = vpop.f32.mrb[11].mxu1 }
 0x590   :  { %v2476_v43 = vpack.c.bf16 %v2366_v4, %v2366_v4 }
 0x594   :  { %v383_v44 = vpop.f32.mrb[12].mxu1 }
 0x595   :  { %v384_v45 = vadd.f32 %v383_v44, %v222_v19  ;;  %v1974_v46 = vpop.f32.mrb[13].mxu1 }
 0x596   :  { %v386_v47 = vpop.f32.mrb[14].mxu1 }
 0x597   :  { %v1975_v48 = vpop.f32.mrb[15].mxu1  ;;  %v389_v49 = vsel %vm274_vm6, %v384_v45, -inf }
 0x598   :  { %390 = vmax.xlane.f32.xlu0 %v389_v49 }
 0x5ae   :  { %401 = vrot.lane.b32.xlu0 %v2370_v10, %s2232_s0 }
 0x5b2   :  { %669 = vrot.lane.b32.xlu0 %v2416_v50, %s2228_s16 }
 0x625   :  { %v391_v51 = vpop.xlane.xlu0 %390 }
 0x626   :  { %v392_v52 = vsub.f32 %v384_v45, %v391_v51 }
 0x628   :  { %v393_v53 = vmul.f32 1.442695, %v392_v52 }
 0x629   :  { %v402_v54 = vpop.permute.xlu0 %401 }
 0x62a   :  { %2165 = vpow2.f32 %v393_v53  ;;  %v407_v55 = vsel %vm292_vm7, %v402_v54, 0 }
 0x62b   :  { %1977 = vmatpush3.bf16.msra.mxu0 %v407_v55 }
 0x62c   :  { %1988 = vmatprep.subr.bf16.mxu0 %v2225_v62 }
 0x62d   :  { %v670_v14 = vpop.permute.xlu0 %669 }
 0x62e   :  { %v675_v21 = vsel %vm227_vm2, %v670_v14, 0 }
 0x634   :  { %v2166_v56 = vpop.eup %2165 }
 0x635   :  { %v395_v57 = vsel %vm274_vm6, %v2166_v56, 0.0 }
 0x636   :  { %396 = vadd.xlane.f32.xlu1 %v395_v57 }
 0x647   :  { %558 = vrot.lane.b32.xlu1 %v2416_v50, %s2227_s5 }
 0x64b   :  { %667 = vrot.lane.b32.xlu1 %v2416_v50, %s2231_s19 }
 0x6c3   :  { %v397_v59 = vpop.xlane.xlu1 %396 }
 0x6c4   :  { %2167 = vrcp.f32 %v397_v59 }
 0x6c7   :  { %v559_v6 = vpop.permute.xlu1 %558 }
 0x6c8   :  { %v564_v12 = vsel %vm227_vm2, %v559_v6, 0 }
 0x6cb   :  { %v668_v23 = vpop.permute.xlu1 %667 }
 0x6ce   :  { %v2168_v60 = vpop.eup %2167 }
 0x6cf   :  { %v399_v61 = vmul.f32 %v2168_v60, %v2166_v56 }
 0x6d1   :  { %v400_v3 = vpack.c.bf16 %v399_v61, %v399_v61 }
 0x6d3   :  { %1979 = vmatmul.mubr.msk.bf16.vlgmr.msra.gmra.mrb[0].mxu0 %vm274_vm6, %v400_v3 }
 0x6d4   :  { %1989 = vmatpush3.bf16.msra.mxu0 %v2437_v63  ;;  %1990 = vmatprep.mubr.msk.bf16.mxu0 %vm2226_vm1, %v2225_v62 }
 0x6d5   :  { %2000 = vmatprep.subr.bf16.mxu0 %v2225_v62 }
 0x6db   :  { %1991 = vmatmul.mubr.msk.bf16.vlgmr.msra.gmra.mrb[4].mxu0 %vm227_vm2, %v336_v5 }
 0x6dc   :  { %2002 = vmatprep.mubr.msk.bf16.mxu0 %vm2226_vm1, %v2225_v62 }
 0x7a6   :  { %v443_v7 = vpop.f32.mrb[0].mxu0 }
 0x7a7   :  { %v449_v9 = vpack.c.bf16 %v443_v7, %v443_v7  ;;  %v1980_v10 = vpop.f32.mrb[1].mxu0 }
 0x7a8   :  { %v446_v11 = vpop.f32.mrb[2].mxu0 }
 0x7a9   :  { %v1981_v13 = vpop.f32.mrb[3].mxu0  ;;  %1985 = vmatmul.mubr.msk.bf16.vlgmr.msra.gmra.mrb[16].mxu1 %vm227_vm2, %v449_v9 }
 0x7aa   :  { %1995 = vmatpush3.bf16.xpose.msra.mxu1 %v564_v12  ;;  %1996 = vmatprep.mubr.msk.bf16.mxu1 %vm2226_vm1, %v2225_v62 }
 0x7ab   :  { %2006 = vmatprep.subr.bf16.mxu1 %v2225_v62 }
 0x7ae   :  { %v544_v17 = vpop.f32.mrb[4].mxu0 }
 0x7af   :  { %v1992_v19 = vpop.f32.mrb[5].mxu0 }
 0x7b0   :  { %v547_v20 = vpop.f32.mrb[6].mxu0 }
 0x7b1   :  { %v1993_v22 = vpop.f32.mrb[7].mxu0  ;;  %1997 = vmatmul.mubr.msk.bf16.vlgmr.msra.gmra.mrb[20].mxu1 %vm227_vm2, %v2416_v50 }
 0x7b2   :  { %2007 = vmatpush3.bf16.xpose.msra.mxu1 %v675_v21  ;;  %2008 = vmatprep.mubr.msk.bf16.mxu1 %vm2226_vm1, %v2225_v62 }
 0x7b3   :  { %2018 = vmatprep.subr.bf16.mxu1 %v2225_v62 }
 0x7b9   :  { %2009 = vmatmul.mubr.msk.bf16.vlgmr.msra.gmra.mrb[24].mxu1 %vm227_vm2, %v668_v23 }
 0x7ba   :  { %2019 = vmatpush3.bf16.msra.mxu1 %v2430_v58  ;;  %2020 = vmatprep.mubr.msk.bf16.mxu1 %vm2226_vm1, %v2225_v62 }
 0x7bb   :  { %2030 = vmatprep.subr.bf16.mxu1 %v2225_v62 }
 0x87c   :  { %v495_v25 = vpop.f32.mrb[16].mxu1 }
 0x87d   :  { %v2464_v26 = vadd.f32 %v544_v17, %v495_v25  ;;  %v1986_v27 = vpop.f32.mrb[17].mxu1 }
 0x87e   :  { %v498_v28 = vpop.f32.mrb[18].mxu1 }
 0x87f   :  { %v1987_v29 = vpop.f32.mrb[19].mxu1 }
 0x884   :  { %v600_v31 = vpop.f32.mrb[20].mxu1 }
 0x885   :  { %v601_v32 = vadd.f32 %v600_v31, %v555_v30  ;;  %v1998_v33 = vpop.f32.mrb[21].mxu1 }
 0x886   :  { %v603_v34 = vpop.f32.mrb[22].mxu1 }
 0x887   :  { %v1999_v35 = vpop.f32.mrb[23].mxu1  ;;  %v606_v36 = vsel %vm274_vm6, %v601_v32, -inf }
 0x888   :  { %607 = vmax.xlane.f32.xlu0 %v606_v36 }
 0x88c   :  { %v711_v37 = vpop.f32.mrb[24].mxu1 }
 0x88d   :  { %v712_v38 = vadd.f32 %v711_v37, %v555_v30  ;;  %v2010_v39 = vpop.f32.mrb[25].mxu1 }
 0x88e   :  { %v714_v40 = vpop.f32.mrb[26].mxu1 }
 0x88f   :  { %v2011_v41 = vpop.f32.mrb[27].mxu1  ;;  %v717_v42 = vsel %vm274_vm6, %v712_v38, -inf }
 0x890   :  { %718 = vmax.xlane.f32.xlu1 %v717_v42 }
 0x8a1   :  { %729 = vrot.lane.b32.xlu1 %v2416_v50, %s2232_s0 }
 0x8a5   :  { %872 = vrot.lane.b32.xlu1 %v2476_v43, %s2227_s5 }
 0x8a9   :  { %983 = vrot.lane.b32.xlu1 %v2476_v43, %s2228_s16 }
 0x915   :  { %v608_v44 = vpop.xlane.xlu0 %607 }
 0x916   :  { %v609_v45 = vsub.f32 %v601_v32, %v608_v44  ;;  %v866_v32 = vstv %s1853_s24 }
 0x917   :  { %vm867_vm10 = vcmp.lt.s32.totalorder %v2386_v16, %v866_v32 }
 0x918   :  { %v610_v46 = vmul.f32 1.442695, %v609_v45  ;;  %vm868_vm11 = vmor %vm218_vm3, %vm867_vm10 }
 0x91a   :  { %2169 = vpow2.f32 %v610_v46 }
 0x91d   :  { %v719_v47 = vpop.xlane.xlu1 %718 }
 0x91e   :  { %v720_v48 = vsub.f32 %v712_v38, %v719_v47  ;;  %v869_v38 = vsel %vm868_vm11, 0.0, %v2229_v18 }
 0x920   :  { %v721_v49 = vmul.f32 1.442695, %v720_v48 }
 0x921   :  { %v730_v61 = vpop.permute.xlu1 %729 }
 0x922   :  { %2171 = vpow2.f32 %v721_v49  ;;  %v735_v5 = vsel %vm292_vm7, %v730_v61, 0 }
 0x924   :  { %v2170_v51 = vpop.eup %2169 }
 0x925   :  { %v612_v52 = vsel %vm274_vm6, %v2170_v51, 0.0  ;;  %v873_v14 = vpop.permute.xlu1 %872 }
 0x926   :  { %613 = vadd.xlane.f32.xlu0 %v612_v52  ;;  %v878_v22 = vsel %vm227_vm2, %v873_v14, 0 }
 0x929   :  { %v984_v24 = vpop.permute.xlu1 %983 }
 0x92a   :  { %v989_v25 = vsel %vm227_vm2, %v984_v24, 0 }
 0x92c   :  { %v2172_v4 = vpop.eup %2171 }
 0x92d   :  { %v723_v53 = vsel %vm274_vm6, %v2172_v4, 0.0 }
 0x92e   :  { %724 = vadd.xlane.f32.xlu0 %v723_v53 }
 0x944   :  { %618 = vrot.lane.b32.xlu0 %v2416_v50, %s2230_s18 }
 0x948   :  { %981 = vrot.lane.b32.xlu0 %v2476_v43, %s2231_s19 }
 0x9b3   :  { %v614_v54 = vpop.xlane.xlu0 %613 }
 0x9b4   :  { %2173 = vrcp.f32 %v614_v54 }
 0x9bb   :  { %v725_v55 = vpop.xlane.xlu0 %724 }
 0x9bc   :  { %2175 = vrcp.f32 %v725_v55 }
 0x9be   :  { %v2174_v56 = vpop.eup %2173 }
 0x9bf   :  { %v616_v57 = vmul.f32 %v2174_v56, %v2170_v51  ;;  %v619_v59 = vpop.permute.xlu0 %618 }
 0x9c0   :  { %v624_v60 = vsel %vm292_vm7, %v619_v59, 0 }
 0x9c1   :  { %2001 = vmatpush3.bf16.msra.mxu0 %v624_v60  ;;  %v617_v3 = vpack.c.bf16 %v616_v57, %v616_v57 }
 0x9c2   :  { %2012 = vmatprep.subr.bf16.mxu0 %v2225_v62 }
 0x9c3   :  { %v982_v27 = vpop.permute.xlu0 %981 }
 0x9c4   :  { %2003 = vmatmul.mubr.msk.bf16.vlgmr.msra.gmra.mrb[8].mxu0 %vm274_vm6, %v617_v3 }
 0x9c5   :  { %2013 = vmatpush3.bf16.msra.mxu0 %v735_v5  ;;  %2014 = vmatprep.mubr.msk.bf16.mxu0 %vm2226_vm1, %v2225_v62 }
 0x9c6   :  { %v2176_v50 = vpop.eup %2175  ;;  %2024 = vmatprep.subr.bf16.mxu0 %v2225_v62 }
 0x9c7   :  { %v727_v6 = vmul.f32 %v2176_v50, %v2172_v4  ;;  %v2532_v4 = vpack.c.bf16 %v2368_v8, %v2368_v8 }
 0x9c9   :  { %v728_v7 = vpack.c.bf16 %v727_v6, %v727_v6 }
 0x9cc   :  { %2015 = vmatmul.mubr.msk.bf16.vlgmr.msra.gmra.mrb[12].mxu0 %vm274_vm6, %v728_v7 }
 0x9cd   :  { %2025 = vmatpush3.bf16.msra.mxu0 %v2437_v63  ;;  %2026 = vmatprep.mubr.msk.bf16.mxu0 %vm2226_vm1, %v2225_v62 }
 0x9ce   :  { %2036 = vmatprep.subr.bf16.mxu0 %v2225_v62 }
 0xa97   :  { %v660_v9 = vpop.f32.mrb[8].mxu0 }
 0xa98   :  { %v666_v10 = vpack.c.bf16 %v660_v9, %v660_v9  ;;  %v2004_v11 = vpop.f32.mrb[9].mxu0 }
 0xa99   :  { %v663_v12 = vpop.f32.mrb[10].mxu0 }
 0xa9a   :  { %v2005_v13 = vpop.f32.mrb[11].mxu0  ;;  %2027 = vmatmul.mubr.msk.bf16.vlgmr.msra.gmra.mrb[16].mxu0 %vm227_vm2, %v666_v10 }
 0xa9b   :  { %2038 = vmatprep.mubr.msk.bf16.mxu0 %vm2226_vm1, %v2225_v62 }
 0xa9f   :  { %v771_v17 = vpop.f32.mrb[12].mxu0 }
 0xaa0   :  { %v777_v19 = vpack.c.bf16 %v771_v17, %v771_v17  ;;  %v2016_v20 = vpop.f32.mrb[13].mxu0 }
 0xaa1   :  { %v774_v21 = vpop.f32.mrb[14].mxu0 }
 0xaa2   :  { %v2017_v23 = vpop.f32.mrb[15].mxu0  ;;  %2021 = vmatmul.mubr.msk.bf16.vlgmr.msra.gmra.mrb[28].mxu1 %vm227_vm2, %v777_v19 }
 0xaa3   :  { %2031 = vmatpush3.bf16.xpose.msra.mxu1 %v878_v22  ;;  %2032 = vmatprep.mubr.msk.bf16.mxu1 %vm2226_vm1, %v2225_v62 }
 0xaa4   :  { %2042 = vmatprep.subr.bf16.mxu1 %v2225_v62 }
 0xaaa   :  { %2033 = vmatmul.mubr.msk.bf16.vlgmr.msra.gmra.mrb[32].mxu1 %vm227_vm2, %v2476_v43 }
 0xaab   :  { %2043 = vmatpush3.bf16.xpose.msra.mxu1 %v989_v25  ;;  %2044 = vmatprep.mubr.msk.bf16.mxu1 %vm2226_vm1, %v2225_v62 }
 0xaac   :  { %2054 = vmatprep.subr.bf16.mxu1 %v2225_v62 }
 0xab2   :  { %2045 = vmatmul.mubr.msk.bf16.vlgmr.msra.gmra.mrb[36].mxu1 %vm227_vm2, %v982_v27 }
 0xab3   :  { %2055 = vmatpush3.bf16.msra.mxu1 %v2430_v58  ;;  %2056 = vmatprep.mubr.msk.bf16.mxu1 %vm2226_vm1, %v2225_v62 }
 0xab4   :  { %2066 = vmatprep.subr.bf16.mxu1 %v2225_v62 }
 0xb6d   :  { %v858_v28 = vpop.f32.mrb[16].mxu0 }
 0xb6e   :  { %v2028_v29 = vpop.f32.mrb[17].mxu0 }
 0xb6f   :  { %v861_v30 = vpop.f32.mrb[18].mxu0 }
 0xb70   :  { %v2029_v31 = vpop.f32.mrb[19].mxu0 }
 0xb75   :  { %v815_v33 = vpop.f32.mrb[28].mxu1 }
 0xb76   :  { %v2520_v34 = vadd.f32 %v858_v28, %v815_v33  ;;  %v2022_v35 = vpop.f32.mrb[29].mxu1 }
 0xb77   :  { %v818_v36 = vpop.f32.mrb[30].mxu1 }
 0xb78   :  { %v2023_v37 = vpop.f32.mrb[31].mxu1 }
 0xb7d   :  { %v914_v39 = vpop.f32.mrb[32].mxu1 }
 0xb7e   :  { %v915_v40 = vadd.f32 %v914_v39, %v869_v38  ;;  %v2034_v41 = vpop.f32.mrb[33].mxu1 }
 0xb7f   :  { %v917_v42 = vpop.f32.mrb[34].mxu1 }
 0xb80   :  { %v2035_v44 = vpop.f32.mrb[35].mxu1  ;;  %v920_v45 = vsel %vm274_vm6, %v915_v40, -inf }
 0xb81   :  { %921 = vmax.xlane.f32.xlu1 %v920_v45 }
 0xb85   :  { %v1025_v46 = vpop.f32.mrb[36].mxu1 }
 0xb86   :  { %v1026_v47 = vadd.f32 %v1025_v46, %v869_v38  ;;  %v2046_v48 = vpop.f32.mrb[37].mxu1 }
 0xb87   :  { %v1028_v49 = vpop.f32.mrb[38].mxu1 }
 0xb88   :  { %v2047_v51 = vpop.f32.mrb[39].mxu1  ;;  %v1031_v52 = vsel %vm274_vm6, %v1026_v47, -inf }
 0xb89   :  { %1032 = vmax.xlane.f32.xlu0 %v1031_v52 }
 0xb92   :  { %932 = vrot.lane.b32.xlu1 %v2476_v43, %s2230_s18 }
 0xb96   :  { %1186 = vrot.lane.b32.xlu1 %v2532_v4, %s2227_s5 }
 0xb9a   :  { %1297 = vrot.lane.b32.xlu1 %v2532_v4, %s2228_s16 }
 0xb9e   :  { %1295 = vrot.lane.b32.xlu1 %v2532_v4, %s2231_s19 }
 0xc0e   :  { %v922_v53 = vpop.xlane.xlu1 %921 }
 0xc0f   :  { %v923_v54 = vsub.f32 %v915_v40, %v922_v53  ;;  %v1180_v40 = vstv %s1860_s25 }
 0xc10   :  { %vm1181_vm12 = vcmp.lt.s32.totalorder %v2386_v16, %v1180_v40  ;;  %v1499_v16 = vadd.f32 %v2586_v15, %v2464_v26 }
 0xc11   :  { %v924_v55 = vmul.f32 1.442695, %v923_v54  ;;  %vm1182_vm13 = vmor %vm218_vm3, %vm1181_vm12 }
 0xc12   :  { %v933_v56 = vpop.permute.xlu1 %932 }
 0xc13   :  { %2177 = vpow2.f32 %v924_v55  ;;  %v938_v57 = vsel %vm292_vm7, %v933_v56, 0 }
 0xc14   :  { %2037 = vmatpush3.bf16.msra.mxu0 %v938_v57 }
 0xc15   :  { %2048 = vmatprep.subr.bf16.mxu0 %v2225_v62 }
 0xc16   :  { %v1033_v8 = vpop.xlane.xlu0 %1032  ;;  %v1187_v24 = vpop.permute.xlu1 %1186 }
 0xc17   :  { %v1034_v59 = vsub.f32 %v1026_v47, %v1033_v8  ;;  %v1192_v30 = vsel %vm227_vm2, %v1187_v24, 0 }
 0xc19   :  { %v1035_v60 = vmul.f32 1.442695, %v1034_v59 }
 0xc1a   :  { %v1298_v32 = vpop.permute.xlu1 %1297 }
 0xc1b   :  { %2179 = vpow2.f32 %v1035_v60  ;;  %v1303_v33 = vsel %vm227_vm2, %v1298_v32, 0 }
 0xc1d   :  { %v2178_v61 = vpop.eup %2177 }
 0xc1e   :  { %v926_v3 = vsel %vm274_vm6, %v2178_v61, 0.0  ;;  %v1296_v35 = vpop.permute.xlu1 %1295 }
 0xc1f   :  { %927 = vadd.xlane.f32.xlu0 %v926_v3 }
 0xc25   :  { %v2180_v5 = vpop.eup %2179 }
 0xc26   :  { %v1037_v50 = vsel %vm274_vm6, %v2180_v5, 0.0 }
 0xc27   :  { %1038 = vadd.xlane.f32.xlu0 %v1037_v50 }
 0xc3d   :  { %1043 = vrot.lane.b32.xlu0 %v2476_v43, %s2232_s0 }
 0xcac   :  { %v928_v6 = vpop.xlane.xlu0 %927 }
 0xcad   :  { %2181 = vrcp.f32 %v928_v6 }
 0xcb4   :  { %v1039_v7 = vpop.xlane.xlu0 %1038 }
 0xcb5   :  { %2183 = vrcp.f32 %v1039_v7 }
 0xcb7   :  { %v2182_v9 = vpop.eup %2181 }
 0xcb8   :  { %v930_v10 = vmul.f32 %v2182_v9, %v2178_v61  ;;  %v1044_v11 = vpop.permute.xlu0 %1043 }
 0xcb9   :  { %v1049_v13 = vsel %vm292_vm7, %v1044_v11, 0 }
 0xcba   :  { %v931_v12 = vpack.c.bf16 %v930_v10, %v930_v10 }
 0xcbc   :  { %2039 = vmatmul.mubr.msk.bf16.vlgmr.msra.gmra.mrb[20].mxu0 %vm274_vm6, %v931_v12  ;;  %v1500_v12 = vadd.f32 %v2586_v15, %v2520_v34 }
 0xcbd   :  { %2049 = vmatpush3.bf16.msra.mxu0 %v1049_v13  ;;  %2050 = vmatprep.mubr.msk.bf16.mxu0 %vm2226_vm1, %v2225_v62 }
 0xcbe   :  { %2060 = vmatprep.subr.bf16.mxu0 %v2225_v62 }
 0xcbf   :  { %v2184_v14 = vpop.eup %2183 }
 0xcc0   :  { %v1041_v43 = vmul.f32 %v2184_v14, %v2180_v5  ;;  %v2602_v14 = vadd.f32 %v1500_v12, %v2324_v2 }
 0xcc2   :  { %v1042_v17 = vpack.c.bf16 %v1041_v43, %v1041_v43 }
 0xcc4   :  { %2051 = vmatmul.mubr.msk.bf16.vlgmr.msra.gmra.mrb[24].mxu0 %vm274_vm6, %v1042_v17 }
 0xcc5   :  { %2061 = vmatpush3.bf16.msra.mxu0 %v2437_v63  ;;  %2062 = vmatprep.mubr.msk.bf16.mxu0 %vm2226_vm1, %v2225_v62 }
 0xcc6   :  { %2072 = vmatprep.subr.bf16.mxu0 %v2225_v62 }
 0xd8f   :  { %v974_v19 = vpop.f32.mrb[20].mxu0 }
 0xd90   :  { %v980_v20 = vpack.c.bf16 %v974_v19, %v974_v19  ;;  %v2040_v21 = vpop.f32.mrb[21].mxu0 }
 0xd91   :  { %v977_v22 = vpop.f32.mrb[22].mxu0 }
 0xd92   :  { %v2041_v23 = vpop.f32.mrb[23].mxu0  ;;  %2063 = vmatmul.mubr.msk.bf16.vlgmr.msra.gmra.mrb[28].mxu0 %vm227_vm2, %v980_v20 }
 0xd93   :  { %2074 = vmatprep.mubr.msk.bf16.mxu0 %vm2226_vm1, %v2225_v62 }
 0xd97   :  { %v1085_v25 = vpop.f32.mrb[24].mxu0 }
 0xd98   :  { %v1091_v27 = vpack.c.bf16 %v1085_v25, %v1085_v25  ;;  %v2052_v28 = vpop.f32.mrb[25].mxu0 }
 0xd99   :  { %v1088_v29 = vpop.f32.mrb[26].mxu0 }
 0xd9a   :  { %v2053_v31 = vpop.f32.mrb[27].mxu0  ;;  %2057 = vmatmul.mubr.msk.bf16.vlgmr.msra.gmra.mrb[40].mxu1 %vm227_vm2, %v1091_v27 }
 0xd9b   :  { %2067 = vmatpush3.bf16.xpose.msra.mxu1 %v1192_v30  ;;  %2068 = vmatprep.mubr.msk.bf16.mxu1 %vm2226_vm1, %v2225_v62 }
 0xd9c   :  { %2078 = vmatprep.subr.bf16.mxu1 %v2225_v62 }
 0xda2   :  { %2069 = vmatmul.mubr.msk.bf16.vlgmr.msra.gmra.mrb[44].mxu1 %vm227_vm2, %v2532_v4 }
 0xda3   :  { %2079 = vmatpush3.bf16.xpose.msra.mxu1 %v1303_v33  ;;  %2080 = vmatprep.mubr.msk.bf16.mxu1 %vm2226_vm1, %v2225_v62 }
 0xda4   :  { %2090 = vmatprep.subr.bf16.mxu1 %v2225_v62 }
 0xdaa   :  { %2081 = vmatmul.mubr.msk.bf16.vlgmr.msra.gmra.mrb[48].mxu1 %vm227_vm2, %v1296_v35 }
 0xdab   :  { %2091 = vmatpush3.bf16.msra.mxu1 %v2430_v58  ;;  %2092 = vmatprep.mubr.msk.bf16.mxu1 %vm2226_vm1, %v2225_v62  ;;  %v1183_v58 = vsel %vm1182_vm13, 0.0, %v2229_v18  ;;  %v2591_v18 = vadd.f32 %v1499_v16, %v2314_v0 }
 0xdad   :  { %v1507_v60 = vsel %vm56_vm0, %v2591_v18, 0.0 }
 0xe65   :  { %v1172_v36 = vpop.f32.mrb[28].mxu0 }
 0xe66   :  { %v2064_v37 = vpop.f32.mrb[29].mxu0 }
 0xe67   :  { %v1175_v38 = vpop.f32.mrb[30].mxu0 }
 0xe68   :  { %v2065_v39 = vpop.f32.mrb[31].mxu0 }
 0xe6d   :  { %v1129_v41 = vpop.f32.mrb[40].mxu1 }
 0xe6e   :  { %v1173_v42 = vadd.f32 %v1172_v36, %v1129_v41  ;;  %v2058_v44 = vpop.f32.mrb[41].mxu1 }
 0xe6f   :  { %v1132_v45 = vpop.f32.mrb[42].mxu1 }
 0xe70   :  { %v2059_v46 = vpop.f32.mrb[43].mxu1  ;;  %v1501_v43 = vadd.f32 %v2586_v15, %v1173_v42 }
 0xe72   :  { %v2606_v19 = vadd.f32 %v1501_v43, %v2319_v1 }
 0xe74   :  { %v1513_v34 = vsel %vm56_vm0, %v2606_v19, 0.0 }
 0xe75   :  { %v1228_v47 = vpop.f32.mrb[44].mxu1 }
 0xe76   :  { %v1229_v48 = vadd.f32 %v1228_v47, %v1183_v58  ;;  %v2070_v49 = vpop.f32.mrb[45].mxu1 }
 0xe77   :  { %v1231_v51 = vpop.f32.mrb[46].mxu1 }
 0xe78   :  { %v2071_v52 = vpop.f32.mrb[47].mxu1  ;;  %v1234_v53 = vsel %vm274_vm6, %v1229_v48, -inf }
 0xe79   :  { %1235 = vmax.xlane.f32.xlu0 %v1234_v53 }
 0xe7d   :  { %v1339_v54 = vpop.f32.mrb[48].mxu1 }
 0xe7e   :  { %v1340_v55 = vadd.f32 %v1339_v54, %v1183_v58  ;;  %v2082_v56 = vpop.f32.mrb[49].mxu1 }
 0xe7f   :  { %v1342_v57 = vpop.f32.mrb[50].mxu1 }
 0xe80   :  { %v2083_v8 = vpop.f32.mrb[51].mxu1  ;;  %v1345_v59 = vsel %vm274_vm6, %v1340_v55, -inf }
 0xe81   :  { %1346 = vmax.xlane.f32.xlu1 %v1345_v59 }
 0xe92   :  { %1357 = vrot.lane.b32.xlu1 %v2532_v4, %s2232_s0 }
 0xeb6   :  { %1508 = vadd.xlane.f32.xlu1 %v1507_v60  ;;  %v2209_v60 = vld [vmem:[%s2716_s1 + $0x18] sm:$0xff] }
 0xf06   :  { %v1236_v61 = vpop.xlane.xlu0 %1235 }
 0xf07   :  { %v1237_v3 = vsub.f32 %v1229_v48, %v1236_v61 }
 0xf09   :  { %v1238_v5 = vmul.f32 1.442695, %v1237_v3 }
 0xf0b   :  { %2185 = vpow2.f32 %v1238_v5 }
 0xf0e   :  { %v1347_v50 = vpop.xlane.xlu1 %1346 }
 0xf0f   :  { %v1348_v6 = vsub.f32 %v1340_v55, %v1347_v50 }
 0xf11   :  { %v1349_v7 = vmul.f32 1.442695, %v1348_v6 }
 0xf12   :  { %v1358_v11 = vpop.permute.xlu1 %1357 }
 0xf13   :  { %2187 = vpow2.f32 %v1349_v7  ;;  %v1363_v29 = vsel %vm292_vm7, %v1358_v11, 0 }
 0xf15   :  { %v2186_v9 = vpop.eup %2185 }
 0xf16   :  { %v1240_v10 = vsel %vm274_vm6, %v2186_v9, 0.0 }
 0xf17   :  { %1241 = vadd.xlane.f32.xlu0 %v1240_v10 }
 0xf1d   :  { %v2188_v26 = vpop.eup %2187 }
 0xf1e   :  { %v1351_v0 = vsel %vm274_vm6, %v2188_v26, 0.0 }
 0xf1f   :  { %1352 = vadd.xlane.f32.xlu0 %v1351_v0 }
 0xf35   :  { %1246 = vrot.lane.b32.xlu0 %v2532_v4, %s2230_s18  ;;  %v1510_v4 = vsel %vm56_vm0, %v2602_v14, 0.0 }
 0xf43   :  { %v1509_v13 = vpop.xlane.xlu1 %1508 }
 0xf44   :  { %v1519_v17 = vmul.f32 0.03125, %v1509_v13 }
 0xf46   :  { %v2609_v20 = vsub.f32 %v2591_v18, %v1519_v17 }
 0xf48   :  { %v1527_v2 = vmul.f32 %v2609_v20, %v2609_v20 }
 0xf4a   :  { %v1531_v21 = vsel %vm56_vm0, %v1527_v2, 0.0 }
 0xf54   :  { %1511 = vadd.xlane.f32.xlu0 %v1510_v4 }
 0xf58   :  { %1514 = vadd.xlane.f32.xlu0 %v1513_v34  ;;  %v1868_v34 = vld [vmem:[%s2723_s8] ss:$0 sm:$0xff] }
 0xf5c   :  { %1532 = vadd.xlane.f32.xlu0 %v1531_v21 }
 0xfa4   :  { %v1242_v22 = vpop.xlane.xlu0 %1241 }
 0xfa5   :  { %2189 = vrcp.f32 %v1242_v22 }
 0xfac   :  { %v1353_v1 = vpop.xlane.xlu0 %1352 }
 0xfad   :  { %2191 = vrcp.f32 %v1353_v1  ;;  %v1869_v1 = vld [vmem:[%s2724_s9] ss:$0 sm:$0xff] }
 0xfaf   :  { %v2190_v23 = vpop.eup %2189 }
 0xfb0   :  { %v1244_v24 = vmul.f32 %v2190_v23, %v2186_v9  ;;  %v1247_v25 = vpop.permute.xlu0 %1246 }
 0xfb1   :  { %v1252_v27 = vsel %vm292_vm7, %v1247_v25, 0 }
 0xfb2   :  { %2073 = vmatpush3.bf16.msra.mxu0 %v1252_v27  ;;  %v1245_v28 = vpack.c.bf16 %v1244_v24, %v1244_v24 }
 0xfb3   :  { %2084 = vmatprep.subr.bf16.mxu0 %v2225_v62 }
 0xfb5   :  { %2075 = vmatmul.mubr.msk.bf16.vlgmr.msra.gmra.mrb[32].mxu0 %vm274_vm6, %v1245_v28  ;;  %v2144_v28 = vld [vmem:[%s2725_s10 + $0x8] sm:$0xff]  }
 0xfb6   :  { %2085 = vmatpush3.bf16.msra.mxu0 %v1363_v29  ;;  %2086 = vmatprep.mubr.msk.bf16.mxu0 %vm2226_vm1, %v2225_v62 }
 0xfb7   :  { %v2192_v30 = vpop.eup %2191  ;;  %2096 = vmatprep.subr.bf16.mxu0 %v2225_v62 }
 0xfb8   :  { %v1355_v31 = vmul.f32 %v2192_v30, %v2188_v26 }
 0xfba   :  { %v1356_v32 = vpack.c.bf16 %v1355_v31, %v1355_v31 }
 0xfbd   :  { %2087 = vmatmul.mubr.msk.bf16.vlgmr.msra.gmra.mrb[36].mxu0 %vm274_vm6, %v1356_v32 }
 0xfbe   :  { %2097 = vmatpush3.bf16.msra.mxu0 %v2437_v63  ;;  %2098 = vmatprep.mubr.msk.bf16.mxu0 %vm2226_vm1, %v2225_v62 }
 0xfe1   :  { %v1512_v33 = vpop.xlane.xlu0 %1511 }
 0xfe2   :  { %v1520_v53 = vmul.f32 0.03125, %v1512_v33 }
 0xfe4   :  { %v1524_v8 = vsub.f32 %v2602_v14, %v1520_v53 }
 0xfe5   :  { %v1515_v35 = vpop.xlane.xlu0 %1514 }
 0xfe6   :  { %v1521_v36 = vmul.f32 0.03125, %v1515_v35  ;;  %v1528_v5 = vmul.f32 %v1524_v8, %v1524_v8 }
 0xfe8   :  { %v2630_v37 = vsub.f32 %v2606_v19, %v1521_v36  ;;  %v1534_v50 = vsel %vm56_vm0, %v1528_v5, 0.0 }
 0xfe9   :  { %v1533_v6 = vpop.xlane.xlu0 %1532 }
 0xfea   :  { %v1529_v38 = vmul.f32 %v2630_v37, %v2630_v37  ;;  %v1543_v7 = vmul.f32 0.03125, %v1533_v6 }
 0xfec   :  { %v1537_v39 = vsel %vm56_vm0, %v1529_v38, 0.0  ;;  %v1547_v9 = vadd.f32 1e-05, %v1543_v7 }
 0xfed   :  { %1538 = vadd.xlane.f32.xlu0 %v1537_v39 }
 0xfee   :  { %2193 = vrsqrt.f32 %v1547_v9 }
 0xff8   :  { %v2194_v17 = vpop.eup %2193 }
 0xff9   :  { %v1555_v4 = vmul.f32 %v2194_v17, %v2609_v20  ;;  %v2143_v20 = vld [vmem:[%s2725_s10] sm:$0xff]  }
 0xffa   :  { %2102 = vmatprep.subr.bf16.mxu1 %v2143_v20 }
 0xffb   :  { %v1566_v22 = vmul.f32 %v1868_v34, %v1555_v4 }
 0xffd   :  { %v1577_v24 = vadd.f32 %v1869_v1, %v1566_v22 }
0x107a   :  { %v1539_v29 = vpop.xlane.xlu0 %1538 }
0x107b   :  { %v1545_v30 = vmul.f32 0.03125, %v1539_v29 }
0x107d   :  { %v1549_v31 = vadd.f32 1e-05, %v1545_v30 }
0x1088   :  { %v1288_v40 = vpop.f32.mrb[32].mxu0 }
0x1089   :  { %v1294_v41 = vpack.c.bf16 %v1288_v40, %v1288_v40  ;;  %v2076_v42 = vpop.f32.mrb[33].mxu0 }
0x108a   :  { %v1291_v44 = vpop.f32.mrb[34].mxu0 }
0x108b   :  { %v2077_v63 = vpop.f32.mrb[35].mxu0  ;;  %2099 = vmatmul.mubr.msk.bf16.vlgmr.msra.gmra.mrb[40].mxu0 %vm227_vm2, %v1294_v41 }
0x1090   :  { %v1399_v62 = vpop.f32.mrb[36].mxu0 }
0x1091   :  { %v1405_v45 = vpack.c.bf16 %v1399_v62, %v1399_v62  ;;  %v2088_v46 = vpop.f32.mrb[37].mxu0 }
0x1092   :  { %v1402_v58 = vpop.f32.mrb[38].mxu0  ;;  %v2146_v46 = vld [vmem:[%s2727_s12 + $0x8] sm:$0xff]  }
0x1093   :  { %v2089_v47 = vpop.f32.mrb[39].mxu0  ;;  %2093 = vmatmul.mubr.msk.bf16.vlgmr.msra.gmra.mrb[52].mxu1 %vm227_vm2, %v1405_v45  ;;  %v2145_v45 = vld [vmem:[%s2727_s12] sm:$0xff]   ;;  %v2148_v58 = vld [vmem:[%s2727_s12 + $0x18] sm:$0xff]  }
0x1094   :  { %2103 = vmatpush3.bf16.msra.mxu1 %v2143_v20  ;;  %2110 = vmatprep.subr.bf16.mxu0 %v2145_v45  ;;  %v2149_v47 = vld [vmem:[%s2727_s12 + $0x20] sm:$0xff]  }
0x1095   :  { %2104 = vmatprep.subr.bf16.mxu1 %v2144_v28  ;;  %2111 = vmatpush3.bf16.msra.mxu0 %v2145_v45 }
0x1096   :  { %2112 = vmatprep.subr.bf16.mxu0 %v2146_v46 }
0x1098   :  { %2105 = vmatpush3.bf16.msra.mxu1 %v2144_v28 }
0x1099   :  { %2113 = vmatpush3.bf16.msra.mxu0 %v2146_v46 }
0x115e   :  { %v1486_v48 = vpop.f32.mrb[40].mxu0 }
0x115f   :  { %v2100_v49 = vpop.f32.mrb[41].mxu0 }
0x1160   :  { %v1489_v51 = vpop.f32.mrb[42].mxu0  ;;  %v2151_v49 = vld [vmem:[%s2727_s12 + $0x30] sm:$0xff]  }
0x1161   :  { %v2101_v52 = vpop.f32.mrb[43].mxu0  ;;  %v2152_v51 = vld [vmem:[%s2727_s12 + $0x38] sm:$0xff]  }
0x1162   :  { %v1870_v52 = vld [vmem:[%s2726_s11] ss:$0 sm:$0xff] }
0x1166   :  { %v1443_v54 = vpop.f32.mrb[52].mxu1 }
0x1167   :  { %v1487_v55 = vadd.f32 %v1486_v48, %v1443_v54  ;;  %v2094_v56 = vpop.f32.mrb[53].mxu1  ;;  %v2150_v48 = vld [vmem:[%s2727_s12 + $0x28] sm:$0xff]  }
0x1168   :  { %v1446_v57 = vpop.f32.mrb[54].mxu1 }
0x1169   :  { %v1502_v59 = vadd.f32 %v2586_v15, %v1487_v55  ;;  %v2095_v16 = vpop.f32.mrb[55].mxu1 }
0x116b   :  { %v2642_v61 = vadd.f32 %v2209_v60, %v1502_v59 }
0x116d   :  { %v1516_v3 = vsel %vm56_vm0, %v2642_v61, 0.0 }
0x116e   :  { %1517 = vadd.xlane.f32.xlu1 %v1516_v3 }
0x1172   :  { %1535 = vadd.xlane.f32.xlu1 %v1534_v50 }
0x11fb   :  { %v1518_v10 = vpop.xlane.xlu1 %1517 }
0x11fc   :  { %v1522_v15 = vmul.f32 0.03125, %v1518_v10 }
0x11fe   :  { %v1526_v26 = vsub.f32 %v2642_v61, %v1522_v15 }
0x11ff   :  { %v1536_v0 = vpop.xlane.xlu1 %1535 }
0x1200   :  { %v1544_v11 = vmul.f32 0.03125, %v1536_v0  ;;  %v1530_v12 = vmul.f32 %v1526_v26, %v1526_v26 }
0x1202   :  { %v1548_v13 = vadd.f32 1e-05, %v1544_v11  ;;  %v1540_v43 = vsel %vm56_vm0, %v1530_v12, 0.0 }
0x1203   :  { %1541 = vadd.xlane.f32.xlu1 %v1540_v43 }
0x1204   :  { %2195 = vrsqrt.f32 %v1548_v13 }
0x1205   :  { %2197 = vrsqrt.f32 %v1549_v31 }
0x120e   :  { %v2196_v2 = vpop.eup %2195 }
0x120f   :  { %v1556_v21 = vmul.f32 %v2196_v2, %v1524_v8  ;;  %v2198_v36 = vpop.eup %2197 }
0x1210   :  { %v1557_v38 = vmul.f32 %v2198_v36, %v2630_v37  ;;  %v2147_v37 = vld [vmem:[%s2727_s12 + $0x10] sm:$0xff]  }
0x1211   :  { %v1567_v23 = vmul.f32 %v1868_v34, %v1556_v21  ;;  %2114 = vmatprep.subr.bf16.mxu0 %v2147_v37 }
0x1212   :  { %v1568_v40 = vmul.f32 %v1868_v34, %v1557_v38  ;;  %2115 = vmatpush3.bf16.msra.mxu0 %v2147_v37 }
0x1213   :  { %v1578_v25 = vadd.f32 %v1869_v1, %v1567_v23  ;;  %2116 = vmatprep.subr.bf16.mxu0 %v2148_v58 }
0x1214   :  { %v1579_v44 = vadd.f32 %v1869_v1, %v1568_v40 }
0x1215   :  { %v1581_v27 = vpack.c.bf16 %v1578_v25, %v1577_v24 }
0x1216   :  { %2117 = vmatpush3.bf16.msra.mxu0 %v2148_v58 }
0x1217   :  { %2106 = vmatprep.mubr.msk.bf16.mxu1 %vm56_vm0, %v1581_v27  ;;  %2118 = vmatprep.subr.bf16.mxu0 %v2149_v47 }
0x121a   :  { %2119 = vmatpush3.bf16.msra.mxu0 %v2149_v47 }
0x121b   :  { %2120 = vmatprep.subr.bf16.mxu0 %v2150_v48 }
0x121e   :  { %2121 = vmatpush3.bf16.msra.mxu0 %v2150_v48 }
0x121f   :  { %2122 = vmatprep.subr.bf16.mxu0 %v2151_v49 }
0x1222   :  { %2123 = vmatpush3.bf16.msra.mxu0 %v2151_v49 }
0x1223   :  { %2124 = vmatprep.subr.bf16.mxu0 %v2152_v51 }
0x1226   :  { %2125 = vmatpush3.bf16.msra.mxu0 %v2152_v51 }
0x1290   :  { %v1542_v32 = vpop.xlane.xlu1 %1541 }
0x1291   :  { %v1546_v33 = vmul.f32 0.03125, %v1542_v32 }
0x1293   :  { %v1550_v35 = vadd.f32 1e-05, %v1546_v33 }
0x1295   :  { %2199 = vrsqrt.f32 %v1550_v35 }
0x129f   :  { %v2200_v39 = vpop.eup %2199 }
0x12a0   :  { %v1558_v41 = vmul.f32 %v2200_v39, %v1526_v26 }
0x12a2   :  { %v1569_v42 = vmul.f32 %v1868_v34, %v1558_v41  ;;  %v1875_v41 = vld [vmem:[%s2728_s13] ss:$0 sm:$0xff] }
0x12a4   :  { %v1580_v63 = vadd.f32 %v1869_v1, %v1569_v42 }
0x12a6   :  { %v1582_v62 = vpack.c.bf16 %v1580_v63, %v1579_v44 }
0x12a8   :  { %2107 = vmatmul.mubr.msk.bf16.vlgmr.msra.gmra.mrb[56].mxu1 %vm56_vm0, %v1582_v62 }
0x137b   :  { %v2108_v53 = vpop.f32.mrb[56].mxu1 }
0x137c   :  { %v1655_v54 = vadd.f32 %v2108_v53, %v1870_v52  ;;  %v1646_v55 = vpop.f32.mrb[57].mxu1 }
0x137d   :  { %v1647_v56 = vadd.f32 %v1870_v52, %v1646_v55  ;;  %v2109_v57 = vpop.f32.mrb[58].mxu1 }
0x137e   :  { %v1667_v8 = vmul.f32 0.044715, %v1655_v54  ;;  %v1658_v59 = vadd.f32 %v2109_v57, %v1870_v52  ;;  %v1649_v16 = vpop.f32.mrb[59].mxu1  ;;  %v1663_v20 = vmul.f32 0.5, %v1655_v54 }
0x137f   :  { %v1665_v60 = vmul.f32 0.044715, %v1647_v56  ;;  %v1650_v3 = vadd.f32 %v1870_v52, %v1649_v16  ;;  %v1661_v30 = vmul.f32 0.5, %v1647_v56 }
0x1380   :  { %v1671_v5 = vmul.f32 %v1667_v8, %v1655_v54  ;;  %v1668_v50 = vmul.f32 0.044715, %v1658_v59  ;;  %v1664_v28 = vmul.f32 0.5, %v1658_v59 }
0x1381   :  { %v1669_v6 = vmul.f32 %v1665_v60, %v1647_v56  ;;  %v1666_v7 = vmul.f32 0.044715, %v1650_v3  ;;  %v1662_v31 = vmul.f32 0.5, %v1650_v3 }
0x1382   :  { %v1675_v9 = vmul.f32 %v1671_v5, %v1655_v54  ;;  %v1672_v10 = vmul.f32 %v1668_v50, %v1658_v59 }
0x1383   :  { %v1673_v15 = vmul.f32 %v1669_v6, %v1647_v56  ;;  %v1670_v26 = vmul.f32 %v1666_v7, %v1650_v3 }
0x1384   :  { %v1679_v0 = vadd.f32 %v1675_v9, %v1655_v54  ;;  %v1676_v11 = vmul.f32 %v1672_v10, %v1658_v59 }
0x1385   :  { %v1674_v12 = vmul.f32 %v1670_v26, %v1650_v3  ;;  %v1677_v13 = vadd.f32 %v1673_v15, %v1647_v56 }
0x1386   :  { %v1683_v43 = vmul.f32 0.7978846, %v1679_v0  ;;  %v1680_v17 = vadd.f32 %v1676_v11, %v1658_v59 }
0x1387   :  { %v1678_v4 = vadd.f32 %v1674_v12, %v1650_v3  ;;  %v1681_v34 = vmul.f32 0.7978846, %v1677_v13 }
0x1388   :  { %2201 = vtanh.f32 %v1683_v43  ;;  %v1684_v2 = vmul.f32 0.7978846, %v1680_v17 }
0x1389   :  { %v1682_v21 = vmul.f32 0.7978846, %v1678_v4  ;;  %2203 = vtanh.f32 %v1681_v34 }
0x138a   :  { %2205 = vtanh.f32 %v1684_v2 }
0x138b   :  { %2207 = vtanh.f32 %v1682_v21 }
0x1392   :  { %v2202_v22 = vpop.eup %2201 }
0x1393   :  { %v2204_v1 = vpop.eup %2203  ;;  %v1691_v23 = vadd.f32 1.0, %v2202_v22 }
0x1394   :  { %v2206_v24 = vpop.eup %2205  ;;  %v1689_v25 = vadd.f32 1.0, %v2204_v1 }
0x1395   :  { %v2208_v27 = vpop.eup %2207  ;;  %v1692_v29 = vadd.f32 1.0, %v2206_v24  ;;  %v1695_v33 = vmul.f32 %v1691_v23, %v1663_v20 }
0x1396   :  { %v1690_v32 = vadd.f32 1.0, %v2208_v27  ;;  %v1693_v36 = vmul.f32 %v1689_v25, %v1661_v30 }
0x1397   :  { %v1696_v35 = vmul.f32 %v1692_v29, %v1664_v28 }
0x1398   :  { %v1694_v38 = vmul.f32 %v1690_v32, %v1662_v31 }
0x1399   :  { %v1698_v39 = vpack.c.bf16 %v1696_v35, %v1695_v33 }
0x139a   :  { %v1697_v40 = vpack.c.bf16 %v1694_v38, %v1693_v36 }
0x139c   :  { %2126 = vmatprep.mubr.bf16.mxu0 %v1697_v40 }
0x139d   :  { %2127 = vmatmul.mubr.bf16.vlgmr.msra.gmra.mrb[44].mxu0 %v1698_v39 }
0x1470   :  { %v2128_v42 = vpop.f32.mrb[44].mxu0 }
0x1471   :  { %v1813_v44 = vadd.f32 %v2128_v42, %v1875_v41  ;;  %v1804_v63 = vpop.f32.mrb[45].mxu0 }
0x1472   :  { %v1805_v62 = vadd.f32 %v1875_v41, %v1804_v63  ;;  %v2129_v45 = vpop.f32.mrb[46].mxu0 }
0x1473   :  { %v1821_v46 = vadd.f32 %v1813_v44, %v2606_v19  ;;  %v1816_v37 = vadd.f32 %v2129_v45, %v1875_v41  ;;  %v1807_v58 = vpop.f32.mrb[47].mxu0 }
0x1474   :  { %v1819_v47 = vadd.f32 %v1805_v62, %v2591_v18  ;;  %v1808_v48 = vadd.f32 %v1875_v41, %v1807_v58 }
0x1475   :  { %1825 = vst.msk [vmem:[%s2729_s14 + $0x10] sm:$0xff] %vm56_vm0, %v1821_v46  ;;  %v1822_v49 = vadd.f32 %v1816_v37, %v2642_v61 }
0x1476   :  { %1823 = vst.msk [vmem:[%s2729_s14] sm:$0xff] %vm56_vm0, %v1819_v47  ;;  %v1820_v51 = vadd.f32 %v1808_v48, %v2602_v14 }
0x1477   :  { %1826 = vst.msk [vmem:[%s2729_s14 + $0x18] sm:$0xff] %vm56_vm0, %v1822_v49 }
0x1478   :  { %1824 = vst.msk [vmem:[%s2729_s14 + $0x8] sm:$0xff] %vm56_vm0, %v1820_v51 }

</bundles_post_ra>
